<compile_context>
chip_gen: v7x
topology: tpu7x:2x2x1
jax: 0.10.0
libtpu: 0.0.40
codegen_flags: <defaults>
</compile_context>

<pallas_src>
import functools

import jax
import jax.numpy as jnp
from jax import lax
from jax.experimental import pallas as pl
from jax.experimental.pallas import tpu as pltpu


# ---------------------------------------------------------------------------
# Helpers
# ---------------------------------------------------------------------------
def _softplus(x):
    """Overflow-safe softplus (same as F.softplus / jax.nn.softplus)."""
    return jnp.maximum(x, 0.0) + jnp.log1p(jnp.exp(-jnp.abs(x)))


def _pick_tile(dim, max_tile, align=128):
    """Largest multiple-of-`align` divisor of `dim` that is <= max_tile,
    falling back to the full dimension (full-extent blocks are always legal)."""
    if dim <= max_tile:
        return dim
    t = (max_tile // align) * align
    while t >= align:
        if dim % t == 0:
            return t
        t -= align
    return dim


# ---------------------------------------------------------------------------
# Fused forward + KLD kernel
# ---------------------------------------------------------------------------
def _lrt_fused_kernel(x_ref, wmu_ref, wrho_ref, bmu_ref, brho_ref,
                      zw_ref, zb_ref,
                      act_ref, kld_ref,
                      gamma_acc, delta_acc, *, prior_sigma):
    """Grid = (n_out tiles [parallel], n_in tiles [arbitrary, innermost]).

    Per step: one (B,tk) x-block, one (tn,tk) w_mu block, one (tn,tk) w_rho
    block.  softplus(w_rho) is computed once and feeds both the delta matmul
    and the KLD partial reduction.
    """
    k = pl.program_id(1)
    k_last = pl.num_programs(1) - 1

    x = x_ref[...].astype(jnp.float32)                        # (B, tk)
    w_mu = wmu_ref[...].astype(jnp.float32)                   # (tn, tk)
    w_sigma = _softplus(wrho_ref[...].astype(jnp.float32))    # (tn, tk)

    @pl.when(k == 0)
    def _init():
        gamma_acc[...] = jnp.zeros_like(gamma_acc)
        delta_acc[...] = jnp.zeros_like(delta_acc)

    # Contract over n_in with weights in native (n_out, n_in) layout: 'bi,oi->bo'
    dims = (((1,), (1,)), ((), ()))
    gamma_acc[...] += lax.dot_general(x, w_mu, dims,
                                      preferred_element_type=jnp.float32)
    delta_acc[...] += lax.dot_general(x * x, w_sigma * w_sigma, dims,
                                      preferred_element_type=jnp.float32)

    # ---- KLD: shares w_sigma with the delta path (computed only once) ----
    ps = jnp.float32(prior_sigma)
    inv_2ps2 = jnp.float32(1.0 / (2.0 * prior_sigma * prior_sigma))
    log_ps = jnp.float32(jnp.log(prior_sigma))

    term_w = (log_ps - jnp.log(w_sigma)
              + (w_sigma * w_sigma + w_mu * w_mu) * inv_2ps2
              - 0.5)                                          # (tn, tk)
    # Reduce over n_in on the MXU -> lane-major (1, tn) per-output-unit partial.
    ones_row = jnp.ones((1, term_w.shape[1]), jnp.float32)
    kld_w_row = lax.dot_general(ones_row, term_w, dims,
                                preferred_element_type=jnp.float32)  # (1, tn)

    @pl.when(k == 0)
    def _kld_init():
        b_mu = bmu_ref[...].astype(jnp.float32)               # (1, tn)
        b_sigma = _softplus(brho_ref[...].astype(jnp.float32))
        kld_ref[...] = (log_ps - jnp.log(b_sigma)
                        + (b_sigma * b_sigma + b_mu * b_mu) * inv_2ps2
                        - 0.5)

    kld_ref[...] += kld_w_row

    # ---- Finalize activations on the last K step (bias + LRT noise) ----
    @pl.when(k == k_last)
    def _finalize():
        b_mu = bmu_ref[...].astype(jnp.float32)
        b_sigma = _softplus(brho_ref[...].astype(jnp.float32))
        act_ref[...] = (gamma_acc[...]
                        + jnp.sqrt(delta_acc[...] + 1e-32)
                        * zw_ref[...].astype(jnp.float32)
                        + b_mu
                        + b_sigma * zb_ref[...].astype(jnp.float32)
                        ).astype(act_ref.dtype)


# ---------------------------------------------------------------------------
# Wrapper
# ---------------------------------------------------------------------------
def lrt_forward_and_kld(x, w_mu, w_rho, bias_mu, bias_rho, zeta_w, zeta_b,
                        prior_sigma=1.0, block_n=256, block_k=256):
    """x: (B, n_in); w_mu/w_rho: (n_out, n_in); bias_*: (n_out,);
    zeta_w: (B, n_out); zeta_b: (n_out,).
    Returns (activations (B, n_out), scalar KLD)."""
    B, n_in = x.shape
    n_out = w_mu.shape[0]

    tn = _pick_tile(n_out, block_n)
    tk = _pick_tile(n_in, block_k)
    grid = (n_out // tn, n_in // tk)

    bias_mu_r = bias_mu.reshape(1, n_out)
    bias_rho_r = bias_rho.reshape(1, n_out)
    zeta_b_r = zeta_b.reshape(1, n_out)

    kernel = functools.partial(_lrt_fused_kernel, prior_sigma=float(prior_sigma))

    act, kld_row = pl.pallas_call(
        kernel,
        out_shape=(jax.ShapeDtypeStruct((B, n_out), jnp.float32),
                   jax.ShapeDtypeStruct((1, n_out), jnp.float32)),
        grid=grid,
        in_specs=[
            pl.BlockSpec((B, tk),  lambda i, k: (0, k)),   # x
            pl.BlockSpec((tn, tk), lambda i, k: (i, k)),   # w_mu   (native layout)
            pl.BlockSpec((tn, tk), lambda i, k: (i, k)),   # w_rho  (native layout)
            pl.BlockSpec((1, tn),  lambda i, k: (0, i)),   # bias_mu
            pl.BlockSpec((1, tn),  lambda i, k: (0, i)),   # bias_rho
            pl.BlockSpec((B, tn),  lambda i, k: (0, i)),   # zeta_w
            pl.BlockSpec((1, tn),  lambda i, k: (0, i)),   # zeta_b
        ],
        out_specs=(
            pl.BlockSpec((B, tn), lambda i, k: (0, i)),    # activations
            pl.BlockSpec((1, tn), lambda i, k: (0, i)),    # per-unit KLD partials
        ),
        scratch_shapes=[
            pltpu.VMEM((B, tn), jnp.float32),              # gamma accumulator
            pltpu.VMEM((B, tn), jnp.float32),              # delta accumulator
        ],
        compiler_params=pltpu.CompilerParams(
            dimension_semantics=("parallel", "arbitrary")),
    )(x, w_mu, w_rho, bias_mu_r, bias_rho_r, zeta_w, zeta_b_r)

    return act, jnp.sum(kld_row)


# ---------------------------------------------------------------------------
# Pure-JAX reference (for sanity checking)
# ---------------------------------------------------------------------------
def _reference_forward(x, w_mu, w_rho, bias_mu, bias_rho, zeta_w, zeta_b):
    w_sigma = _softplus(w_rho)
    b_sigma = _softplus(bias_rho)
    gamma = x @ w_mu.T
    delta = (x * x) @ (w_sigma * w_sigma).T
    return gamma + jnp.sqrt(delta + 1e-32) * zeta_w + bias_mu + b_sigma * zeta_b


def _reference_kld(w_mu, w_rho, bias_mu, bias_rho, prior_sigma=1.0):
    w_sigma = _softplus(w_rho)
    b_sigma = _softplus(bias_rho)
    kld_w = jnp.sum(jnp.log(prior_sigma / w_sigma)
                    + (w_sigma ** 2 + w_mu ** 2) / (2 * prior_sigma ** 2) - 0.5)
    kld_b = jnp.sum(jnp.log(prior_sigma / b_sigma)
                    + (b_sigma ** 2 + bias_mu ** 2) / (2 * prior_sigma ** 2) - 0.5)
    return kld_w + kld_b


# ---------------------------------------------------------------------------
if __name__ == "__main__":
    # Small linear-layer shapes: batch=8, n_in=512, n_out=512 -> grid (2, 2).
    B, n_in, n_out = 8, 512, 512
    prior_sigma = 1.0  # sigma1 = exp(-0)

    key = jax.random.PRNGKey(0)
    k_wmu, k_wrho, k_bmu, k_brho, k_x, k_zw, k_zb = jax.random.split(key, 7)

    # Parameter init mirroring the PyTorch __init__ ranges.
    w_mu = jax.random.uniform(k_wmu, (n_out, n_in), jnp.float32, -0.2, 0.2)
    w_rho = jax.random.uniform(k_wrho, (n_out, n_in), jnp.float32, -5.0, -4.0)
    bias_mu = jax.random.uniform(k_bmu, (n_out,), jnp.float32, -0.2, 0.2)
    bias_rho = jax.random.uniform(k_brho, (n_out,), jnp.float32, -5.0, -4.0)

    # Input and the Normal(0,1) reparameterization noise (sampled in glue,
    # consumed in-kernel, matching torch.distributions.Normal(0,1).sample()).
    x = jax.random.normal(k_x, (B, n_in), jnp.float32)
    zeta_w = jax.random.normal(k_zw, (B, n_out), jnp.float32)
    zeta_b = jax.random.normal(k_zb, (n_out,), jnp.float32)

    activations, kld = lrt_forward_and_kld(
        x, w_mu, w_rho, bias_mu, bias_rho, zeta_w, zeta_b, prior_sigma)
    jax.block_until_ready((activations, kld))

    # Correctness check against pure-JAX reference.
    ref_act = _reference_forward(x, w_mu, w_rho, bias_mu, bias_rho, zeta_w, zeta_b)
    ref_kld = _reference_kld(w_mu, w_rho, bias_mu, bias_rho, prior_sigma)
    assert activations.shape == (B, n_out)
    assert jnp.allclose(activations, ref_act, atol=2e-3, rtol=2e-3)
    assert jnp.allclose(kld, ref_kld, rtol=2e-3, atol=1.0)

    print("KERNEL_OK")
</pallas_src>

<mosaic_0001>
module attributes {stable_mosaic.version = 11 : i64} {
  func.func @_lrt_fused_kernel(%arg0: i32, %arg1: i32, %arg2: memref<8x256xf32, #tpu.memory_space<vmem>>, %arg3: memref<256x256xf32, #tpu.memory_space<vmem>>, %arg4: memref<256x256xf32, #tpu.memory_space<vmem>>, %arg5: memref<1x256xf32, #tpu.memory_space<vmem>>, %arg6: memref<1x256xf32, #tpu.memory_space<vmem>>, %arg7: memref<8x256xf32, #tpu.memory_space<vmem>>, %arg8: memref<1x256xf32, #tpu.memory_space<vmem>>, %arg9: memref<8x256xf32, #tpu.memory_space<vmem>>, %arg10: memref<1x256xf32, #tpu.memory_space<vmem>>, %arg11: memref<8x256xf32, #tpu.memory_space<vmem>>, %arg12: memref<8x256xf32, #tpu.memory_space<vmem>>) attributes {dimension_semantics = [#tpu.dimension_semantics<parallel>, #tpu.dimension_semantics<arbitrary>], iteration_bounds = array<i64: 2, 2>, scalar_prefetch = 0 : i64, scratch_operands = 2 : i64, tpu.core_type = #tpu.core_type<tc>, window_params = [{transform_indices = @transform_0, window_bounds = array<i64: 8, 256>}, {transform_indices = @transform_1, window_bounds = array<i64: 256, 256>}, {transform_indices = @transform_2, window_bounds = array<i64: 256, 256>}, {transform_indices = @transform_3, window_bounds = array<i64: 1, 256>}, {transform_indices = @transform_4, window_bounds = array<i64: 1, 256>}, {transform_indices = @transform_5, window_bounds = array<i64: 8, 256>}, {transform_indices = @transform_6, window_bounds = array<i64: 1, 256>}, {transform_indices = @transform_7, window_bounds = array<i64: 8, 256>}, {transform_indices = @transform_8, window_bounds = array<i64: 1, 256>}]} {
    %c0 = arith.constant 0 : index
    %c0_0 = arith.constant 0 : index
    %0 = vector.load %arg2[%c0, %c0_0] : memref<8x256xf32, #tpu.memory_space<vmem>>, vector<8x256xf32>
    %c0_1 = arith.constant 0 : index
    %c0_2 = arith.constant 0 : index
    %1 = vector.load %arg3[%c0_1, %c0_2] : memref<256x256xf32, #tpu.memory_space<vmem>>, vector<256x256xf32>
    %c0_3 = arith.constant 0 : index
    %c0_4 = arith.constant 0 : index
    %2 = vector.load %arg4[%c0_3, %c0_4] : memref<256x256xf32, #tpu.memory_space<vmem>>, vector<256x256xf32>
    %cst = arith.constant 0.000000e+00 : f32
    %3 = vector.broadcast %cst : f32 to vector<256x256xf32>
    %4 = arith.maximumf %2, %3 : vector<256x256xf32>
    %5 = math.absf %2 : vector<256x256xf32>
    %cst_5 = arith.constant 0.000000e+00 : f32
    %6 = vector.broadcast %cst_5 : f32 to vector<256x256xf32>
    %7 = arith.subf %6, %5 : vector<256x256xf32>
    %8 = math.exp %7 : vector<256x256xf32>
    %9 = math.log1p %8 : vector<256x256xf32>
    %10 = arith.addf %4, %9 : vector<256x256xf32>
    %c0_i32 = arith.constant 0 : i32
    %11 = arith.cmpi eq, %arg1, %c0_i32 : i32
    %12 = arith.extui %11 : i1 to i32
    %c0_i32_6 = arith.constant 0 : i32
    %13 = arith.cmpi ne, %12, %c0_i32_6 : i32
    scf.if %13 {
      %cst_30 = arith.constant 0.000000e+00 : f32
      %47 = vector.broadcast %cst_30 : f32 to vector<8x256xf32>
      %c0_31 = arith.constant 0 : index
      %c0_32 = arith.constant 0 : index
      %48 = vector.load %arg11[%c0_31, %c0_32] : memref<8x256xf32, #tpu.memory_space<vmem>>, vector<8x256xf32>
      tpu.vector_store %arg11[%c0_31, %c0_32], %47 {strides = array<i32>} : memref<8x256xf32, #tpu.memory_space<vmem>>, vector<8x256xf32>,
      %cst_33 = arith.constant 0.000000e+00 : f32
      %49 = vector.broadcast %cst_33 : f32 to vector<8x256xf32>
      %c0_34 = arith.constant 0 : index
      %c0_35 = arith.constant 0 : index
      %50 = vector.load %arg12[%c0_34, %c0_35] : memref<8x256xf32, #tpu.memory_space<vmem>>, vector<8x256xf32>
      tpu.vector_store %arg12[%c0_34, %c0_35], %49 {strides = array<i32>} : memref<8x256xf32, #tpu.memory_space<vmem>>, vector<8x256xf32>,
    } else {
    }
    %c0_7 = arith.constant 0 : index
    %c0_8 = arith.constant 0 : index
    %14 = vector.load %arg11[%c0_7, %c0_8] : memref<8x256xf32, #tpu.memory_space<vmem>>, vector<8x256xf32>
    %cst_9 = arith.constant dense<0.000000e+00> : vector<8x256xf32>
    %15 = tpu.matmul %0, %1, %cst_9 {dimension_numbers = #tpu.dot_dimension_numbers<[1], [1], [0], [0], [0, 0, 1, 0], [], []>} : vector<8x256xf32>, vector<256x256xf32>, vector<8x256xf32> -> vector<8x256xf32>
    %16 = arith.addf %14, %15 : vector<8x256xf32>
    %c0_10 = arith.constant 0 : index
    %c0_11 = arith.constant 0 : index
    %17 = vector.load %arg11[%c0_10, %c0_11] : memref<8x256xf32, #tpu.memory_space<vmem>>, vector<8x256xf32>
    tpu.vector_store %arg11[%c0_10, %c0_11], %16 {strides = array<i32>} : memref<8x256xf32, #tpu.memory_space<vmem>>, vector<8x256xf32>,
    %c0_12 = arith.constant 0 : index
    %c0_13 = arith.constant 0 : index
    %18 = vector.load %arg12[%c0_12, %c0_13] : memref<8x256xf32, #tpu.memory_space<vmem>>, vector<8x256xf32>
    %19 = arith.mulf %0, %0 : vector<8x256xf32>
    %20 = arith.mulf %10, %10 : vector<256x256xf32>
    %cst_14 = arith.constant dense<0.000000e+00> : vector<8x256xf32>
    %21 = tpu.matmul %19, %20, %cst_14 {dimension_numbers = #tpu.dot_dimension_numbers<[1], [1], [0], [0], [0, 0, 1, 0], [], []>} : vector<8x256xf32>, vector<256x256xf32>, vector<8x256xf32> -> vector<8x256xf32>
    %22 = arith.addf %18, %21 : vector<8x256xf32>
    %c0_15 = arith.constant 0 : index
    %c0_16 = arith.constant 0 : index
    %23 = vector.load %arg12[%c0_15, %c0_16] : memref<8x256xf32, #tpu.memory_space<vmem>>, vector<8x256xf32>
    tpu.vector_store %arg12[%c0_15, %c0_16], %22 {strides = array<i32>} : memref<8x256xf32, #tpu.memory_space<vmem>>, vector<8x256xf32>,
    %cst_17 = arith.constant 1.000000e+00 : f32
    %24 = math.log %cst_17 : f32
    %25 = math.log %10 : vector<256x256xf32>
    %26 = vector.broadcast %24 : f32 to vector<256x256xf32>
    %27 = arith.subf %26, %25 : vector<256x256xf32>
    %28 = arith.mulf %10, %10 : vector<256x256xf32>
    %29 = arith.mulf %1, %1 : vector<256x256xf32>
    %30 = arith.addf %28, %29 : vector<256x256xf32>
    %cst_18 = arith.constant 5.000000e-01 : f32
    %31 = vector.broadcast %cst_18 : f32 to vector<256x256xf32>
    %32 = arith.mulf %30, %31 : vector<256x256xf32>
    %33 = arith.addf %27, %32 : vector<256x256xf32>
    %cst_19 = arith.constant 5.000000e-01 : f32
    %34 = vector.broadcast %cst_19 : f32 to vector<256x256xf32>
    %35 = arith.subf %33, %34 : vector<256x256xf32>
    %cst_20 = arith.constant 1.000000e+00 : f32
    %36 = vector.broadcast %cst_20 : f32 to vector<1x256xf32>
    %cst_21 = arith.constant dense<0.000000e+00> : vector<1x256xf32>
    %37 = tpu.matmul %36, %35, %cst_21 {dimension_numbers = #tpu.dot_dimension_numbers<[1], [1], [0], [0], [0, 0, 1, 0], [], []>} : vector<1x256xf32>, vector<256x256xf32>, vector<1x256xf32> -> vector<1x256xf32>
    %c0_i32_22 = arith.constant 0 : i32
    %38 = arith.cmpi eq, %arg1, %c0_i32_22 : i32
    %39 = arith.extui %38 : i1 to i32
    %cst_23 = arith.constant 5.000000e-01 : f32
    %c0_i32_24 = arith.constant 0 : i32
    %40 = arith.cmpi ne, %39, %c0_i32_24 : i32
    scf.if %40 {
      %c0_30 = arith.constant 0 : index
      %c0_31 = arith.constant 0 : index
      %47 = vector.load %arg5[%c0_30, %c0_31] : memref<1x256xf32, #tpu.memory_space<vmem>>, vector<1x256xf32>
      %c0_32 = arith.constant 0 : index
      %c0_33 = arith.constant 0 : index
      %48 = vector.load %arg6[%c0_32, %c0_33] : memref<1x256xf32, #tpu.memory_space<vmem>>, vector<1x256xf32>
      %cst_34 = arith.constant 0.000000e+00 : f32
      %49 = vector.broadcast %cst_34 : f32 to vector<1x256xf32>
      %50 = arith.maximumf %48, %49 : vector<1x256xf32>
      %51 = math.absf %48 : vector<1x256xf32>
      %cst_35 = arith.constant 0.000000e+00 : f32
      %52 = vector.broadcast %cst_35 : f32 to vector<1x256xf32>
      %53 = arith.subf %52, %51 : vector<1x256xf32>
      %54 = math.exp %53 : vector<1x256xf32>
      %55 = math.log1p %54 : vector<1x256xf32>
      %56 = arith.addf %50, %55 : vector<1x256xf32>
      %57 = math.log %56 : vector<1x256xf32>
      %58 = vector.broadcast %24 : f32 to vector<1x256xf32>
      %59 = arith.subf %58, %57 : vector<1x256xf32>
      %60 = arith.mulf %56, %56 : vector<1x256xf32>
      %61 = arith.mulf %47, %47 : vector<1x256xf32>
      %62 = arith.addf %60, %61 : vector<1x256xf32>
      %63 = vector.broadcast %cst_23 : f32 to vector<1x256xf32>
      %64 = arith.mulf %62, %63 : vector<1x256xf32>
      %65 = arith.addf %59, %64 : vector<1x256xf32>
      %cst_36 = arith.constant 5.000000e-01 : f32
      %66 = vector.broadcast %cst_36 : f32 to vector<1x256xf32>
      %67 = arith.subf %65, %66 : vector<1x256xf32>
      %c0_37 = arith.constant 0 : index
      %c0_38 = arith.constant 0 : index
      %68 = vector.load %arg10[%c0_37, %c0_38] : memref<1x256xf32, #tpu.memory_space<vmem>>, vector<1x256xf32>
      tpu.vector_store %arg10[%c0_37, %c0_38], %67 {strides = array<i32>} : memref<1x256xf32, #tpu.memory_space<vmem>>, vector<1x256xf32>,
    } else {
    }
    %c0_25 = arith.constant 0 : index
    %c0_26 = arith.constant 0 : index
    %41 = vector.load %arg10[%c0_25, %c0_26] : memref<1x256xf32, #tpu.memory_space<vmem>>, vector<1x256xf32>
    %42 = arith.addf %41, %37 : vector<1x256xf32>
    %c0_27 = arith.constant 0 : index
    %c0_28 = arith.constant 0 : index
    %43 = vector.load %arg10[%c0_27, %c0_28] : memref<1x256xf32, #tpu.memory_space<vmem>>, vector<1x256xf32>
    tpu.vector_store %arg10[%c0_27, %c0_28], %42 {strides = array<i32>} : memref<1x256xf32, #tpu.memory_space<vmem>>, vector<1x256xf32>,
    %c1_i32 = arith.constant 1 : i32
    %44 = arith.cmpi eq, %arg1, %c1_i32 : i32
    %45 = arith.extui %44 : i1 to i32
    %c0_i32_29 = arith.constant 0 : i32
    %46 = arith.cmpi ne, %45, %c0_i32_29 : i32
    scf.if %46 {
      %c0_30 = arith.constant 0 : index
      %c0_31 = arith.constant 0 : index
      %47 = vector.load %arg5[%c0_30, %c0_31] : memref<1x256xf32, #tpu.memory_space<vmem>>, vector<1x256xf32>
      %c0_32 = arith.constant 0 : index
      %c0_33 = arith.constant 0 : index
      %48 = vector.load %arg6[%c0_32, %c0_33] : memref<1x256xf32, #tpu.memory_space<vmem>>, vector<1x256xf32>
      %cst_34 = arith.constant 0.000000e+00 : f32
      %49 = vector.broadcast %cst_34 : f32 to vector<1x256xf32>
      %50 = arith.maximumf %48, %49 : vector<1x256xf32>
      %51 = math.absf %48 : vector<1x256xf32>
      %cst_35 = arith.constant 0.000000e+00 : f32
      %52 = vector.broadcast %cst_35 : f32 to vector<1x256xf32>
      %53 = arith.subf %52, %51 : vector<1x256xf32>
      %54 = math.exp %53 : vector<1x256xf32>
      %55 = math.log1p %54 : vector<1x256xf32>
      %56 = arith.addf %50, %55 : vector<1x256xf32>
      %c0_36 = arith.constant 0 : index
      %c0_37 = arith.constant 0 : index
      %57 = vector.load %arg11[%c0_36, %c0_37] : memref<8x256xf32, #tpu.memory_space<vmem>>, vector<8x256xf32>
      %c0_38 = arith.constant 0 : index
      %c0_39 = arith.constant 0 : index
      %58 = vector.load %arg12[%c0_38, %c0_39] : memref<8x256xf32, #tpu.memory_space<vmem>>, vector<8x256xf32>
      %cst_40 = arith.constant 1.000000e-32 : f32
      %59 = vector.broadcast %cst_40 : f32 to vector<8x256xf32>
      %60 = arith.addf %58, %59 : vector<8x256xf32>
      %61 = math.sqrt %60 : vector<8x256xf32>
      %c0_41 = arith.constant 0 : index
      %c0_42 = arith.constant 0 : index
      %62 = vector.load %arg7[%c0_41, %c0_42] : memref<8x256xf32, #tpu.memory_space<vmem>>, vector<8x256xf32>
      %63 = arith.mulf %61, %62 : vector<8x256xf32>
      %64 = arith.addf %57, %63 : vector<8x256xf32>
      %65 = vector.broadcast %47 : vector<1x256xf32> to vector<8x256xf32>
      %66 = arith.addf %64, %65 : vector<8x256xf32>
      %c0_43 = arith.constant 0 : index
      %c0_44 = arith.constant 0 : index
      %67 = vector.load %arg8[%c0_43, %c0_44] : memref<1x256xf32, #tpu.memory_space<vmem>>, vector<1x256xf32>
      %68 = arith.mulf %56, %67 : vector<1x256xf32>
      %69 = vector.broadcast %68 : vector<1x256xf32> to vector<8x256xf32>
      %70 = arith.addf %66, %69 : vector<8x256xf32>
      %c0_45 = arith.constant 0 : index
      %c0_46 = arith.constant 0 : index
      %71 = vector.load %arg9[%c0_45, %c0_46] : memref<8x256xf32, #tpu.memory_space<vmem>>, vector<8x256xf32>
      tpu.vector_store %arg9[%c0_45, %c0_46], %70 {strides = array<i32>} : memref<8x256xf32, #tpu.memory_space<vmem>>, vector<8x256xf32>,
    } else {
    }
    return
  }
  func.func @transform_0(%arg0: i32, %arg1: i32) -> (i32, i32) {
    %c0_i32 = arith.constant 0 : i32
    %c0_i32_0 = arith.constant 0 : i32
    return %c0_i32, %arg1 : i32, i32
  }
  func.func @transform_1(%arg0: i32, %arg1: i32) -> (i32, i32) {
    %c0_i32 = arith.constant 0 : i32
    return %arg0, %arg1 : i32, i32
  }
  func.func @transform_2(%arg0: i32, %arg1: i32) -> (i32, i32) {
    %c0_i32 = arith.constant 0 : i32
    return %arg0, %arg1 : i32, i32
  }
  func.func @transform_3(%arg0: i32, %arg1: i32) -> (i32, i32) {
    %c0_i32 = arith.constant 0 : i32
    %c0_i32_0 = arith.constant 0 : i32
    return %c0_i32, %arg0 : i32, i32
  }
  func.func @transform_4(%arg0: i32, %arg1: i32) -> (i32, i32) {
    %c0_i32 = arith.constant 0 : i32
    %c0_i32_0 = arith.constant 0 : i32
    return %c0_i32, %arg0 : i32, i32
  }
  func.func @transform_5(%arg0: i32, %arg1: i32) -> (i32, i32) {
    %c0_i32 = arith.constant 0 : i32
    %c0_i32_0 = arith.constant 0 : i32
    return %c0_i32, %arg0 : i32, i32
  }
  func.func @transform_6(%arg0: i32, %arg1: i32) -> (i32, i32) {
    %c0_i32 = arith.constant 0 : i32
    %c0_i32_0 = arith.constant 0 : i32
    return %c0_i32, %arg0 : i32, i32
  }
  func.func @transform_7(%arg0: i32, %arg1: i32) -> (i32, i32) {
    %c0_i32 = arith.constant 0 : i32
    %c0_i32_0 = arith.constant 0 : i32
    return %c0_i32, %arg0 : i32, i32
  }
  func.func @transform_8(%arg0: i32, %arg1: i32) -> (i32, i32) {
    %c0_i32 = arith.constant 0 : i32
    %c0_i32_0 = arith.constant 0 : i32
    return %c0_i32, %arg0 : i32, i32
  }
}

</mosaic_0001>

<bundles_post_ra>
// kernel: tpu_custom_call.1
= control target key start
LH: loop header
LB: loop body
LE: loop exit
PB: predicated region body
PF: predicated region fallthrough
CT: control target
= control target key end

     0   :  { %s8042_s0 = inlined_call_operand.hbm [shape: f32[8,512], index: 0, kind: input, shape index: {}]   ;;  %s8043_s1 = inlined_call_operand.hbm [shape: f32[512,512], index: 1, kind: input, shape index: {}]   ;;  %s8044_s2 = inlined_call_operand.hbm [shape: f32[512,512], index: 2, kind: input, shape index: {}]   ;;  %s8045_s3 = inlined_call_operand.vmem [shape: f32[1,512], index: 3, kind: input, shape index: {}]   ;;  %s8046_s4 = inlined_call_operand.vmem [shape: f32[1,512], index: 4, kind: input, shape index: {}]   ;;  %s8047_s5 = inlined_call_operand.hbm [shape: f32[8,512], index: 5, kind: input, shape index: {}]   ;;  %s8048_s6 = inlined_call_operand.vmem [shape: f32[1,512], index: 6, kind: input, shape index: {}]   ;;  %s8049_s7 = inlined_call_operand.hbm [shape: f32[8,512], index: 7, kind: output, shape index: {0}]   ;;  %s8050_s8 = inlined_call_operand.hbm [shape: f32[1,512], index: 8, kind: output, shape index: {1}]  }
   0x1   :  { %8547 = sst [smem:[#allocation299_spill]] %s8042_s0 }
   0x2   :  { %8548 = sst [smem:[#allocation300_spill]] %s8043_s1 }
   0x3   :  { %8549 = sst [smem:[#allocation301_spill]] %s8044_s2 }
   0x4   :  { %8550 = sst [smem:[#allocation302_spill]] %s8045_s3 }
   0x5   :  { %8551 = sst [smem:[#allocation303_spill]] %s8046_s4 }
   0x6   :  { %8552 = sst [smem:[#allocation304_spill]] %s8047_s5 }
   0x7   :  { %8553 = sst [smem:[#allocation305_spill]] %s8048_s6 }
   0x8   :  { %8554 = sst [smem:[#allocation306_spill]] %s8049_s7 }
   0x9   :  { %8555 = sst [smem:[#allocation307_spill]] %s8050_s8 }
   0xa   :  { %14 = vsyncpa [#allocation5], 0 }
   0xb   :  { %16 = vsyncpa [#allocation5 + $0x1], 0 }
   0xc   :  { %17 = vsyncpa [#allocation8], 0 }
   0xd   :  { %19 = vsyncpa [#allocation8 + $0x1], 0 }
   0xe   :  { %20 = vsyncpa [#allocation11], 0 }
   0xf   :  { %22 = vsyncpa [#allocation11 + $0x1], 0 }
  0x10   :  { %23 = vsyncpa [#allocation6], 0 }
  0x11   :  { %25 = vsyncpa [#allocation6 + $0x1], 0 }
  0x12   :  { %26 = vsyncpa [#allocation14], 0 }
  0x13   :  { %28 = vsyncpa [#allocation14 + $0x1], 0  ;;  %s4037_s27 = smov 0   ;;  %s4039_s28 = smov 0  }
  0x14   :  { %s4041_s29 = smov 0   ;;  %s4043_s30 = smov 0  }
  0x15   :  { %s4045_s9 = smov 0   ;;  %s4047_s10 = smov 0  }
  0x16   :  { %s4049_s11 = smov 0   ;;  %s4051_s12 = smov 0  }
  0x17   :  { %s4053_s13 = smov 0   ;;  %s4055_s14 = smov 0  }
  0x18   :  { %s4057_s15 = smov 0   ;;  %s4059_s16 = smov 0  }
  0x19   :  { %s4061_s17 = smov 0   ;;  %s4063_s18 = smov 0  }
  0x1a LB: > { %8556 = sst [smem:[#allocation20_spill]] %s3942_s9  ;;  %p8069_p0 = scmp.eq.s32.totalorder %s3978_s18, 0  ;;  %s3978_s18 = sphi %s4063_s18, %s34_s18   ;;  %s3974_s17 = sphi %s4061_s17, %s9922_s17   ;;  %s3970_s16 = sphi %s4059_s16, %s9910_s16   ;;  %s3966_s15 = sphi %s4057_s15, %s9921_s15   ;;  %s3962_s14 = sphi %s4055_s14, %s9920_s14   ;;  %s3958_s13 = sphi %s4053_s13, %s9919_s13   ;;  %s3954_s12 = sphi %s4051_s12, %s9918_s12   ;;  %s3950_s11 = sphi %s4049_s11, %s9908_s11   ;;  %s3946_s10 = sphi %s4047_s10, %s9917_s10   ;;  %s3942_s9 = sphi %s4045_s9, %s9916_s9   ;;  %s3938_s30 = sphi %s4043_s30, %s9915_s30   ;;  %s3934_s29 = sphi %s4041_s29, %s9914_s29   ;;  %s3930_s28 = sphi %s4039_s28, %s9913_s28   ;;  %s3926_s27 = sphi %s4037_s27, %s9912_s27  }
  0x1b   : > { %8557 = sst [smem:[#allocation21_spill]] %s3954_s12  ;;  %p88_p1 = scmp.ne.s32.totalorder %s3946_s10, %s3942_s9 }
  0x1c   : > { %8558 = sst [smem:[#allocation22_spill]] %s3962_s14  ;;  %p8055_p3 = scmp.lt.s32.totalorder %s3978_s18, 4 }
  0x1d   : > { %8559 = sst [smem:[#allocation23_spill]] %s3966_s15  ;;  %p90_p4 = por %p88_p1, %p8069_p0 }
  0x1e   : > { %8560 = sst [smem:[#allocation24_spill]] %s3970_s16  ;;  %s321_s20 = sand.u32 1, %s3978_s18  }
  0x1f   : > { %s323_s21 = sand.u32 1, %s3946_s10   ;;  %s2827_s23 = sshll.u32 %s3970_s16, 1 }
  0x20   : > { %s4118_s22 = sshll.u32 %s323_s21, 9  ;;  %s2925_s24 = sshll.u32 %s3974_s17, 7 }
  0x21   : > { %s4122_s25 = sadd.s32 %s2925_s24, %s2827_s23  ;;  %s325_s26 = scalar_lea.vmem [#allocation7], %s4118_s22 }
  0x22   : > { %s335_s8 = sshll.u32 %s325_s26, 4  ;;  %s8054_s19 = sshll.u32 %s4122_s25, 7  ;;  %s4126_s8 = int_to_ptr.vmem [resolvable:$true] %s335_s8 }
  0x23   : > { %s8561_s1 = sld [smem:[#allocation300_spill]]  ;;  %p4137_p5 = pnand %p8055_p3, %p90_p4 }
  0x24   : > { %s4141_s23 = scalar_lea.sflag [#allocation8], %s321_s20 }
  0x25   : > { %p3674_p7 = pneg %p4137_p5 }
  0x29   : > { %s4133_s6 = scalar_lea.hbm %s8561_s1, %s8054_s19  ;;  %s3677_s26 = scalar_lea.hbm %s8561_s1, 32768 }
  0x2a   : > { %s3672_s24 = scalar_lea.hbm %s4133_s6, 8192  ;;  %p3678_p10 = scmp.lt.u32.totalorder %s4133_s6, %s8561_s1 }
  0x2b   : > { %p3673_p6 = scmp.ne.s32.totalorder %s4133_s6, %s3672_s24  ;;  %p3679_p11 = scmp.lt.u32.totalorder %s3677_s26, %s3672_s24 }
  0x2c   : > { %p3681_p13 = scmp.lt.u32.totalorder %s3672_s24, %s4133_s6 }
  0x2d   : > { %p3675_p8 = pnand %p3674_p7, %p3673_p6  ;;  %p3680_p12 = por %p3679_p11, %p3678_p10 }
  0x2f   : > { %p3676_p9 = pneg %p3675_p8  ;;  %p3682_p1 = por %p3681_p13, %p3680_p12 }
  0x31   : > { %p3683_p4 = pnand %p3682_p1, %p3676_p9 }
  0x33   : > { %3686 = shalt.err (!%p3683_p4)
}
  0x34   : > { %s3687_s20 = scalar_lea.vmem %s4126_s8, 8192  ;;  %s3980_s7 = smov [#allocation7]  }
  0x35   : > { %p3688_p6 = scmp.ne.s32.totalorder %s4126_s8, %s3687_s20  ;;  %s3692_s14 = sshll.u32 %s3980_s7, 4  ;;  %s3693_s14 = int_to_ptr.vmem [resolvable:$false] %s3692_s14 }
  0x36   : > { %s3694_s4 = scalar_lea.vmem %s3693_s14, 16384  ;;  %p3695_p2 = scmp.lt.s32.totalorder %s4126_s8, %s3693_s14 }
  0x37   : > { %p3690_p8 = pnand %p3688_p6, %p3674_p7  ;;  %p3696_p10 = scmp.lt.s32.totalorder %s3694_s4, %s3687_s20 }
  0x39   : > { %p3691_p3 = pneg %p3690_p8  ;;  %p3697_p11 = por %p3696_p10, %p3695_p2 }
  0x3b   : > { %p3698_p12 = pnand %p3697_p11, %p3691_p3 }
  0x3d   : > { %3701 = shalt.err (!%p3698_p12)
}
  0x3e   : > { %s8056_s19 = smov 512   ;;  %s8057_s24 = smov 256  }
  0x3f   : > { %s8058_s26 = smov 16   ;;  %s8563_s20 = sshll.u32 %s4122_s25, 7 }
  0x40   : > { %3140 = dma.hbm_to_vmem [thread:$0]  (!%p4137_p5), %s4133_s6, 8192, %s4126_s8, %s4141_s23, %s8056_s19, %s8057_s24, %s8058_s26  }
  0x41   : > { %s8564_s2 = sld [smem:[#allocation301_spill]]  ;;  %s349_s1 = scalar_lea.vmem [#allocation9], %s4118_s22 }
  0x42   : > { %s359_s3 = sshll.u32 %s349_s1, 4  ;;  %p2838_p2 = scmp.ge.s32.totalorder %s3978_s18, 1  ;;  %s4181_s3 = int_to_ptr.vmem [resolvable:$true] %s359_s3 }
  0x43   : > { %p410_p3 = scmp.lt.s32.totalorder %s3978_s18, 5  ;;  %s4189_s8 = sadd.s32 4294967295, %s3978_s18  }
  0x44   : > { %s43_s1 = sadd.s32 1, %s3970_s16  ;;  %s53_s22 = sadd.s32 1, %s3958_s13 }
  0x45   : > { %p4184_p9 = pnand %p2838_p2, %p410_p3  ;;  %p4193_p13 = scmp.ge.s32.totalorder %s43_s1, 2 }
  0x46   : > { %p60_p1 = scmp.ne.s32.totalorder %s3958_s13, %s3954_s12  ;;  %p66_p4 = scmp.ne.s32.totalorder %s3954_s12, %s3950_s11 }
  0x47   : > { %s4177_s4 = scalar_lea.hbm %s8564_s2, %s8563_s20  ;;  %p8068_p6 = scmp.eq.s32.totalorder %s4189_s8, 0 }
  0x48   : > { %s8565_s6 = scalar_select %p4184_p9, 1, 0 }
  0x49   : > { %s8566_s25 = scalar_select %p4193_p13, 1, 0 }
  0x4a   : > { %s9924_s1 = smov (%p4193_p13, %s43_s1), 0  ;;  %p4208_p8 = por %p8069_p0, %p60_p1 }
  0x4b   : > { %8567 = sst [smem:[#allocation25_spill]] %s9924_s1  ;;  %p4214_p10 = por %p8068_p6, %p66_p4 }
  0x4c   : > { %s4220_s11 = ssub.s32 %s3970_s16, %s9924_s1  ;;  %p8571_p11 = scmp.ne.s32.totalorder %s3942_s9, %s3938_s30 }
  0x4d   : > { %s8569_s7 = scalar_select %p4214_p10, 1, 0 }
  0x4e   : > { %p4227_p12 = por %p8571_p11, %p8068_p6  ;;  %p51_p2 = scmp.eq.s32.totalorder %s4220_s11, 0 }
  0x4f   : > { %8570 = sst [smem:[#allocation26_spill]] %s8569_s7  ;;  %s8067_s19 = sand.u32 1, %s3958_s13  }
  0x50   : > { %s8572_s14 = scalar_select %p4227_p12, 1, 0 }
  0x51   : > { %s2822_s24 = sshll.u32 %s8067_s19, 4  ;;  %s2924_s15 = sshll.u32 %s3970_s16, 8 }
  0x52   : > { %8573 = sst [smem:[#allocation27_spill]] %s8572_s14  ;;  %s306_s30 = scalar_lea.vmem [#allocation4], %s2822_s24 }
  0x53   : > { %s4236_s26 = scalar_select %p51_p2, %s3958_s13, %s53_s22  }
  0x54   : > { %s8574_s0 = sld [smem:[#allocation299_spill]]  ;;  %s314_s9 = sshll.u32 %s306_s30, 4  ;;  %s4244_s9 = int_to_ptr.vmem [resolvable:$true] %s314_s9 }
  0x55   : > { %p8575_p3 = scmp.lt.s32.totalorder %s3978_s18, 4  ;;  %s3702_s19 = scalar_lea.hbm %s4177_s4, 8192 }
  0x56   : > { %p3703_p4 = scmp.ne.s32.totalorder %s4177_s4, %s3702_s19  ;;  %p3708_p6 = scmp.lt.u32.totalorder %s4177_s4, %s8564_s2 }
  0x57   : > { %p4250_p1 = pnand %p8575_p3, %p4208_p8  ;;  %p3711_p8 = scmp.lt.u32.totalorder %s3702_s19, %s4177_s4 }
  0x58   : > { %p3705_p11 = pnand %p3703_p4, %p3674_p7 }
  0x5a   : > { %s4242_s1 = scalar_lea.hbm %s8574_s0, %s2924_s15  ;;  %p3706_p2 = pneg %p3705_p11 }
  0x5b   : > { %s3707_s15 = scalar_lea.hbm %s8564_s2, 32768 }
  0x5c   : > { %p3709_p0 = scmp.lt.u32.totalorder %s3707_s15, %s3702_s19 }
  0x5e   : > { %p3710_p12 = por %p3709_p0, %p3708_p6 }
  0x60   : > { %p3712_p3 = por %p3711_p8, %p3710_p12 }
  0x62   : > { %p3713_p10 = pnand %p3712_p3, %p3706_p2 }
  0x64   : > { %3716 = shalt.err (!%p3713_p10)
}
  0x65   : > { %s3717_s20 = scalar_lea.vmem %s4181_s3, 8192  ;;  %s3984_s30 = smov [#allocation9]  }
  0x66   : > { %p3718_p4 = scmp.ne.s32.totalorder %s4181_s3, %s3717_s20  ;;  %s3722_s22 = sshll.u32 %s3984_s30, 4  ;;  %s3723_s22 = int_to_ptr.vmem [resolvable:$false] %s3722_s22 }
  0x67   : > { %s3724_s12 = scalar_lea.vmem %s3723_s22, 16384  ;;  %p3725_p13 = scmp.lt.s32.totalorder %s4181_s3, %s3723_s22 }
  0x68   : > { %p3720_p11 = pnand %p3718_p4, %p3674_p7  ;;  %p3726_p0 = scmp.lt.s32.totalorder %s3724_s12, %s3717_s20 }
  0x6a   : > { %p3721_p9 = pneg %p3720_p11  ;;  %p3727_p6 = por %p3726_p0, %p3725_p13 }
  0x6c   : > { %p3728_p12 = pnand %p3727_p6, %p3721_p9 }
  0x6e   : > { %3731 = shalt.err (!%p3728_p12)
}
  0x6f   : > { %s8577_s19 = smov 16   ;;  %s8578_s15 = smov 256  }
  0x70   : > { %s8579_s24 = smov 512   ;;  %s8580_s7 = sand.u32 1, %s3958_s13  }
  0x71   : > { %3143 = dma.hbm_to_vmem [thread:$0]  (!%p4137_p5), %s4177_s4, 8192, %s4181_s3, %s4141_s23, %s8579_s24, %s8578_s15, %s8577_s19  }
  0x72   : > { %s303_s20 = scalar_lea.sflag [#allocation5], %s8580_s7  ;;  %s3732_s30 = scalar_lea.hbm %s4242_s1, 256 }
  0x73   : > { %p3733_p7 = scmp.ne.s32.totalorder %s4242_s1, %s3732_s30  ;;  %p3734_p9 = pneg %p4250_p1 }
  0x74   : > { %s3737_s12 = scalar_lea.hbm %s8574_s0, 512  ;;  %p3738_p2 = scmp.lt.u32.totalorder %s4242_s1, %s8574_s0 }
  0x75   : > { %p3735_p13 = pnand %p3734_p9, %p3733_p7  ;;  %p3739_p8 = scmp.lt.u32.totalorder %s3737_s12, %s3732_s30 }
  0x76   : > { %p3741_p3 = scmp.lt.u32.totalorder %s3732_s30, %s4242_s1 }
  0x77   : > { %p3736_p10 = pneg %p3735_p13  ;;  %p3740_p5 = por %p3739_p8, %p3738_p2 }
  0x79   : > { %p3742_p4 = por %p3741_p3, %p3740_p5 }
  0x7b   : > { %p3743_p11 = pnand %p3742_p4, %p3736_p10 }
  0x7d   : > { %3746 = shalt.err (!%p3743_p11)
}
  0x7e   : > { %s3747_s3 = scalar_lea.vmem %s4244_s9, 256  ;;  %s3985_s23 = smov [#allocation4]  }
  0x7f   : > { %p3748_p0 = scmp.ne.s32.totalorder %s4244_s9, %s3747_s3  ;;  %s3752_s4 = sshll.u32 %s3985_s23, 4  ;;  %s3753_s4 = int_to_ptr.vmem [resolvable:$false] %s3752_s4 }
  0x80   : > { %s3754_s2 = scalar_lea.vmem %s3753_s4, 512  ;;  %p3755_p7 = scmp.lt.s32.totalorder %s4244_s9, %s3753_s4 }
  0x81   : > { %p3750_p6 = pnand %p3748_p0, %p3734_p9  ;;  %p3756_p13 = scmp.lt.s32.totalorder %s3754_s2, %s3747_s3 }
  0x83   : > { %p3751_p12 = pneg %p3750_p6  ;;  %p3757_p2 = por %p3756_p13, %p3755_p7 }
  0x85   : > { %p3758_p8 = pnand %p3757_p2, %p3751_p12 }
  0x87   : > { %3761 = shalt.err (!%p3758_p8)
}
  0x88   : > { %3137 = dma.hbm_to_vmem [thread:$0]  (!%p4250_p1), %s4242_s1, 256, %s4244_s9, %s303_s20  }
  0x89   : > { %s2819_s16 = sadd.s32 4294967294, %s3978_s18   ;;  %s46_s14 = sadd.s32 1, %s3974_s17 }
  0x8a   : > { %s187_s19 = sadd.s32 1, %s3934_s29  ;;  %p8581_p9 = scmp.ne.s32.totalorder %s8566_s25, 0 }
  0x8b   : > { %p194_p10 = scmp.ne.s32.totalorder %s3934_s29, %s3930_s28  ;;  %p200_p5 = scmp.ne.s32.totalorder %s3930_s28, %s3926_s27 }
  0x8c   : > { %s9926_s14 = smov (!%p8581_p9, %s46_s14), %s3974_s17  ;;  %p250_p4 = scmp.eq.s32.totalorder %s4189_s8, 3 }
  0x8d   : > { %p48_p3 = scmp.ge.s32.totalorder %s9926_s14, 2  ;;  %p8582_p11 = scmp.eq.s32.totalorder %s3978_s18, 0 }
  0x8e   : > { %p8584_p1 = scmp.eq.s32.totalorder %s4189_s8, 0  ;;  %p4336_p12 = por %p250_p4, %p194_p10 }
  0x8f   : > { %p4321_p0 = por %p194_p10, %p8582_p11  ;;  %s9928_s14 = smov (%p48_p3, %s9926_s14), 0 }
  0x90   : > { %p4330_p6 = por %p200_p5, %p8584_p1  ;;  %p256_p7 = scmp.eq.s32.totalorder %s2819_s16, 3 }
  0x91   : > { %s8586_s1 = scalar_select %p4336_p12, 1, 0 }
  0x92   : > { %s76_s25 = ssub.s32 %s3974_s17, %s9928_s14  ;;  %s385_s24 = sand.u32 1, %s3934_s29  }
  0x93   : > { %s78_s7 = sor.u32 %s76_s25, %s4220_s11  ;;  %p185_p13 = scmp.eq.s32.totalorder %s76_s25, 0 }
  0x94   : > { %p79_p2 = scmp.eq.s32.totalorder %s78_s7, 0  ;;  %p4347_p8 = por %p256_p7, %p200_p5 }
  0x95   : > { %s4352_s30 = scalar_select %p185_p13, %s3934_s29, %s187_s19  }
  0x96   : > { %s8587_s20 = scalar_select %p4347_p8, 1, 0 }
  0x97   : > { %s8588_s21 = sadd.s32 1, %s3946_s10  ;;  %s2835_s12 = sshll.u32 %s385_s24, 4 }
  0x98   : > { %s4357_s22 = scalar_select %p79_p2, %s3946_s10, %s8588_s21  }
  0x99   : > { %s2927_s3 = sshll.u32 %s3974_s17, 8  ;;  %s8589_s5 = sld [smem:[#allocation304_spill]] }
  0x9a   : > { %s389_s11 = scalar_lea.vmem [#allocation10], %s2835_s12  ;;  %p8590_p9 = scmp.lt.s32.totalorder %s3978_s18, 4 }
  0x9b   : > { %s397_s16 = sshll.u32 %s389_s11, 4  ;;  %s386_s25 = scalar_lea.sflag [#allocation11], %s385_s24  ;;  %s4365_s16 = int_to_ptr.vmem [resolvable:$true] %s397_s16 }
  0x9c   : > { %p4371_p10 = pnand %p8590_p9, %p4321_p0 }
  0x9e   : > { %p3764_p3 = pneg %p4371_p10 }
  0x9f   : > { %s4363_s2 = scalar_lea.hbm %s8589_s5, %s2927_s3  ;;  %s3767_s15 = scalar_lea.hbm %s8589_s5, 512 }
  0xa0   : > { %s3762_s7 = scalar_lea.hbm %s4363_s2, 256  ;;  %p3768_p0 = scmp.lt.u32.totalorder %s4363_s2, %s8589_s5 }
  0xa1   : > { %p3763_p5 = scmp.ne.s32.totalorder %s4363_s2, %s3762_s7  ;;  %p3769_p1 = scmp.lt.u32.totalorder %s3767_s15, %s3762_s7 }
  0xa2   : > { %p3771_p13 = scmp.lt.u32.totalorder %s3762_s7, %s4363_s2 }
  0xa3   : > { %p3765_p4 = pnand %p3764_p3, %p3763_p5  ;;  %p3770_p7 = por %p3769_p1, %p3768_p0 }
  0xa5   : > { %p3766_p11 = pneg %p3765_p4  ;;  %p3772_p2 = por %p3771_p13, %p3770_p7 }
  0xa7   : > { %p3773_p9 = pnand %p3772_p2, %p3766_p11 }
  0xa9   : > { %3776 = shalt.err (!%p3773_p9)
}
  0xaa   : > { %s3777_s24 = scalar_lea.vmem %s4365_s16, 256  ;;  %s3986_s4 = smov [#allocation10]  }
  0xab   : > { %p3778_p5 = scmp.ne.s32.totalorder %s4365_s16, %s3777_s24  ;;  %s3782_s11 = sshll.u32 %s3986_s4, 4  ;;  %s3783_s11 = int_to_ptr.vmem [resolvable:$false] %s3782_s11 }
  0xac   : > { %s3784_s21 = scalar_lea.vmem %s3783_s11, 512  ;;  %p3785_p12 = scmp.lt.s32.totalorder %s4365_s16, %s3783_s11 }
  0xad   : > { %p3780_p4 = pnand %p3778_p5, %p3764_p3  ;;  %p3786_p0 = scmp.lt.s32.totalorder %s3784_s21, %s3777_s24 }
  0xaf   : > { %p3781_p8 = pneg %p3780_p4  ;;  %p3787_p1 = por %p3786_p0, %p3785_p12 }
  0xb1   : > { %p3788_p7 = pnand %p3787_p1, %p3781_p8 }
  0xb3   : > { %3791 = shalt.err (!%p3788_p7)
}
  0xb4   : > { %3146 = dma.hbm_to_vmem [thread:$0]  (!%p4371_p10), %s4363_s2, 256, %s4365_s16, %s386_s25  }
  0xb5   : > { %p8592_p11 = scmp.ne.s32.totalorder %s8565_s6, 0 }
  0xb7   : > { %414 = sbr.rel (%p8592_p11) target bundleno = 1154 (0x482), region = 48 }
  0xbe   : > { %s8593_s7 = sld [smem:[#allocation21_spill]]  ;;  %s8594_s12 = sld [smem:[#allocation26_spill]] }
  0xc4   : > { %s416_s15 = sand.u32 1, %s8593_s7   ;;  %p8595_p3 = scmp.ne.s32.totalorder %s8594_s12, 0 }
  0xc5   : > { %s2839_s3 = sshll.u32 %s416_s15, 4  ;;  %s417_s23 = scalar_lea.sflag [#allocation5], %s416_s15 }
  0xc6   : > { %s420_s4 = scalar_lea.vmem [#allocation4], %s2839_s3 }
  0xc7   : > { %3905 = dma.done.wait (%p8595_p3), %s417_s23, 256  }
  0xc8   : > { %3907 = vsyncadd (%p8595_p3), %s417_s23, 4294967040  ;;  %s8596_s24 = sld [smem:[#allocation20_spill]]  ;;  %s8597_s19 = sld [smem:[#allocation27_spill]] }
  0xc9   : > { %s425_s11 = sand.u32 1, %s4189_s8  }
  0xca   : > { %s426_s16 = scalar_lea.sflag [#allocation8], %s425_s11 }
  0xce   : > { %s427_s21 = sand.u32 1, %s8596_s24   ;;  %p8598_p12 = scmp.ne.s32.totalorder %s8597_s19, 0 }
  0xcf   : > { %s2840_s2 = sshll.u32 %s427_s21, 9 }
  0xd0   : > { %s4409_s6 = scalar_lea.vmem [#allocation7], %s2840_s2 }
  0xd1   : > { %3909 = dma.done.wait (%p8598_p12), %s426_s16, 16384  }
  0xd2   : > { %3911 = vsyncadd (%p8598_p12), %s426_s16, 4294950912  ;;  %s4416_s25 = sand.u32 1, %s3930_s28   ;;  %s4419_s12 = scalar_lea.vmem [#allocation9], %s2840_s2 }
  0xd3   : > { %s8075_s7 = sshll.u32 %s4416_s25, 4  ;;  %s444_s8 = scalar_lea.sflag [#allocation11], %s4416_s25 }
  0xd4   : > { %s4424_s15 = scalar_lea.vmem [#allocation10], %s8075_s7 }
  0xd5   : > { %3913 = dma.done.wait (%p4330_p6), %s444_s8, 256  }
  0xd6   : > { %3915 = vsyncadd (%p4330_p6), %s444_s8, 4294967040  ;;  %s8599_s3 = sld [smem:[#allocation23_spill]]  ;;  %s8600_s11 = sld [smem:[#allocation302_spill]]  ;;  %v4450_v0 = vld [vmem:[%s420_s4] sm:$0xff]  ;;  %v4452_v1 = vld [vmem:[%s420_s4 + $0x8] sm:$0xff] }
  0xd7   : > { %s8601_s8 = sld [smem:[#allocation303_spill]]  ;;  %s8602_s0 = sld [smem:[#allocation305_spill]]  ;;  %8603 = vst [vmem:[#allocation28_spill] sm:$0xff] %v4450_v0  ;;  %8604 = vst [vmem:[#allocation29_spill] sm:$0xff] %v4452_v1  ;;  %v4455_v2 = vld [vmem:[%s4409_s6] sm:$0xff]  ;;  %v4458_v3 = vld [vmem:[%s4409_s6 + $0x8] sm:$0xff] }
  0xd8   : > { %8605 = vst [vmem:[#allocation30_spill] sm:$0xff] %v4455_v2  ;;  %8606 = vst [vmem:[#allocation31_spill] sm:$0xff] %v4458_v3  ;;  %v4461_v4 = vld [vmem:[%s4409_s6 + $0x10] sm:$0xff]  ;;  %v4464_v5 = vld [vmem:[%s4409_s6 + $0x18] sm:$0xff] }
  0xd9   : > { %8607 = vst [vmem:[#allocation32_spill] sm:$0xff] %v4461_v4  ;;  %8608 = vst [vmem:[#allocation33_spill] sm:$0xff] %v4464_v5  ;;  %v4467_v6 = vld [vmem:[%s4409_s6 + $0x20] sm:$0xff]  ;;  %v4470_v7 = vld [vmem:[%s4409_s6 + $0x28] sm:$0xff] }
  0xda   : > { %8609 = vst [vmem:[#allocation34_spill] sm:$0xff] %v4467_v6  ;;  %8610 = vst [vmem:[#allocation35_spill] sm:$0xff] %v4470_v7  ;;  %v4473_v8 = vld [vmem:[%s4409_s6 + $0x30] sm:$0xff]  ;;  %v4476_v9 = vld [vmem:[%s4409_s6 + $0x38] sm:$0xff] }
  0xdb   : > { %8611 = vst [vmem:[#allocation36_spill] sm:$0xff] %v4473_v8  ;;  %8612 = vst [vmem:[#allocation37_spill] sm:$0xff] %v4476_v9  ;;  %v4479_v10 = vld [vmem:[%s4409_s6 + $0x40] sm:$0xff]  ;;  %v4482_v11 = vld [vmem:[%s4409_s6 + $0x48] sm:$0xff] }
  0xdc   : > { %s2845_s24 = sshll.u32 %s8599_s3, 1  ;;  %8613 = vst [vmem:[#allocation38_spill] sm:$0xff] %v4479_v10  ;;  %8614 = vst [vmem:[#allocation39_spill] sm:$0xff] %v4482_v11  ;;  %v4485_v12 = vld [vmem:[%s4409_s6 + $0x50] sm:$0xff]  ;;  %v4488_v13 = vld [vmem:[%s4409_s6 + $0x58] sm:$0xff] }
  0xdd   : > { %p518_p8 = scmp.lt.s32.totalorder %s2845_s24, 3  ;;  %8615 = vst [vmem:[#allocation40_spill] sm:$0xff] %v4485_v12  ;;  %8616 = vst [vmem:[#allocation41_spill] sm:$0xff] %v4488_v13  ;;  %v4491_v14 = vld [vmem:[%s4409_s6 + $0x60] sm:$0xff]  ;;  %v4494_v15 = vld [vmem:[%s4409_s6 + $0x68] sm:$0xff] }
  0xde   : > { %8617 = vst [vmem:[#allocation42_spill] sm:$0xff] %v4491_v14  ;;  %8618 = vst [vmem:[#allocation43_spill] sm:$0xff] %v4494_v15  ;;  %v4497_v16 = vld [vmem:[%s4409_s6 + $0x70] sm:$0xff]  ;;  %v4500_v17 = vld [vmem:[%s4409_s6 + $0x78] sm:$0xff] }
  0xdf   : > { %s9930_s24 = smov (!%p518_p8, %s2845_s24), 3  ;;  %8619 = vst [vmem:[#allocation44_spill] sm:$0xff] %v4497_v16  ;;  %8620 = vst [vmem:[#allocation45_spill] sm:$0xff] %v4500_v17  ;;  %v4503_v18 = vld [vmem:[%s4409_s6 + $0x80] sm:$0xff]  ;;  %v4506_v19 = vld [vmem:[%s4409_s6 + $0x88] sm:$0xff] }
  0xe0   : > { %s4438_s21 = scalar_lea.vmem %s8600_s11, %s9930_s24  ;;  %s4444_s23 = scalar_lea.vmem %s8601_s8, %s9930_s24  ;;  %8621 = vst [vmem:[#allocation46_spill] sm:$0xff] %v4503_v18  ;;  %8622 = vst [vmem:[#allocation47_spill] sm:$0xff] %v4506_v19  ;;  %v4509_v20 = vld [vmem:[%s4409_s6 + $0x90] sm:$0xff]  ;;  %v4512_v21 = vld [vmem:[%s4409_s6 + $0x98] sm:$0xff] }
  0xe1   : > { %s531_s5 = scalar_lea.vmem %s8602_s0, %s9930_s24  ;;  %8623 = vst [vmem:[#allocation48_spill] sm:$0xff] %v4509_v20  ;;  %8624 = vst [vmem:[#allocation49_spill] sm:$0xff] %v4512_v21  ;;  %v4515_v22 = vld [vmem:[%s4409_s6 + $0xa0] sm:$0xff]  ;;  %v4518_v23 = vld [vmem:[%s4409_s6 + $0xa8] sm:$0xff]  ;;  %s9657_s0 = sshll.u32 %s4416_s25, 4 }
  0xe2   : > { %8625 = vst [vmem:[#allocation50_spill] sm:$0xff] %v4515_v22  ;;  %8626 = vst [vmem:[#allocation51_spill] sm:$0xff] %v4518_v23  ;;  %v4521_v24 = vld [vmem:[%s4409_s6 + $0xb0] sm:$0xff]  ;;  %v4524_v25 = vld [vmem:[%s4409_s6 + $0xb8] sm:$0xff]  ;;  %s7174_s4 = scalar_lea.vmem [#allocation12], %s9657_s0 }
  0xe3   : > { %8627 = vst [vmem:[#allocation52_spill] sm:$0xff] %v4521_v24  ;;  %8628 = vst [vmem:[#allocation53_spill] sm:$0xff] %v4524_v25  ;;  %v4527_v26 = vld [vmem:[%s4409_s6 + $0xc0] sm:$0xff]  ;;  %v4530_v27 = vld [vmem:[%s4409_s6 + $0xc8] sm:$0xff] }
  0xe4   : > { %8629 = vst [vmem:[#allocation54_spill] sm:$0xff] %v4527_v26  ;;  %8630 = vst [vmem:[#allocation55_spill] sm:$0xff] %v4530_v27  ;;  %v4533_v28 = vld [vmem:[%s4409_s6 + $0xd0] sm:$0xff]  ;;  %v4536_v29 = vld [vmem:[%s4409_s6 + $0xd8] sm:$0xff] }
  0xe5   : > { %8631 = vst [vmem:[#allocation56_spill] sm:$0xff] %v4533_v28  ;;  %8632 = vst [vmem:[#allocation57_spill] sm:$0xff] %v4536_v29  ;;  %v4539_v30 = vld [vmem:[%s4409_s6 + $0xe0] sm:$0xff]  ;;  %v4542_v31 = vld [vmem:[%s4409_s6 + $0xe8] sm:$0xff] }
  0xe6   : > { %8633 = vst [vmem:[#allocation58_spill] sm:$0xff] %v4539_v30  ;;  %8634 = vst [vmem:[#allocation59_spill] sm:$0xff] %v4542_v31  ;;  %v4545_v32 = vld [vmem:[%s4409_s6 + $0xf0] sm:$0xff]  ;;  %v4548_v33 = vld [vmem:[%s4409_s6 + $0xf8] sm:$0xff] }
  0xe7   : > { %8635 = vst [vmem:[#allocation60_spill] sm:$0xff] %v4545_v32  ;;  %8636 = vst [vmem:[#allocation61_spill] sm:$0xff] %v4548_v33  ;;  %v4551_v34 = vld [vmem:[%s4409_s6 + $0x100] sm:$0xff]  ;;  %v4554_v35 = vld [vmem:[%s4409_s6 + $0x108] sm:$0xff] }
  0xe8   : > { %8637 = vst [vmem:[#allocation62_spill] sm:$0xff] %v4551_v34  ;;  %8638 = vst [vmem:[#allocation63_spill] sm:$0xff] %v4554_v35  ;;  %v4557_v36 = vld [vmem:[%s4409_s6 + $0x110] sm:$0xff]  ;;  %v4560_v37 = vld [vmem:[%s4409_s6 + $0x118] sm:$0xff] }
  0xe9   : > { %8639 = vst [vmem:[#allocation64_spill] sm:$0xff] %v4557_v36  ;;  %8640 = vst [vmem:[#allocation65_spill] sm:$0xff] %v4560_v37  ;;  %v4563_v38 = vld [vmem:[%s4409_s6 + $0x120] sm:$0xff]  ;;  %v4566_v39 = vld [vmem:[%s4409_s6 + $0x128] sm:$0xff] }
  0xea   : > { %8641 = vst [vmem:[#allocation66_spill] sm:$0xff] %v4563_v38  ;;  %8642 = vst [vmem:[#allocation67_spill] sm:$0xff] %v4566_v39  ;;  %v4569_v40 = vld [vmem:[%s4409_s6 + $0x130] sm:$0xff]  ;;  %v4572_v41 = vld [vmem:[%s4409_s6 + $0x138] sm:$0xff] }
  0xeb   : > { %8643 = vst [vmem:[#allocation68_spill] sm:$0xff] %v4569_v40  ;;  %8644 = vst [vmem:[#allocation69_spill] sm:$0xff] %v4572_v41  ;;  %v4575_v42 = vld [vmem:[%s4409_s6 + $0x140] sm:$0xff]  ;;  %v4578_v43 = vld [vmem:[%s4409_s6 + $0x148] sm:$0xff] }
  0xec   : > { %8645 = vst [vmem:[#allocation70_spill] sm:$0xff] %v4575_v42  ;;  %8646 = vst [vmem:[#allocation71_spill] sm:$0xff] %v4578_v43  ;;  %v4581_v44 = vld [vmem:[%s4409_s6 + $0x150] sm:$0xff]  ;;  %v4584_v45 = vld [vmem:[%s4409_s6 + $0x158] sm:$0xff] }
  0xed   : > { %8647 = vst [vmem:[#allocation72_spill] sm:$0xff] %v4581_v44  ;;  %8648 = vst [vmem:[#allocation73_spill] sm:$0xff] %v4584_v45  ;;  %v4587_v46 = vld [vmem:[%s4409_s6 + $0x160] sm:$0xff]  ;;  %v4590_v47 = vld [vmem:[%s4409_s6 + $0x168] sm:$0xff] }
  0xee   : > { %8649 = vst [vmem:[#allocation74_spill] sm:$0xff] %v4587_v46  ;;  %8650 = vst [vmem:[#allocation75_spill] sm:$0xff] %v4590_v47  ;;  %v4593_v48 = vld [vmem:[%s4409_s6 + $0x170] sm:$0xff]  ;;  %v4596_v49 = vld [vmem:[%s4409_s6 + $0x178] sm:$0xff] }
  0xef   : > { %8651 = vst [vmem:[#allocation76_spill] sm:$0xff] %v4593_v48  ;;  %8652 = vst [vmem:[#allocation77_spill] sm:$0xff] %v4596_v49  ;;  %v4599_v50 = vld [vmem:[%s4409_s6 + $0x180] sm:$0xff]  ;;  %v4602_v51 = vld [vmem:[%s4409_s6 + $0x188] sm:$0xff] }
  0xf0   : > { %8653 = vst [vmem:[#allocation78_spill] sm:$0xff] %v4599_v50  ;;  %8654 = vst [vmem:[#allocation79_spill] sm:$0xff] %v4602_v51  ;;  %v4605_v52 = vld [vmem:[%s4409_s6 + $0x190] sm:$0xff]  ;;  %v4608_v53 = vld [vmem:[%s4409_s6 + $0x198] sm:$0xff] }
  0xf1   : > { %8655 = vst [vmem:[#allocation80_spill] sm:$0xff] %v4605_v52  ;;  %8656 = vst [vmem:[#allocation81_spill] sm:$0xff] %v4608_v53  ;;  %v4611_v54 = vld [vmem:[%s4409_s6 + $0x1a0] sm:$0xff]  ;;  %v4614_v55 = vld [vmem:[%s4409_s6 + $0x1a8] sm:$0xff] }
  0xf2   : > { %8657 = vst [vmem:[#allocation82_spill] sm:$0xff] %v4611_v54  ;;  %8658 = vst [vmem:[#allocation83_spill] sm:$0xff] %v4614_v55  ;;  %v4617_v56 = vld [vmem:[%s4409_s6 + $0x1b0] sm:$0xff]  ;;  %v4620_v57 = vld [vmem:[%s4409_s6 + $0x1b8] sm:$0xff] }
  0xf3   : > { %8659 = vst [vmem:[#allocation84_spill] sm:$0xff] %v4617_v56  ;;  %8660 = vst [vmem:[#allocation85_spill] sm:$0xff] %v4620_v57  ;;  %v4623_v58 = vld [vmem:[%s4409_s6 + $0x1c0] sm:$0xff]  ;;  %v4626_v59 = vld [vmem:[%s4409_s6 + $0x1c8] sm:$0xff] }
  0xf4   : > { %8661 = vst [vmem:[#allocation86_spill] sm:$0xff] %v4623_v58  ;;  %8662 = vst [vmem:[#allocation87_spill] sm:$0xff] %v4626_v59  ;;  %v4629_v60 = vld [vmem:[%s4409_s6 + $0x1d0] sm:$0xff]  ;;  %v4632_v61 = vld [vmem:[%s4409_s6 + $0x1d8] sm:$0xff] }
  0xf5   : > { %8663 = vst [vmem:[#allocation88_spill] sm:$0xff] %v4629_v60  ;;  %8664 = vst [vmem:[#allocation89_spill] sm:$0xff] %v4632_v61  ;;  %v4635_v62 = vld [vmem:[%s4409_s6 + $0x1e0] sm:$0xff]  ;;  %v4638_v63 = vld [vmem:[%s4409_s6 + $0x1e8] sm:$0xff] }
  0xf6   : > { %8665 = vst [vmem:[#allocation90_spill] sm:$0xff] %v4635_v62  ;;  %8666 = vst [vmem:[#allocation91_spill] sm:$0xff] %v4638_v63  ;;  %v4641_v0 = vld [vmem:[%s4409_s6 + $0x1f0] sm:$0xff]  ;;  %v4644_v56 = vld [vmem:[%s4409_s6 + $0x1f8] sm:$0xff]  ;;  %s9658_s6 = sshll.u32 %s4416_s25, 1 }
  0xf7   : > { %8667 = vst [vmem:[#allocation92_spill] sm:$0xff] %v4641_v0  ;;  %8668 = vst [vmem:[#allocation93_spill] sm:$0xff] %v4644_v56  ;;  %v4647_v54 = vld [vmem:[%s4419_s12] sm:$0xff]  ;;  %v4650_v58 = vld [vmem:[%s4419_s12 + $0x8] sm:$0xff]  ;;  %s7178_s7 = scalar_lea.vmem [#allocation13], %s9658_s6 }
  0xf8   : > { %8669 = vst [vmem:[#allocation94_spill] sm:$0xff] %v4647_v54  ;;  %8670 = vst [vmem:[#allocation95_spill] sm:$0xff] %v4650_v58  ;;  %v4653_v60 = vld [vmem:[%s4419_s12 + $0x10] sm:$0xff]  ;;  %v4656_v61 = vld [vmem:[%s4419_s12 + $0x18] sm:$0xff]  ;;  %v8742_v10 = vand.u32 2147483647, %v4647_v54 }
  0xf9   : > { %8671 = vst [vmem:[#allocation96_spill] sm:$0xff] %v4653_v60  ;;  %8672 = vst [vmem:[#allocation97_spill] sm:$0xff] %v4656_v61  ;;  %v4659_v59 = vld [vmem:[%s4419_s12 + $0x20] sm:$0xff]  ;;  %v4662_v62 = vld [vmem:[%s4419_s12 + $0x28] sm:$0xff]  ;;  %v8744_v8 = vand.u32 2147483647, %v4653_v60 }
  0xfa   : > { %8673 = vst [vmem:[#allocation98_spill] sm:$0xff] %v4659_v59  ;;  %8674 = vst [vmem:[#allocation99_spill] sm:$0xff] %v4662_v62  ;;  %v4665_v63 = vld [vmem:[%s4419_s12 + $0x30] sm:$0xff]  ;;  %v4671_v55 = vld [vmem:[%s4419_s12 + $0x38] sm:$0xff]  ;;  %v8745_v7 = vand.u32 2147483647, %v4656_v61 }
  0xfb   : > { %8675 = vst [vmem:[#allocation100_spill] sm:$0xff] %v4665_v63  ;;  %8676 = vst [vmem:[#allocation101_spill] sm:$0xff] %v4671_v55  ;;  %v4674_v52 = vld [vmem:[%s4419_s12 + $0x40] sm:$0xff]  ;;  %v4677_v50 = vld [vmem:[%s4419_s12 + $0x48] sm:$0xff]  ;;  %v8748_v3 = vand.u32 2147483647, %v4665_v63 }
  0xfc   : > { %8677 = vst [vmem:[#allocation102_spill] sm:$0xff] %v4674_v52  ;;  %8678 = vst [vmem:[#allocation103_spill] sm:$0xff] %v4677_v50  ;;  %v4683_v48 = vld [vmem:[%s4419_s12 + $0x50] sm:$0xff]  ;;  %v4686_v56 = vld [vmem:[%s4419_s12 + $0x58] sm:$0xff] }
  0xfd   : > { %8679 = vst [vmem:[#allocation104_spill] sm:$0xff] %v4683_v48  ;;  %8680 = vst [vmem:[#allocation105_spill] sm:$0xff] %v4686_v56  ;;  %v4689_v57 = vld [vmem:[%s4419_s12 + $0x60] sm:$0xff]  ;;  %v4695_v47 = vld [vmem:[%s4419_s12 + $0x68] sm:$0xff] }
  0xfe   : > { %8681 = vst [vmem:[#allocation106_spill] sm:$0xff] %v4689_v57  ;;  %8682 = vst [vmem:[#allocation107_spill] sm:$0xff] %v4695_v47  ;;  %v4698_v51 = vld [vmem:[%s4419_s12 + $0x70] sm:$0xff]  ;;  %v4701_v0 = vld [vmem:[%s4419_s12 + $0x78] sm:$0xff] }
  0xff   : > { %8683 = vst [vmem:[#allocation108_spill] sm:$0xff] %v4698_v51  ;;  %8684 = vst [vmem:[#allocation109_spill] sm:$0xff] %v4701_v0  ;;  %v4707_v45 = vld [vmem:[%s4419_s12 + $0x80] sm:$0xff]  ;;  %v4710_v49 = vld [vmem:[%s4419_s12 + $0x88] sm:$0xff] }
 0x100   : > { %8685 = vst [vmem:[#allocation110_spill] sm:$0xff] %v4707_v45  ;;  %8686 = vst [vmem:[#allocation111_spill] sm:$0xff] %v4710_v49  ;;  %v4713_v53 = vld [vmem:[%s4419_s12 + $0x90] sm:$0xff]  ;;  %v4719_v38 = vld [vmem:[%s4419_s12 + $0x98] sm:$0xff] }
 0x101   : > { %8687 = vst [vmem:[#allocation112_spill] sm:$0xff] %v4713_v53  ;;  %8688 = vst [vmem:[#allocation113_spill] sm:$0xff] %v4719_v38  ;;  %v4722_v42 = vld [vmem:[%s4419_s12 + $0xa0] sm:$0xff]  ;;  %v4725_v46 = vld [vmem:[%s4419_s12 + $0xa8] sm:$0xff] }
 0x102   : > { %8689 = vst [vmem:[#allocation114_spill] sm:$0xff] %v4722_v42  ;;  %8690 = vst [vmem:[#allocation115_spill] sm:$0xff] %v4725_v46  ;;  %v4731_v36 = vld [vmem:[%s4419_s12 + $0xb0] sm:$0xff]  ;;  %v4734_v40 = vld [vmem:[%s4419_s12 + $0xb8] sm:$0xff] }
 0x103   : > { %8691 = vst [vmem:[#allocation116_spill] sm:$0xff] %v4731_v36  ;;  %8692 = vst [vmem:[#allocation117_spill] sm:$0xff] %v4734_v40  ;;  %v4737_v44 = vld [vmem:[%s4419_s12 + $0xc0] sm:$0xff]  ;;  %v4743_v35 = vld [vmem:[%s4419_s12 + $0xc8] sm:$0xff] }
 0x104   : > { %8693 = vst [vmem:[#allocation118_spill] sm:$0xff] %v4737_v44  ;;  %8694 = vst [vmem:[#allocation119_spill] sm:$0xff] %v4743_v35  ;;  %v4746_v39 = vld [vmem:[%s4419_s12 + $0xd0] sm:$0xff]  ;;  %v4749_v43 = vld [vmem:[%s4419_s12 + $0xd8] sm:$0xff] }
 0x105   : > { %8695 = vst [vmem:[#allocation120_spill] sm:$0xff] %v4746_v39  ;;  %8696 = vst [vmem:[#allocation121_spill] sm:$0xff] %v4749_v43  ;;  %v4755_v33 = vld [vmem:[%s4419_s12 + $0xe0] sm:$0xff]  ;;  %v4758_v37 = vld [vmem:[%s4419_s12 + $0xe8] sm:$0xff] }
 0x106   : > { %8697 = vst [vmem:[#allocation122_spill] sm:$0xff] %v4755_v33  ;;  %8698 = vst [vmem:[#allocation123_spill] sm:$0xff] %v4758_v37  ;;  %v4761_v41 = vld [vmem:[%s4419_s12 + $0xf0] sm:$0xff]  ;;  %v4767_v26 = vld [vmem:[%s4419_s12 + $0xf8] sm:$0xff] }
 0x107   : > { %8699 = vst [vmem:[#allocation124_spill] sm:$0xff] %v4761_v41  ;;  %8700 = vst [vmem:[#allocation125_spill] sm:$0xff] %v4767_v26  ;;  %v4770_v30 = vld [vmem:[%s4419_s12 + $0x100] sm:$0xff]  ;;  %v4773_v34 = vld [vmem:[%s4419_s12 + $0x108] sm:$0xff] }
 0x108   : > { %8701 = vst [vmem:[#allocation126_spill] sm:$0xff] %v4770_v30  ;;  %8702 = vst [vmem:[#allocation127_spill] sm:$0xff] %v4773_v34  ;;  %v4779_v24 = vld [vmem:[%s4419_s12 + $0x110] sm:$0xff]  ;;  %v4782_v28 = vld [vmem:[%s4419_s12 + $0x118] sm:$0xff] }
 0x109   : > { %8703 = vst [vmem:[#allocation128_spill] sm:$0xff] %v4779_v24  ;;  %8704 = vst [vmem:[#allocation129_spill] sm:$0xff] %v4782_v28  ;;  %v4785_v32 = vld [vmem:[%s4419_s12 + $0x120] sm:$0xff]  ;;  %v4791_v23 = vld [vmem:[%s4419_s12 + $0x128] sm:$0xff] }
 0x10a   : > { %8705 = vst [vmem:[#allocation130_spill] sm:$0xff] %v4785_v32  ;;  %8706 = vst [vmem:[#allocation131_spill] sm:$0xff] %v4791_v23  ;;  %v4794_v27 = vld [vmem:[%s4419_s12 + $0x130] sm:$0xff]  ;;  %v4797_v31 = vld [vmem:[%s4419_s12 + $0x138] sm:$0xff] }
 0x10b   : > { %8707 = vst [vmem:[#allocation132_spill] sm:$0xff] %v4794_v27  ;;  %8708 = vst [vmem:[#allocation133_spill] sm:$0xff] %v4797_v31  ;;  %v4803_v21 = vld [vmem:[%s4419_s12 + $0x140] sm:$0xff]  ;;  %v4806_v25 = vld [vmem:[%s4419_s12 + $0x148] sm:$0xff] }
 0x10c   : > { %8709 = vst [vmem:[#allocation134_spill] sm:$0xff] %v4803_v21  ;;  %8710 = vst [vmem:[#allocation135_spill] sm:$0xff] %v4806_v25  ;;  %v4809_v29 = vld [vmem:[%s4419_s12 + $0x150] sm:$0xff]  ;;  %v4815_v14 = vld [vmem:[%s4419_s12 + $0x158] sm:$0xff] }
 0x10d   : > { %8711 = vst [vmem:[#allocation136_spill] sm:$0xff] %v4809_v29  ;;  %8712 = vst [vmem:[#allocation137_spill] sm:$0xff] %v4815_v14  ;;  %v4818_v18 = vld [vmem:[%s4419_s12 + $0x160] sm:$0xff]  ;;  %v4821_v22 = vld [vmem:[%s4419_s12 + $0x168] sm:$0xff] }
 0x10e   : > { %8713 = vst [vmem:[#allocation138_spill] sm:$0xff] %v4818_v18  ;;  %8714 = vst [vmem:[#allocation139_spill] sm:$0xff] %v4821_v22  ;;  %v4827_v12 = vld [vmem:[%s4419_s12 + $0x170] sm:$0xff]  ;;  %v4830_v16 = vld [vmem:[%s4419_s12 + $0x178] sm:$0xff]  ;;  %v793_v22 = vsub.f32 0.0, %v8742_v10 }
 0x10f   : > { %8715 = vst [vmem:[#allocation140_spill] sm:$0xff] %v4827_v12  ;;  %8716 = vst [vmem:[#allocation141_spill] sm:$0xff] %v4830_v16  ;;  %v4833_v20 = vld [vmem:[%s4419_s12 + $0x180] sm:$0xff]  ;;  %v4839_v11 = vld [vmem:[%s4419_s12 + $0x188] sm:$0xff]  ;;  %v8743_v18 = vand.u32 2147483647, %v4650_v58 }
 0x110   : > { %8717 = vst [vmem:[#allocation142_spill] sm:$0xff] %v4833_v20  ;;  %8718 = vst [vmem:[#allocation143_spill] sm:$0xff] %v4839_v11  ;;  %v4842_v15 = vld [vmem:[%s4419_s12 + $0x190] sm:$0xff]  ;;  %v4845_v19 = vld [vmem:[%s4419_s12 + $0x198] sm:$0xff]  ;;  %v8749_v10 = vand.u32 2147483647, %v4671_v55 }
 0x111   : > { %8719 = vst [vmem:[#allocation144_spill] sm:$0xff] %v4842_v15  ;;  %8720 = vst [vmem:[#allocation145_spill] sm:$0xff] %v4845_v19  ;;  %v4851_v1 = vld [vmem:[%s4419_s12 + $0x1a0] sm:$0xff]  ;;  %v4854_v13 = vld [vmem:[%s4419_s12 + $0x1a8] sm:$0xff]  ;;  %v8737_v21 = vmov %v4842_v15  ;;  %v796_v15 = vsub.f32 0.0, %v8745_v7 }
 0x112   : > { %8721 = vst [vmem:[#allocation146_spill] sm:$0xff] %v4851_v1  ;;  %8722 = vst [vmem:[#allocation147_spill] sm:$0xff] %v4854_v13  ;;  %v4857_v17 = vld [vmem:[%s4419_s12 + $0x1b0] sm:$0xff]  ;;  %v4863_v4 = vld [vmem:[%s4419_s12 + $0x1b8] sm:$0xff]  ;;  %v8738_v29 = vmov %v4851_v1  ;;  %v794_v1 = vsub.f32 0.0, %v8743_v18  ;;  %v800_v54 = vsub.f32 0.0, %v8749_v10 }
 0x113   : > { %8723 = vst [vmem:[#allocation148_spill] sm:$0xff] %v4857_v17  ;;  %8724 = vst [vmem:[#allocation149_spill] sm:$0xff] %v4863_v4  ;;  %v4866_v6 = vld [vmem:[%s4419_s12 + $0x1c0] sm:$0xff]  ;;  %v4869_v2 = vld [vmem:[%s4419_s12 + $0x1c8] sm:$0xff]  ;;  %v8747_v4 = vand.u32 2147483647, %v4662_v62 }
 0x114   : > { %8725 = vst [vmem:[#allocation150_spill] sm:$0xff] %v4866_v6  ;;  %8726 = vst [vmem:[#allocation151_spill] sm:$0xff] %v4869_v2  ;;  %v4875_v16 = vld [vmem:[%s4419_s12 + $0x1d0] sm:$0xff]  ;;  %v4878_v9 = vld [vmem:[%s4419_s12 + $0x1d8] sm:$0xff]  ;;  %v8741_v28 = vmov %v4866_v6  ;;  %v8746_v6 = vand.u32 2147483647, %v4659_v59 }
 0x115   : > { %8727 = vst [vmem:[#allocation152_spill] sm:$0xff] %v4875_v16  ;;  %8728 = vst [vmem:[#allocation153_spill] sm:$0xff] %v4878_v9  ;;  %v4881_v20 = vld [vmem:[%s4419_s12 + $0x1e0] sm:$0xff]  ;;  %v4887_v11 = vld [vmem:[%s4419_s12 + $0x1e8] sm:$0xff]  ;;  %v795_v16 = vsub.f32 0.0, %v8744_v8  ;;  %v798_v5 = vsub.f32 0.0, %v8747_v4 }
 0x116   : > { %8729 = vst [vmem:[#allocation154_spill] sm:$0xff] %v4881_v20  ;;  %8730 = vst [vmem:[#allocation155_spill] sm:$0xff] %v4887_v11  ;;  %v4890_v12 = vld [vmem:[%s4419_s12 + $0x1f0] sm:$0xff]  ;;  %v4946_v32 = vld [vmem:[%s4419_s12 + $0x1f8] sm:$0xff]  ;;  %v797_v11 = vsub.f32 0.0, %v8746_v6  ;;  %s9659_s12 = sld [smem:[#allocation22_spill]] }
 0x117   : > { %8731 = vst [vmem:[#allocation156_spill] sm:$0xff] %v4890_v12  ;;  %8733 = vst [vmem:[#allocation157_spill] sm:$0xff] %v4946_v32  ;;  %v8734_v13 = vld [vmem:[#allocation141_spill] sm:$0xff]  ;;  %v8735_v27 = vld [vmem:[#allocation142_spill] sm:$0xff]  ;;  %v799_v32 = vsub.f32 0.0, %v8748_v3 }
 0x118   : > { %v8736_v31 = vld [vmem:[#allocation143_spill] sm:$0xff]  ;;  %v8750_v18 = vand.u32 2147483647, %v4674_v52  ;;  %v8751_v8 = vand.u32 2147483647, %v4677_v50  ;;  %v8797_v50 = vld [vmem:[#allocation140_spill] sm:$0xff] }
 0x119   : > { %v8739_v14 = vld [vmem:[#allocation147_spill] sm:$0xff]  ;;  %v8752_v7 = vand.u32 2147483647, %v4683_v48  ;;  %v8753_v6 = vand.u32 2147483647, %v4686_v56  ;;  %v8793_v56 = vld [vmem:[#allocation138_spill] sm:$0xff] }
 0x11a   : > { %v801_v58 = vsub.f32 0.0, %v8750_v18  ;;  %v802_v60 = vsub.f32 0.0, %v8751_v8  ;;  %v8754_v4 = vand.u32 2147483647, %v4689_v57  ;;  %v8755_v3 = vand.u32 2147483647, %v4695_v47 }
 0x11b   : > { %v803_v61 = vsub.f32 0.0, %v8752_v7  ;;  %v804_v59 = vsub.f32 0.0, %v8753_v6  ;;  %v8756_v10 = vand.u32 2147483647, %v4698_v51  ;;  %v8757_v18 = vand.u32 2147483647, %v4701_v0 }
 0x11c   : > { %v805_v62 = vsub.f32 0.0, %v8754_v4  ;;  %v806_v63 = vsub.f32 0.0, %v8755_v3  ;;  %v8758_v8 = vand.u32 2147483647, %v4707_v45  ;;  %v8759_v7 = vand.u32 2147483647, %v4710_v49 }
 0x11d   : > { %v807_v55 = vsub.f32 0.0, %v8756_v10  ;;  %v4998_v52 = vsub.f32 0.0, %v8757_v18  ;;  %v8760_v4 = vand.u32 2147483647, %v4713_v53  ;;  %v8761_v3 = vand.u32 2147483647, %v4719_v38 }
 0x11e   : > { %v5002_v48 = vsub.f32 0.0, %v8758_v8  ;;  %v5006_v6 = vsub.f32 0.0, %v8759_v7  ;;  %v8762_v10 = vand.u32 2147483647, %v4722_v42  ;;  %v8763_v45 = vand.u32 2147483647, %v4725_v46 }
 0x11f   : > { %v5010_v57 = vsub.f32 0.0, %v8760_v4  ;;  %v5014_v51 = vsub.f32 0.0, %v8761_v3  ;;  %v8764_v49 = vand.u32 2147483647, %v4731_v36  ;;  %v8765_v53 = vand.u32 2147483647, %v4734_v40 }
 0x120   : > { %v5018_v18 = vsub.f32 0.0, %v8762_v10  ;;  %v5022_v8 = vsub.f32 0.0, %v8763_v45  ;;  %v8766_v38 = vand.u32 2147483647, %v4737_v44  ;;  %v8767_v42 = vand.u32 2147483647, %v4743_v35 }
 0x121   : > { %v5026_v7 = vsub.f32 0.0, %v8764_v49  ;;  %v5030_v4 = vsub.f32 0.0, %v8765_v53  ;;  %v8768_v46 = vand.u32 2147483647, %v4746_v39  ;;  %v857_v0 = vmul.f32 1.442695, %v793_v22 }
 0x122   : > { %v5034_v3 = vsub.f32 0.0, %v8766_v38  ;;  %v5038_v10 = vsub.f32 0.0, %v8767_v42  ;;  %v859_v36 = vmul.f32 1.442695, %v794_v1  ;;  %v8769_v49 = vand.u32 2147483647, %v4749_v43 }
 0x123   : > { %v5042_v45 = vsub.f32 0.0, %v8768_v46  ;;  %v8770_v53 = vand.u32 2147483647, %v4755_v33  ;;  %v861_v38 = vmul.f32 1.442695, %v795_v16  ;;  %3274 = vpow2.f32 %v857_v0  ;;  %v8786_v43 = vld [vmem:[#allocation134_spill] sm:$0xff] }
 0x124   : > { %v5046_v47 = vsub.f32 0.0, %v8769_v49  ;;  %v863_v44 = vmul.f32 1.442695, %v796_v15  ;;  %v8771_v35 = vand.u32 2147483647, %v4758_v37  ;;  %3276 = vpow2.f32 %v859_v36  ;;  %v8779_v37 = vld [vmem:[#allocation130_spill] sm:$0xff] }
 0x125   : > { %v5050_v40 = vsub.f32 0.0, %v8770_v53  ;;  %v8772_v39 = vand.u32 2147483647, %v4761_v41  ;;  %v865_v1 = vmul.f32 1.442695, %v797_v11  ;;  %3278 = vpow2.f32 %v861_v38  ;;  %v8777_v11 = vld [vmem:[#allocation129_spill] sm:$0xff] }
 0x126   : > { %v5054_v42 = vsub.f32 0.0, %v8771_v35  ;;  %v8773_v22 = vand.u32 2147483647, %v4767_v26  ;;  %v8774_v33 = vand.u32 2147483647, %v4770_v30  ;;  %3280 = vpow2.f32 %v863_v44  ;;  %v8784_v38 = vld [vmem:[#allocation133_spill] sm:$0xff] }
 0x127   : > { %v5058_v46 = vsub.f32 0.0, %v8772_v39  ;;  %v867_v15 = vmul.f32 1.442695, %v798_v5  ;;  %v8775_v16 = vand.u32 2147483647, %v4773_v34  ;;  %v8782_v34 = vld [vmem:[#allocation132_spill] sm:$0xff]  ;;  %3282 = vpow2.f32 %v865_v1 }
 0x128   : > { %v5062_v49 = vsub.f32 0.0, %v8773_v22  ;;  %v5066_v53 = vsub.f32 0.0, %v8774_v33  ;;  %v8776_v41 = vand.u32 2147483647, %v4779_v24  ;;  %v869_v0 = vmul.f32 1.442695, %v799_v32 }
 0x129   : > { %v5070_v35 = vsub.f32 0.0, %v8775_v16  ;;  %v8778_v26 = vand.u32 2147483647, %v8777_v11  ;;  %v8780_v30 = vand.u32 2147483647, %v8779_v37  ;;  %3284 = vpow2.f32 %v867_v15  ;;  %v8791_v1 = vld [vmem:[#allocation137_spill] sm:$0xff] }
 0x12a   : > { %v5074_v39 = vsub.f32 0.0, %v8776_v41  ;;  %v871_v5 = vmul.f32 1.442695, %v800_v54  ;;  %v8781_v36 = vand.u32 2147483647, %v4791_v23  ;;  %v8789_v23 = vld [vmem:[#allocation136_spill] sm:$0xff]  ;;  %3286 = vpow2.f32 %v869_v0 }
 0x12b   : > { %v5078_v22 = vsub.f32 0.0, %v8778_v26  ;;  %v5082_v33 = vsub.f32 0.0, %v8780_v30  ;;  %v8783_v24 = vand.u32 2147483647, %v8782_v34  ;;  %v873_v32 = vmul.f32 1.442695, %v801_v58 }
 0x12c   : > { %v5086_v16 = vsub.f32 0.0, %v8781_v36  ;;  %v8785_v11 = vand.u32 2147483647, %v8784_v38  ;;  %v8787_v37 = vand.u32 2147483647, %v8786_v43  ;;  %3288 = vpow2.f32 %v871_v5  ;;  %v8795_v15 = vld [vmem:[#allocation139_spill] sm:$0xff] }
 0x12d   : > { %v5090_v41 = vsub.f32 0.0, %v8783_v24  ;;  %v875_v44 = vmul.f32 1.442695, %v802_v60  ;;  %v8788_v54 = vand.u32 2147483647, %v4806_v25  ;;  %3290 = vpow2.f32 %v873_v32  ;;  %v5132_v5 = vpop.eup %3274  ;;  %p2848_p6 = scmp.ne.s32.totalorder %s9659_s12, 0 }
 0x12e   : > { %v5094_v26 = vsub.f32 0.0, %v8785_v11  ;;  %v5098_v30 = vsub.f32 0.0, %v8787_v37  ;;  %v8790_v34 = vand.u32 2147483647, %v8789_v23  ;;  %v877_v58 = vmul.f32 1.442695, %v803_v61 }
 0x12f   : > { %v5102_v36 = vsub.f32 0.0, %v8788_v54  ;;  %v8792_v38 = vand.u32 2147483647, %v8791_v1  ;;  %v8794_v43 = vand.u32 2147483647, %v8793_v56  ;;  %3292 = vpow2.f32 %v875_v44 }
 0x130   : > { %v5106_v24 = vsub.f32 0.0, %v8790_v34  ;;  %v879_v60 = vmul.f32 1.442695, %v804_v59  ;;  %v8796_v25 = vand.u32 2147483647, %v8795_v15  ;;  %3294 = vpow2.f32 %v877_v58 }
 0x131   : > { %v5110_v11 = vsub.f32 0.0, %v8792_v38  ;;  %v5114_v37 = vsub.f32 0.0, %v8794_v43  ;;  %v8798_v23 = vand.u32 2147483647, %v8797_v50  ;;  %v881_v61 = vmul.f32 1.442695, %v805_v62 }
 0x132   : > { %v5118_v54 = vsub.f32 0.0, %v8796_v25  ;;  %v8799_v0 = vand.u32 2147483647, %v8734_v13  ;;  %v8800_v56 = vand.u32 2147483647, %v8735_v27  ;;  %3296 = vpow2.f32 %v879_v60 }
 0x133   : > { %v5122_v34 = vsub.f32 0.0, %v8798_v23  ;;  %v883_v59 = vmul.f32 1.442695, %v806_v63  ;;  %v8801_v25 = vand.u32 2147483647, %v8736_v31  ;;  %3298 = vpow2.f32 %v881_v61 }
 0x134   : > { %v5126_v38 = vsub.f32 0.0, %v8799_v0  ;;  %v5130_v43 = vsub.f32 0.0, %v8800_v56  ;;  %v8802_v23 = vand.u32 2147483647, %v8737_v21  ;;  %v885_v62 = vmul.f32 1.442695, %v807_v55  ;;  %v5142_v0 = vpop.eup %3276 }
 0x135   : > { %v5136_v15 = vsub.f32 0.0, %v8801_v25  ;;  %v8803_v27 = vand.u32 2147483647, %v4845_v19  ;;  %v8804_v63 = vand.u32 2147483647, %v8738_v29  ;;  %v5153_v31 = vpop.eup %3278  ;;  %3300 = vpow2.f32 %v883_v59 }
 0x136   : > { %v5140_v32 = vsub.f32 0.0, %v8802_v23  ;;  %v887_v25 = vmul.f32 1.442695, %v4998_v52  ;;  %v8805_v23 = vand.u32 2147483647, %v8739_v14  ;;  %v5164_v19 = vpop.eup %3280  ;;  %3302 = vpow2.f32 %v885_v62 }
 0x137   : > { %v5146_v56 = vsub.f32 0.0, %v8803_v27  ;;  %v5150_v44 = vsub.f32 0.0, %v8804_v63  ;;  %v8806_v55 = vand.u32 2147483647, %v4857_v17  ;;  %v889_v27 = vmul.f32 1.442695, %v5002_v48  ;;  %v5175_v14 = vpop.eup %3282 }
 0x138   : > { %v5157_v21 = vsub.f32 0.0, %v8805_v23  ;;  %v8807_v63 = vld [vmem:[#allocation149_spill] sm:$0xff]  ;;  %v8809_v52 = vand.u32 2147483647, %v8741_v28  ;;  %v891_v23 = vmul.f32 1.442695, %v5006_v6  ;;  %3304 = vpow2.f32 %v887_v25 }
 0x139   : > { %v5161_v58 = vsub.f32 0.0, %v8806_v55  ;;  %v8808_v29 = vand.u32 2147483647, %v8807_v63  ;;  %v8810_v55 = vand.u32 2147483647, %v4869_v2  ;;  %v8811_v48 = vld [vmem:[#allocation152_spill] sm:$0xff]  ;;  %v5186_v63 = vpop.eup %3284  ;;  %3306 = vpow2.f32 %v889_v27 }
 0x13a   : > { %v5172_v13 = vsub.f32 0.0, %v8809_v52  ;;  %v8812_v17 = vand.u32 2147483647, %v8811_v48  ;;  %v8813_v52 = vand.u32 2147483647, %v4878_v9  ;;  %v5197_v2 = vpop.eup %3286  ;;  %3308 = vpow2.f32 %v891_v23 }
 0x13b   : > { %v5168_v60 = vsub.f32 0.0, %v8808_v29  ;;  %v5179_v61 = vsub.f32 0.0, %v8810_v55  ;;  %v893_v29 = vmul.f32 1.442695, %v5010_v57  ;;  %v8814_v6 = vand.u32 2147483647, %v4881_v20  ;;  %v5208_v9 = vpop.eup %3288 }
 0x13c   : > { %v5183_v50 = vsub.f32 0.0, %v8812_v17  ;;  %v5190_v59 = vsub.f32 0.0, %v8813_v52  ;;  %v895_v55 = vmul.f32 1.442695, %v5014_v51  ;;  %v8815_v17 = vld [vmem:[#allocation155_spill] sm:$0xff] }
 0x13d   : > { %v5194_v28 = vsub.f32 0.0, %v8814_v6  ;;  %v8816_v48 = vand.u32 2147483647, %v8815_v17  ;;  %v8817_v57 = vand.u32 2147483647, %v4890_v12  ;;  %v8818_v6 = vld [vmem:[#allocation157_spill] sm:$0xff]  ;;  %3310 = vpow2.f32 %v893_v29 }
 0x13e   : > { %v897_v52 = vmul.f32 1.442695, %v5018_v18  ;;  %v8819_v20 = vand.u32 2147483647, %v8818_v6  ;;  %v899_v51 = vmul.f32 1.442695, %v5022_v8  ;;  %3312 = vpow2.f32 %v895_v55 }
 0x13f   : > { %v5201_v62 = vsub.f32 0.0, %v8816_v48  ;;  %v5205_v1 = vsub.f32 0.0, %v8817_v57  ;;  %v901_v17 = vmul.f32 1.442695, %v5026_v7  ;;  %v5216_v48 = vpop.eup %3290  ;;  %v903_v57 = vmul.f32 1.442695, %v5030_v4 }
 0x140   : > { %v5212_v25 = vsub.f32 0.0, %v8819_v20  ;;  %v905_v27 = vmul.f32 1.442695, %v5034_v3  ;;  %v907_v18 = vmul.f32 1.442695, %v5038_v10  ;;  %v5221_v12 = vpop.eup %3292  ;;  %3314 = vpow2.f32 %v897_v52 }
 0x141   : > { %v909_v20 = vmul.f32 1.442695, %v5042_v45  ;;  %v911_v23 = vmul.f32 1.442695, %v5046_v47  ;;  %v913_v8 = vmul.f32 1.442695, %v5050_v40  ;;  %v5226_v6 = vpop.eup %3294  ;;  %3316 = vpow2.f32 %v899_v51 }
 0x142   : > { %v915_v7 = vmul.f32 1.442695, %v5054_v42  ;;  %v917_v4 = vmul.f32 1.442695, %v5058_v46  ;;  %v919_v3 = vmul.f32 1.442695, %v5062_v49  ;;  %v5231_v29 = vpop.eup %3296  ;;  %3318 = vpow2.f32 %v901_v17 }
 0x143   : > { %v921_v10 = vmul.f32 1.442695, %v5066_v53  ;;  %v923_v45 = vmul.f32 1.442695, %v5070_v35  ;;  %v925_v47 = vmul.f32 1.442695, %v5074_v39  ;;  %v5236_v55 = vpop.eup %3298  ;;  %3320 = vpow2.f32 %v903_v57 }
 0x144   : > { %v5239_v40 = vmul.f32 1.442695, %v5078_v22  ;;  %v5242_v42 = vmul.f32 1.442695, %v5082_v33  ;;  %v5245_v46 = vmul.f32 1.442695, %v5086_v16  ;;  %v5247_v49 = vpop.eup %3300  ;;  %3322 = vpow2.f32 %v905_v27 }
 0x145   : > { %v5250_v53 = vmul.f32 1.442695, %v5090_v41  ;;  %v5253_v35 = vmul.f32 1.442695, %v5094_v26  ;;  %v5256_v39 = vmul.f32 1.442695, %v5098_v30  ;;  %v5258_v22 = vpop.eup %3302  ;;  %3324 = vpow2.f32 %v907_v18 }
 0x146   : > { %v5261_v33 = vmul.f32 1.442695, %v5102_v36  ;;  %v5264_v16 = vmul.f32 1.442695, %v5106_v24  ;;  %v5267_v17 = vmul.f32 1.442695, %v5110_v11  ;;  %v5269_v41 = vpop.eup %3304  ;;  %3326 = vpow2.f32 %v909_v20 }
 0x147   : > { %v5272_v26 = vmul.f32 1.442695, %v5114_v37  ;;  %v5275_v30 = vmul.f32 1.442695, %v5118_v54  ;;  %v5278_v52 = vmul.f32 1.442695, %v5122_v34  ;;  %v5280_v36 = vpop.eup %3306  ;;  %3328 = vpow2.f32 %v911_v23 }
 0x148   : > { %v5283_v24 = vmul.f32 1.442695, %v5126_v38  ;;  %v5286_v11 = vmul.f32 1.442695, %v5130_v43  ;;  %v5289_v51 = vmul.f32 1.442695, %v5136_v15  ;;  %v5291_v37 = vpop.eup %3308  ;;  %3330 = vpow2.f32 %v913_v8 }
 0x149   : > { %v5294_v54 = vmul.f32 1.442695, %v5140_v32  ;;  %v5297_v34 = vmul.f32 1.442695, %v5146_v56  ;;  %v5300_v57 = vmul.f32 1.442695, %v5150_v44  ;;  %v5302_v38 = vpop.eup %3310  ;;  %3332 = vpow2.f32 %v915_v7 }
 0x14a   : > { %v5305_v43 = vmul.f32 1.442695, %v5157_v21  ;;  %v5308_v15 = vmul.f32 1.442695, %v5161_v58  ;;  %v988_v27 = vmul.f32 -0.5, %v5132_v5  ;;  %v5311_v18 = vpop.eup %3312  ;;  %v997_v44 = vmul.f32 -0.5, %v5142_v0 }
 0x14b   : > { %v5314_v32 = vmul.f32 1.442695, %v5168_v60  ;;  %v5317_v56 = vmul.f32 1.442695, %v5172_v13  ;;  %v5320_v20 = vpop.eup %3314  ;;  %3334 = vpow2.f32 %v917_v4  ;;  %v5323_v21 = vmul.f32 1.442695, %v5179_v61 }
 0x14c   : > { %v5326_v58 = vmul.f32 1.442695, %v5183_v50  ;;  %v1006_v23 = vmul.f32 -0.5, %v5153_v31  ;;  %v5329_v8 = vpop.eup %3316  ;;  %3336 = vpow2.f32 %v919_v3  ;;  %v5332_v60 = vmul.f32 1.442695, %v5190_v59 }
 0x14d   : > { %8820 = vst [vmem:[#allocation158_spill] sm:$0xff] %v5329_v8  ;;  %v5335_v13 = vmul.f32 1.442695, %v5194_v28  ;;  %v5338_v7 = vmul.f32 1.442695, %v5201_v62  ;;  %v5340_v4 = vpop.eup %3318  ;;  %3338 = vpow2.f32 %v921_v10  ;;  %v989_v8 = vadd.f32 1.0, %v988_v27 }
 0x14e   : > { %8822 = vst [vmem:[#allocation160_spill] sm:$0xff] %v5340_v4  ;;  %v5343_v50 = vmul.f32 1.442695, %v5205_v1  ;;  %v5346_v61 = vmul.f32 1.442695, %v5212_v25  ;;  %v5348_v3 = vpop.eup %3320  ;;  %3340 = vpow2.f32 %v923_v45  ;;  %v5351_v59 = vadd.f32 1.0, %v5132_v5 }
 0x14f   : > { %8821 = vst [vmem:[#allocation159_spill] sm:$0xff] %v5338_v7  ;;  %8823 = vst [vmem:[#allocation161_spill] sm:$0xff] %v5348_v3  ;;  %v998_v28 = vadd.f32 1.0, %v997_v44  ;;  %v1015_v62 = vmul.f32 -0.5, %v5164_v19  ;;  %v5354_v7 = vpop.eup %3322  ;;  %3342 = vpow2.f32 %v925_v47  ;;  %v1007_v1 = vadd.f32 1.0, %v1006_v23 }
 0x150   : > { %8824 = vst [vmem:[#allocation162_spill] sm:$0xff] %v5354_v7  ;;  %v1024_v4 = vmul.f32 -0.5, %v5175_v14  ;;  %v5358_v25 = vpop.eup %3324  ;;  %3344 = vpow2.f32 %v5239_v40  ;;  %v5362_v45 = vadd.f32 1.0, %v5142_v0  ;;  %v5366_v44 = vadd.f32 1.0, %v5153_v31 }
 0x151   : > { %8825 = vst [vmem:[#allocation163_spill] sm:$0xff] %v5358_v25  ;;  %v5368_v3 = vpop.eup %3326  ;;  %3346 = vpow2.f32 %v5242_v42  ;;  %v5372_v47 = vmul.f32 %v5132_v5, %v989_v8  ;;  %v1033_v10 = vmul.f32 -0.5, %v5186_v63  ;;  %v5380_v27 = vmul.f32 %v5142_v0, %v998_v28 }
 0x152   : > { %8826 = vst [vmem:[#allocation164_spill] sm:$0xff] %v5368_v3  ;;  %v5376_v40 = vpop.eup %3328  ;;  %3348 = vpow2.f32 %v5245_v46  ;;  %v5383_v25 = vadd.f32 1.0, %v5164_v19  ;;  %v1016_v3 = vadd.f32 1.0, %v1015_v62  ;;  %v5389_v42 = vmul.f32 %v5153_v31, %v1007_v1 }
 0x153   : > { %8827 = vst [vmem:[#allocation165_spill] sm:$0xff] %v5372_v47  ;;  %8828 = vst [vmem:[#allocation166_spill] sm:$0xff] %v5380_v27  ;;  %v5385_v7 = vpop.eup %3330  ;;  %3350 = vpow2.f32 %v5250_v53  ;;  %v1025_v8 = vadd.f32 1.0, %v1024_v4  ;;  %v1042_v23 = vmul.f32 -0.5, %v5197_v2  ;;  %v5397_v28 = vadd.f32 1.0, %v5175_v14 }
 0x154   : > { %8829 = vst [vmem:[#allocation167_spill] sm:$0xff] %v5389_v42  ;;  %v5392_v47 = vpop.eup %3332  ;;  %3352 = vpow2.f32 %v5253_v35  ;;  %v1051_v62 = vmul.f32 -0.5, %v5208_v9  ;;  %v1034_v4 = vadd.f32 1.0, %v1033_v10  ;;  %v1060_v1 = vmul.f32 -0.5, %v5216_v48 }
 0x155   : > { %8830 = vst [vmem:[#allocation168_spill] sm:$0xff] %v5392_v47  ;;  %v5400_v27 = vpop.eup %3334  ;;  %3354 = vpow2.f32 %v5256_v39  ;;  %v5409_v35 = vmul.f32 %v5164_v19, %v1016_v3  ;;  %v5412_v46 = vadd.f32 1.0, %v5186_v63  ;;  %v5419_v39 = vmul.f32 %v5175_v14, %v1025_v8 }
 0x156   : > { %8831 = vst [vmem:[#allocation169_spill] sm:$0xff] %v5400_v27  ;;  %v5405_v42 = vpop.eup %3336  ;;  %3356 = vpow2.f32 %v5261_v33  ;;  %v5422_v10 = vadd.f32 1.0, %v5197_v2  ;;  %v1043_v53 = vadd.f32 1.0, %v1042_v23  ;;  %v1069_v47 = vmul.f32 -0.5, %v5221_v12 }
 0x157   : > { %8832 = vst [vmem:[#allocation170_spill] sm:$0xff] %v5405_v42  ;;  %8833 = vst [vmem:[#allocation171_spill] sm:$0xff] %v5409_v35  ;;  %v5415_v27 = vpop.eup %3338  ;;  %3358 = vpow2.f32 %v5264_v16  ;;  %v1052_v42 = vadd.f32 1.0, %v1051_v62  ;;  %v5433_v16 = vmul.f32 %v5186_v63, %v1034_v4  ;;  %v1061_v8 = vadd.f32 1.0, %v1060_v1 }
 0x158   : > { %8834 = vst [vmem:[#allocation172_spill] sm:$0xff] %v5415_v27  ;;  %v5424_v33 = vpop.eup %3340  ;;  %3360 = vpow2.f32 %v5267_v17  ;;  %v1078_v27 = vmul.f32 -0.5, %v5226_v6  ;;  %v5440_v17 = vadd.f32 1.0, %v5208_v9  ;;  %v5444_v3 = vadd.f32 1.0, %v5216_v48 }
 0x159   : > { %8835 = vst [vmem:[#allocation173_spill] sm:$0xff] %v5424_v33  ;;  %v5429_v35 = vpop.eup %3342  ;;  %3362 = vpow2.f32 %v5272_v26  ;;  %v5450_v26 = vmul.f32 %v5197_v2, %v1043_v53  ;;  %v1087_v1 = vmul.f32 -0.5, %v5231_v29  ;;  %v5458_v62 = vmul.f32 %v5208_v9, %v1052_v42 }
 0x15a   : > { %8836 = vst [vmem:[#allocation174_spill] sm:$0xff] %v5429_v35  ;;  %v5436_v23 = vpop.eup %3344  ;;  %3364 = vpow2.f32 %v5275_v30  ;;  %v1079_v53 = vadd.f32 1.0, %v1078_v27  ;;  %v1096_v4 = vmul.f32 -0.5, %v5236_v55  ;;  %v5475_v42 = vadd.f32 1.0, %v5226_v6 }
 0x15b   : > { %8837 = vst [vmem:[#allocation175_spill] sm:$0xff] %v5436_v23  ;;  %v5446_v35 = vpop.eup %3346  ;;  %3366 = vpow2.f32 %v5278_v52  ;;  %8840 = vst [vmem:[#allocation178_spill] sm:$0xff] %v5458_v62  ;;  %v5461_v23 = vadd.f32 1.0, %v5221_v12  ;;  %v5467_v52 = vmul.f32 %v5216_v48, %v1061_v8  ;;  %v1088_v27 = vadd.f32 1.0, %v1087_v1 }
 0x15c   : > { %8838 = vst [vmem:[#allocation176_spill] sm:$0xff] %v5446_v35  ;;  %v5454_v30 = vpop.eup %3348  ;;  %3368 = vpow2.f32 %v5283_v24  ;;  %v1070_v35 = vadd.f32 1.0, %v1069_v47  ;;  %v1105_v47 = vmul.f32 -0.5, %v5247_v49  ;;  %v1114_v8 = vmul.f32 -0.5, %v5258_v22 }
 0x15d   : > { %8839 = vst [vmem:[#allocation177_spill] sm:$0xff] %v5454_v30  ;;  %v5463_v33 = vpop.eup %3350  ;;  %3370 = vpow2.f32 %v5286_v11  ;;  %8842 = vst [vmem:[#allocation180_spill] sm:$0xff] %v5467_v52  ;;  %v5490_v24 = vadd.f32 1.0, %v5231_v29  ;;  %v5500_v1 = vadd.f32 1.0, %v5236_v55  ;;  %v1097_v11 = vadd.f32 1.0, %v1096_v4 }
 0x15e   : > { %8841 = vst [vmem:[#allocation179_spill] sm:$0xff] %v5463_v33  ;;  %v5470_v30 = vpop.eup %3352  ;;  %3372 = vpow2.f32 %v5289_v51  ;;  %v5487_v51 = vmul.f32 %v5221_v12, %v1070_v35  ;;  %v5522_v35 = vadd.f32 1.0, %v5258_v22 }
 0x15f   : > { %8843 = vst [vmem:[#allocation181_spill] sm:$0xff] %v5470_v30  ;;  %v5478_v33 = vpop.eup %3354  ;;  %3374 = vpow2.f32 %v5294_v54  ;;  %v5497_v54 = vmul.f32 %v5226_v6, %v1079_v53  ;;  %v1123_v30 = vmul.f32 -0.5, %v5269_v41  ;;  %v1115_v53 = vadd.f32 1.0, %v1114_v8 }
 0x160   : > { %8844 = vst [vmem:[#allocation182_spill] sm:$0xff] %v5478_v33  ;;  %v5483_v52 = vpop.eup %3356  ;;  %3376 = vpow2.f32 %v5297_v34  ;;  %8846 = vst [vmem:[#allocation184_spill] sm:$0xff] %v5487_v51  ;;  %v1141_v8 = vmul.f32 -0.5, %v5291_v37 }
 0x161   : > { %8845 = vst [vmem:[#allocation183_spill] sm:$0xff] %v5483_v52  ;;  %v5493_v33 = vpop.eup %3358  ;;  %3378 = vpow2.f32 %v5300_v57  ;;  %8848 = vst [vmem:[#allocation186_spill] sm:$0xff] %v5497_v54  ;;  %v1106_v52 = vadd.f32 1.0, %v1105_v47  ;;  %v5511_v57 = vmul.f32 %v5231_v29, %v1088_v27  ;;  %v1150_v27 = vmul.f32 -0.5, %v5302_v38 }
 0x162   : > { %8847 = vst [vmem:[#allocation185_spill] sm:$0xff] %v5493_v33  ;;  %v5502_v34 = vpop.eup %3360  ;;  %3380 = vpow2.f32 %v5305_v43  ;;  %v1132_v33 = vmul.f32 -0.5, %v5280_v36  ;;  %v5518_v43 = vadd.f32 1.0, %v5247_v49 }
 0x163   : > { %8849 = vst [vmem:[#allocation187_spill] sm:$0xff] %v5502_v34  ;;  %v5507_v51 = vpop.eup %3362  ;;  %3382 = vpow2.f32 %v5308_v15  ;;  %8851 = vst [vmem:[#allocation189_spill] sm:$0xff] %v5511_v57  ;;  %v5528_v15 = vmul.f32 %v5236_v55, %v1097_v11  ;;  %v5536_v47 = vmul.f32 %v5247_v49, %v1106_v52  ;;  %v5553_v52 = vadd.f32 1.0, %v5280_v36 }
 0x164   : > { %8850 = vst [vmem:[#allocation188_spill] sm:$0xff] %v5507_v51  ;;  %v5514_v4 = vpop.eup %3364  ;;  %3384 = vpow2.f32 %v5314_v32  ;;  %v1133_v11 = vadd.f32 1.0, %v1132_v33  ;;  %v1142_v33 = vadd.f32 1.0, %v1141_v8  ;;  %v5578_v8 = vadd.f32 1.0, %v5302_v38 }
 0x165   : > { %8852 = vst [vmem:[#allocation190_spill] sm:$0xff] %v5514_v4  ;;  %v5524_v51 = vpop.eup %3366  ;;  %3386 = vpow2.f32 %v5317_v56  ;;  %8854 = vst [vmem:[#allocation192_spill] sm:$0xff] %v5528_v15  ;;  %v5539_v4 = vadd.f32 1.0, %v5269_v41  ;;  %v5545_v56 = vmul.f32 %v5258_v22, %v1115_v53  ;;  %v1168_v53 = vmul.f32 -0.5, %v5320_v20 }
 0x166   : > { %8853 = vst [vmem:[#allocation191_spill] sm:$0xff] %v5524_v51  ;;  %v5532_v32 = vpop.eup %3368  ;;  %3388 = vpow2.f32 %v5323_v21  ;;  %8856 = vst [vmem:[#allocation194_spill] sm:$0xff] %v5536_v47  ;;  %v1124_v51 = vadd.f32 1.0, %v1123_v30  ;;  %v1159_v30 = vmul.f32 -0.5, %v5311_v18  ;;  %v5568_v21 = vadd.f32 1.0, %v5291_v37 }
 0x167   : > { %8855 = vst [vmem:[#allocation193_spill] sm:$0xff] %v5532_v32  ;;  %v5541_v34 = vpop.eup %3370  ;;  %3390 = vpow2.f32 %v5326_v58  ;;  %8858 = vst [vmem:[#allocation196_spill] sm:$0xff] %v5545_v56  ;;  %v1151_v58 = vadd.f32 1.0, %v1150_v27  ;;  %v8889_v57 = vand.u32 2147483647, %v5142_v0  ;;  %v8895_v0 = vmov 0 }
 0x168   : > { %8857 = vst [vmem:[#allocation195_spill] sm:$0xff] %v5541_v34  ;;  %v5548_v32 = vpop.eup %3372  ;;  %3392 = vpow2.f32 %v5332_v60  ;;  %v5565_v60 = vmul.f32 %v5269_v41, %v1124_v51  ;;  %v5600_v51 = vadd.f32 1.0, %v5320_v20  ;;  %v8993_v62 = vld [vmem:[#allocation186_spill] sm:$0xff] }
 0x169   : > { %8859 = vst [vmem:[#allocation197_spill] sm:$0xff] %v5548_v32  ;;  %v5556_v34 = vpop.eup %3374  ;;  %3394 = vpow2.f32 %v5335_v13  ;;  %v8862_v32 = vld [vmem:[#allocation159_spill] sm:$0xff]  ;;  %v5575_v13 = vmul.f32 %v5280_v36, %v1133_v11  ;;  %v1169_v11 = vadd.f32 1.0, %v1168_v53  ;;  %v8874_v53 = vld [vmem:[#allocation161_spill] sm:$0xff]  ;;  %vm5649_vm1 = vcmp.lt.f32.partialorder %v8889_v57, 0.0004427343 }
 0x16a   : > { %8860 = vst [vmem:[#allocation198_spill] sm:$0xff] %v5556_v34  ;;  %v5561_v56 = vpop.eup %3376  ;;  %3396 = vpow2.f32 %v8862_v32  ;;  %8863 = vst [vmem:[#allocation159_spill] sm:$0xff] %v5565_v60  ;;  %v8867_v60 = vld [vmem:[#allocation158_spill] sm:$0xff]  ;;  %v8897_v57 = vand.u32 2147483647, %v5164_v19 }
 0x16b   : > { %8861 = vst [vmem:[#allocation199_spill] sm:$0xff] %v5561_v56  ;;  %v5571_v34 = vpop.eup %3378  ;;  %3398 = vpow2.f32 %v5343_v50  ;;  %8865 = vst [vmem:[#allocation201_spill] sm:$0xff] %v5575_v13  ;;  %v1160_v56 = vadd.f32 1.0, %v1159_v30  ;;  %v1177_v47 = vmul.f32 -0.5, %v8867_v60  ;;  %v5589_v50 = vmul.f32 %v5291_v37, %v1142_v33  ;;  %v8879_v33 = vld [vmem:[#allocation162_spill] sm:$0xff] }
 0x16c   : > { %8864 = vst [vmem:[#allocation200_spill] sm:$0xff] %v5571_v34  ;;  %v5580_v32 = vpop.eup %3380  ;;  %3400 = vpow2.f32 %v5346_v61  ;;  %v8870_v34 = vld [vmem:[#allocation160_spill] sm:$0xff]  ;;  %v5596_v61 = vadd.f32 1.0, %v5311_v18  ;;  %vm5671_vm3 = vcmp.lt.f32.partialorder %v8897_v57, 0.0004427343 }
 0x16d   : > { %8866 = vst [vmem:[#allocation202_spill] sm:$0xff] %v5580_v32  ;;  %v5585_v15 = vpop.eup %3382  ;;  %3402 = vlog2.f32 %v5351_v59  ;;  %8869 = vst [vmem:[#allocation203_spill] sm:$0xff] %v5589_v50  ;;  %v1186_v13 = vmul.f32 -0.5, %v8870_v34  ;;  %v5606_v59 = vmul.f32 %v5302_v38, %v1151_v58  ;;  %v5614_v30 = vmul.f32 %v5311_v18, %v1160_v56 }
 0x16e   : > { %8868 = vst [vmem:[#allocation158_spill] sm:$0xff] %v5585_v15  ;;  %v5592_v27 = vpop.eup %3384  ;;  %3404 = vlog2.f32 %v5362_v45  ;;  %v5617_v32 = vadd.f32 1.0, %v8867_v60  ;;  %v5631_v56 = vadd.f32 1.0, %v8870_v34 }
 0x16f   : > { %8871 = vst [vmem:[#allocation160_spill] sm:$0xff] %v5592_v27  ;;  %v5602_v15 = vpop.eup %3386  ;;  %3406 = vlog2.f32 %v5366_v44  ;;  %8873 = vst [vmem:[#allocation205_spill] sm:$0xff] %v5606_v59  ;;  %v1195_v27 = vmul.f32 -0.5, %v8874_v53  ;;  %v5623_v44 = vmul.f32 %v5320_v20, %v1169_v11  ;;  %v1187_v58 = vadd.f32 1.0, %v1186_v13 }
 0x170   : > { %8872 = vst [vmem:[#allocation204_spill] sm:$0xff] %v5602_v15  ;;  %v5610_v45 = vpop.eup %3388  ;;  %3408 = vlog2.f32 %v5383_v25  ;;  %8876 = vst [vmem:[#allocation206_spill] sm:$0xff] %v5614_v30  ;;  %v1178_v15 = vadd.f32 1.0, %v1177_v47  ;;  %v1204_v59 = vmul.f32 -0.5, %v8879_v33  ;;  %v8881_v47 = vld [vmem:[#allocation163_spill] sm:$0xff]  ;;  %v8884_v11 = vmov 0 }
 0x171   : > { %8875 = vst [vmem:[#allocation161_spill] sm:$0xff] %v5610_v45  ;;  %v5619_v50 = vpop.eup %3390  ;;  %3410 = vlog2.f32 %v5397_v28  ;;  %8878 = vst [vmem:[#allocation208_spill] sm:$0xff] %v5623_v44  ;;  %v1213_v30 = vmul.f32 -0.5, %v8881_v47  ;;  %v8883_v28 = vand.u32 2147483647, %v5132_v5 }
 0x172   : > { %8877 = vst [vmem:[#allocation207_spill] sm:$0xff] %v5619_v50  ;;  %v5626_v45 = vpop.eup %3392  ;;  %3412 = vlog2.f32 %v5412_v46  ;;  %v1196_v46 = vadd.f32 1.0, %v1195_v27  ;;  %v5655_v5 = vmul.f32 %v8867_v60, %v1178_v15  ;;  %v8894_v13 = vand.u32 2147483647, %v5153_v31 }
 0x173   : > { %8880 = vst [vmem:[#allocation162_spill] sm:$0xff] %v5626_v45  ;;  %v5634_v50 = vpop.eup %3394  ;;  %vm5638_vm0 = vcmp.lt.f32.partialorder %v8883_v28, 0.0004427343  ;;  %3414 = vlog2.f32 %v5422_v10  ;;  %v8887_v45 = vld [vmem:[#allocation164_spill] sm:$0xff]  ;;  %v5658_v10 = vadd.f32 1.0, %v8874_v53  ;;  %v5677_v15 = vmul.f32 %v8870_v34, %v1187_v58 }
 0x174   : > { %8882 = vst [vmem:[#allocation163_spill] sm:$0xff] %v5634_v50  ;;  %v8885_v11 = vsel %vm5638_vm0, 4294967295, %v8884_v11  ;;  %v1222_v25 = vmul.f32 -0.5, %v8887_v45  ;;  %v5645_v44 = vpop.eup %3396  ;;  %3416 = vlog2.f32 %v5440_v17  ;;  %8892 = vst [vmem:[#allocation210_spill] sm:$0xff] %v5655_v5  ;;  %vm5665_vm2 = vcmp.lt.f32.partialorder %v8894_v13, 0.0004427343 }
 0x175   : > { %8886 = vst [vmem:[#allocation209_spill] sm:$0xff] %v8885_v11  ;;  %8888 = vst [vmem:[#allocation164_spill] sm:$0xff] %v5645_v44  ;;  %v5661_v28 = vpop.eup %3398  ;;  %v8896_v0 = vsel %vm5665_vm2, 4294967295, %v8895_v0  ;;  %v8898_v17 = vmov 0  ;;  %3418 = vlog2.f32 %v5444_v3  ;;  %v5680_v27 = vadd.f32 1.0, %v8879_v33  ;;  %v8955_v11 = vld [vmem:[#allocation171_spill] sm:$0xff] }
 0x176   : > { %8893 = vst [vmem:[#allocation211_spill] sm:$0xff] %v5661_v28  ;;  %v8899_v17 = vsel %vm5671_vm3, 4294967295, %v8898_v17  ;;  %8900 = vst [vmem:[#allocation212_spill] sm:$0xff] %v5677_v15  ;;  %v1205_v28 = vadd.f32 1.0, %v1204_v59  ;;  %v5682_v31 = vpop.eup %3400  ;;  %v8902_v13 = vand.u32 2147483647, %v5175_v14  ;;  %3420 = vlog2.f32 %v5461_v23 }
 0x177   : > { %8901 = vst [vmem:[#allocation213_spill] sm:$0xff] %v5682_v31  ;;  %v8903_v44 = vmov 0  ;;  %v1214_v3 = vadd.f32 1.0, %v1213_v30  ;;  %v1231_v58 = vmul.f32 -0.5, %v5376_v40  ;;  %v3403_v57 = vpop.eup %3402  ;;  %v8905_v50 = vand.u32 2147483647, %v5186_v63 }
 0x178   : > { %vm5686_vm4 = vcmp.lt.f32.partialorder %v8902_v13, 0.0004427343  ;;  %v8906_v59 = vmov 0  ;;  %3422 = vlog2.f32 %v5475_v42  ;;  %v5701_v14 = vmul.f32 %v8874_v53, %v1196_v46  ;;  %v3405_v19 = vpop.eup %3404 }
 0x179   : > { %v8904_v44 = vsel %vm5686_vm4, 4294967295, %v8903_v44  ;;  %vm5695_vm5 = vcmp.lt.f32.partialorder %v8905_v50, 0.0004427343  ;;  %v5704_v13 = vadd.f32 1.0, %v8881_v47  ;;  %v1223_v23 = vadd.f32 1.0, %v1222_v25  ;;  %v3407_v46 = vpop.eup %3406 }
 0x17a   : > { %v8907_v59 = vsel %vm5695_vm5, 4294967295, %v8906_v59  ;;  %8909 = vst [vmem:[#allocation215_spill] sm:$0xff] %v5701_v14  ;;  %v8910_v30 = vand.u32 2147483647, %v5197_v2  ;;  %v8911_v31 = vmov 0  ;;  %3424 = vlog2.f32 %v5490_v24  ;;  %v3409_v14 = vpop.eup %3408 }
 0x17b   : > { %8908 = vst [vmem:[#allocation214_spill] sm:$0xff] %v8907_v59  ;;  %v5715_v42 = vadd.f32 1.0, %v8887_v45  ;;  %v1240_v50 = vmul.f32 -0.5, %v5385_v7  ;;  %3426 = vlog2.f32 %v5500_v1  ;;  %v5720_v25 = vmul.f32 %v8879_v33, %v1205_v28 }
 0x17c   : > { %vm5708_vm6 = vcmp.lt.f32.partialorder %v8910_v30, 0.0004427343  ;;  %v5724_v30 = vadd.f32 1.0, %v5376_v40  ;;  %v5726_v24 = vmul.f32 0.6931472, %v3403_v57  ;;  %v8916_v15 = vmov 0 }
 0x17d   : > { %v8912_v31 = vsel %vm5708_vm6, 4294967295, %v8911_v31  ;;  %8913 = vst [vmem:[#allocation216_spill] sm:$0xff] %v5720_v25  ;;  %v8915_v63 = vand.u32 2147483647, %v5208_v9  ;;  %3428 = vlog2.f32 %v5518_v43  ;;  %v5736_v1 = vmul.f32 %v8881_v47, %v1214_v3  ;;  %v3411_v25 = vpop.eup %3410 }
 0x17e   : > { %8914 = vst [vmem:[#allocation217_spill] sm:$0xff] %v5726_v24  ;;  %v1232_v28 = vadd.f32 1.0, %v1231_v58  ;;  %v5738_v2 = vmul.f32 0.6931472, %v3405_v19  ;;  %v8921_v5 = vand.u32 2147483647, %v5216_v48  ;;  %3430 = vlog2.f32 %v5522_v35  ;;  %v3413_v3 = vpop.eup %3412 }
 0x17f   : > { %vm5730_vm7 = vcmp.lt.f32.partialorder %v8915_v63, 0.0004427343  ;;  %8919 = vst [vmem:[#allocation219_spill] sm:$0xff] %v5736_v1  ;;  %v8922_v57 = vmov 0  ;;  %v8924_v9 = vand.u32 2147483647, %v5221_v12  ;;  %v5754_v43 = vmul.f32 %v8887_v45, %v1223_v23  ;;  %v3415_v35 = vpop.eup %3414 }
 0x180   : > { %v8917_v15 = vsel %vm5730_vm7, 4294967295, %v8916_v15  ;;  %8920 = vst [vmem:[#allocation220_spill] sm:$0xff] %v5738_v2  ;;  %vm5742_vm8 = vcmp.lt.f32.partialorder %v8921_v5, 0.0004427343  ;;  %v8925_v63 = vmov 0  ;;  %v8931_v12 = vmov 0 }
 0x181   : > { %8918 = vst [vmem:[#allocation218_spill] sm:$0xff] %v8917_v15  ;;  %v8923_v57 = vsel %vm5742_vm8, 4294967295, %v8922_v57  ;;  %vm5748_vm9 = vcmp.lt.f32.partialorder %v8924_v9, 0.0004427343  ;;  %8927 = vst [vmem:[#allocation221_spill] sm:$0xff] %v5754_v43  ;;  %3432 = vlog2.f32 %v5539_v4  ;;  %v1241_v9 = vadd.f32 1.0, %v1240_v50 }
 0x182   : > { %v8926_v63 = vsel %vm5748_vm9, 4294967295, %v8925_v63  ;;  %v5757_v58 = vmul.f32 0.6931472, %v3407_v46  ;;  %v5759_v48 = vmul.f32 0.6931472, %v3409_v14  ;;  %v8935_v19 = vmov 0  ;;  %v3417_v46 = vpop.eup %3416 }
 0x183   : > { %v8930_v5 = vand.u32 2147483647, %v5226_v6  ;;  %v5768_v1 = vmul.f32 0.6931472, %v3411_v25  ;;  %v8934_v23 = vand.u32 2147483647, %v5231_v29  ;;  %3434 = vlog2.f32 %v5553_v52 }
 0x184   : > { %8928 = vst [vmem:[#allocation222_spill] sm:$0xff] %v5757_v58  ;;  %8929 = vst [vmem:[#allocation223_spill] sm:$0xff] %v5759_v48  ;;  %v8937_v14 = vand.u32 2147483647, %v5236_v55  ;;  %v8938_v6 = vmov 0  ;;  %v5784_v4 = vadd.f32 1.0, %v5385_v7  ;;  %3436 = vlog2.f32 %v5568_v21 }
 0x185   : > { %vm5763_vm10 = vcmp.lt.f32.partialorder %v8930_v5, 0.0004427343  ;;  %vm5772_vm11 = vcmp.lt.f32.partialorder %v8934_v23, 0.0004427343  ;;  %v5791_v5 = vmul.f32 0.6931472, %v3413_v3  ;;  %v5801_v52 = vmul.f32 %v5376_v40, %v1232_v28 }
 0x186   : > { %v8932_v12 = vsel %vm5763_vm10, 4294967295, %v8931_v12  ;;  %v8936_v19 = vsel %vm5772_vm11, 4294967295, %v8935_v19  ;;  %vm5778_vm12 = vcmp.lt.f32.partialorder %v8937_v14, 0.0004427343  ;;  %v8943_v55 = vand.u32 2147483647, %v5247_v49  ;;  %v3419_v14 = vpop.eup %3418 }
 0x187   : > { %8933 = vst [vmem:[#allocation224_spill] sm:$0xff] %v8932_v12  ;;  %v8939_v6 = vsel %vm5778_vm12, 4294967295, %v8938_v6  ;;  %8942 = vst [vmem:[#allocation226_spill] sm:$0xff] %v5791_v5  ;;  %v8944_v23 = vmov 0  ;;  %v8948_v50 = vld [vmem:[#allocation166_spill] sm:$0xff]  ;;  %v8950_v49 = vmov 0  ;;  %3438 = vlog2.f32 %v5578_v8  ;;  %v3421_v28 = vpop.eup %3420 }
 0x188   : > { %8940 = vst [vmem:[#allocation225_spill] sm:$0xff] %v8939_v6  ;;  %vm5795_vm13 = vcmp.lt.f32.partialorder %v8943_v55, 0.0004427343  ;;  %8947 = vst [vmem:[#allocation228_spill] sm:$0xff] %v5801_v52  ;;  %v5807_v25 = vmul.f32 0.6931472, %v3415_v35  ;;  %3440 = vlog2.f32 %v5596_v61 }
 0x189   : > { %v8945_v23 = vsel %vm5795_vm13, 4294967295, %v8944_v23  ;;  %v8949_v3 = vand.u32 2147483647, %v5258_v22  ;;  %v8953_v21 = vld [vmem:[#allocation168_spill] sm:$0xff]  ;;  %v8954_v24 = vld [vmem:[#allocation167_spill] sm:$0xff]  ;;  %v5827_v22 = vmul.f32 %v5385_v7, %v1241_v9  ;;  %3442 = vlog2.f32 %v5600_v51  ;;  %v9106_v52 = vld [vmem:[#allocation185_spill] sm:$0xff] }
 0x18a   : > { %8946 = vst [vmem:[#allocation227_spill] sm:$0xff] %v8945_v23  ;;  %v1249_v55 = vmul.f32 -0.5, %v8953_v21  ;;  %v5833_v2 = vmul.f32 0.6931472, %v3417_v46  ;;  %v1246_v29 = vadd.f32 1.0, %v8953_v21  ;;  %v8960_v8 = vmov 0 }
 0x18b   : > { %vm5811_vm14 = vcmp.lt.f32.partialorder %v8949_v3, 0.0004427343  ;;  %8956 = vst [vmem:[#allocation168_spill] sm:$0xff] %v5827_v22  ;;  %v3423_v3 = vpop.eup %3422  ;;  %v5841_v9 = vmul.f32 0.6931472, %v3419_v14  ;;  %3444 = vlog2.f32 %v5617_v32  ;;  %v9247_v54 = vld [vmem:[#allocation222_spill] sm:$0xff] }
 0x18c   : > { %v8951_v49 = vsel %vm5811_vm14, 4294967295, %v8950_v49  ;;  %8957 = vst [vmem:[#allocation167_spill] sm:$0xff] %v5833_v2  ;;  %v3425_v58 = vpop.eup %3424  ;;  %v5843_v35 = vmul.f32 0.6931472, %v3421_v28  ;;  %v8959_v48 = vand.u32 2147483647, %v5269_v41  ;;  %3446 = vlog2.f32 %v5631_v56 }
 0x18d   : > { %8952 = vst [vmem:[#allocation166_spill] sm:$0xff] %v8951_v49  ;;  %8958 = vst [vmem:[#allocation171_spill] sm:$0xff] %v5841_v9  ;;  %v3427_v51 = vpop.eup %3426  ;;  %v5856_v59 = vmul.f32 0.6931472, %v3423_v3  ;;  %v8964_v14 = vand.u32 2147483647, %v5280_v36  ;;  %3448 = vlog2.f32 %v5658_v10 }
 0x18e   : > { %vm5847_vm15 = vcmp.lt.f32.partialorder %v8959_v48, 0.0004427343  ;;  %v8965_v28 = vmov 0  ;;  %v1250_v41 = vadd.f32 1.0, %v1249_v55  ;;  %v3429_v48 = vpop.eup %3428  ;;  %v5865_v61 = vmul.f32 0.6931472, %v3425_v58 }
 0x18f   : > { %v8961_v8 = vsel %vm5847_vm15, 4294967295, %v8960_v8  ;;  %8963 = vst [vmem:[#allocation230_spill] sm:$0xff] %v5856_v59  ;;  %vm5860_vm5 = vcmp.lt.f32.partialorder %v8964_v14, 0.0004427343  ;;  %v5867_v32 = vmul.f32 0.6931472, %v3427_v51  ;;  %v3431_v58 = vpop.eup %3430  ;;  %3450 = vlog2.f32 %v5680_v27 }
 0x190   : > { %8962 = vst [vmem:[#allocation229_spill] sm:$0xff] %v8961_v8  ;;  %v8966_v28 = vsel %vm5860_vm5, 4294967295, %v8965_v28  ;;  %8967 = vst [vmem:[#allocation231_spill] sm:$0xff] %v5865_v61  ;;  %v8969_v5 = vand.u32 2147483647, %v5291_v37  ;;  %v8973_v3 = vmov 0  ;;  %v3433_v15 = vpop.eup %3432  ;;  %3452 = vlog2.f32 %v5704_v13 }
 0x191   : > { %8968 = vst [vmem:[#allocation232_spill] sm:$0xff] %v5867_v32  ;;  %v8972_v36 = vand.u32 2147483647, %v5302_v38  ;;  %v1252_v56 = vand.u32 2147483647, %v8953_v21  ;;  %v8978_v38 = vmov 0  ;;  %v3435_v27 = vpop.eup %3434  ;;  %3454 = vlog2.f32 %v5715_v42 }
 0x192   : > { %vm5871_vm4 = vcmp.lt.f32.partialorder %v8969_v5, 0.0004427343  ;;  %v5887_v5 = vmul.f32 0.6931472, %v3429_v48  ;;  %v8977_v55 = vand.u32 2147483647, %v5311_v18  ;;  %v3437_v13 = vpop.eup %3436  ;;  %3456 = vlog2.f32 %v5724_v30 }
 0x193   : > { %vm5877_vm6 = vcmp.lt.f32.partialorder %v8972_v36, 0.0004427343  ;;  %v8981_v51 = vand.u32 2147483647, %v5320_v20  ;;  %v8982_v10 = vmov 0  ;;  %v8985_v14 = vld [vmem:[#allocation169_spill] sm:$0xff]  ;;  %3458 = vlog2.f32 %v5784_v4 }
 0x194   : > { %v8974_v3 = vsel %vm5877_vm6, 4294967295, %v8973_v3  ;;  %8976 = vst [vmem:[#allocation234_spill] sm:$0xff] %v5887_v5  ;;  %vm5891_vm3 = vcmp.lt.f32.partialorder %v8977_v55, 0.0004427343  ;;  %v1258_v36 = vmul.f32 -0.5, %v8985_v14  ;;  %v8986_v48 = vld [vmem:[#allocation180_spill] sm:$0xff]  ;;  %3460 = vlog2.f32 %v1246_v29 }
 0x195   : > { %8975 = vst [vmem:[#allocation233_spill] sm:$0xff] %v8974_v3  ;;  %v8979_v38 = vsel %vm5891_vm3, 4294967295, %v8978_v38  ;;  %vm5897_vm2 = vcmp.lt.f32.partialorder %v8981_v51, 0.0004427343  ;;  %v8987_v55 = vld [vmem:[#allocation184_spill] sm:$0xff]  ;;  %v8990_v2 = vmov 0 }
 0x196   : > { %8980 = vst [vmem:[#allocation235_spill] sm:$0xff] %v8979_v38  ;;  %v8983_v10 = vsel %vm5897_vm2, 4294967295, %v8982_v10  ;;  %v5911_v20 = vmul.f32 0.6931472, %v3431_v58  ;;  %v8989_v51 = vand.u32 2147483647, %v8867_v60  ;;  %v5932_v60 = vmul.f32 %v8953_v21, %v1250_v41  ;;  %v3439_v41 = vpop.eup %3438 }
 0x197   : > { %8984 = vst [vmem:[#allocation236_spill] sm:$0xff] %v8983_v10  ;;  %v8994_v9 = vand.u32 2147483647, %v8870_v34  ;;  %v8995_v37 = vmov 0  ;;  %v1255_v58 = vadd.f32 1.0, %v8985_v14  ;;  %v3441_v30 = vpop.eup %3440  ;;  %v9030_v32 = vmov 0 }
 0x198   : > { %8988 = vst [vmem:[#allocation169_spill] sm:$0xff] %v5911_v20  ;;  %vm5915_vm7 = vcmp.lt.f32.partialorder %v8989_v51, 0.0004427343  ;;  %8998 = vst [vmem:[#allocation186_spill] sm:$0xff] %v5932_v60  ;;  %v8999_v51 = vld [vmem:[#allocation189_spill] sm:$0xff]  ;;  %v3443_v5 = vpop.eup %3442  ;;  %v9345_v46 = vld [vmem:[#allocation206_spill] sm:$0xff] }
 0x199   : > { %v8991_v2 = vsel %vm5915_vm7, 4294967295, %v8990_v2  ;;  %vm5926_vm8 = vcmp.lt.f32.partialorder %v8994_v9, 0.0004427343  ;;  %v9001_v9 = vand.u32 2147483647, %v8874_v53  ;;  %v9007_v53 = vmov 0  ;;  %v3445_v18 = vpop.eup %3444 }
 0x19a   : > { %8992 = vst [vmem:[#allocation180_spill] sm:$0xff] %v8991_v2  ;;  %v8996_v37 = vsel %vm5926_vm8, 4294967295, %v8995_v37  ;;  %v1261_v21 = vand.u32 2147483647, %v8985_v14  ;;  %v5955_v61 = vmul.f32 0.6931472, %v3433_v15  ;;  %3462 = vlog2.f32 %v1255_v58 }
 0x19b   : > { %8997 = vst [vmem:[#allocation184_spill] sm:$0xff] %v8996_v37  ;;  %vm5945_vm10 = vcmp.lt.f32.partialorder %v9001_v9, 0.0004427343  ;;  %v9006_v34 = vand.u32 2147483647, %v8879_v33  ;;  %v1259_v9 = vadd.f32 1.0, %v1258_v36 }
 0x19c   : > { %9005 = vst [vmem:[#allocation189_spill] sm:$0xff] %v5955_v61  ;;  %v5968_v6 = vmul.f32 0.6931472, %v3435_v27  ;;  %v9011_v15 = vld [vmem:[#allocation170_spill] sm:$0xff]  ;;  %v5971_v33 = vmul.f32 0.6931472, %v3437_v13 }
 0x19d   : > { %vm5959_vm12 = vcmp.lt.f32.partialorder %v9006_v34, 0.0004427343  ;;  %v1264_v12 = vadd.f32 1.0, %v9011_v15  ;;  %v5973_v34 = vmul.f32 0.6931472, %v3439_v41  ;;  %v1267_v36 = vmul.f32 -0.5, %v9011_v15  ;;  %v3447_v41 = vpop.eup %3446 }
 0x19e   : > { %v9008_v53 = vsel %vm5959_vm12, 4294967295, %v9007_v53  ;;  %9010 = vst [vmem:[#allocation237_spill] sm:$0xff] %v5968_v6  ;;  %9012 = vst [vmem:[#allocation170_spill] sm:$0xff] %v5971_v33  ;;  %v9014_v59 = vand.u32 2147483647, %v8881_v47  ;;  %v9020_v13 = vmov 0  ;;  %v3449_v49 = vpop.eup %3448 }
 0x19f   : > { %9013 = vst [vmem:[#allocation238_spill] sm:$0xff] %v5973_v34  ;;  %v5982_v27 = vmul.f32 0.6931472, %v3441_v30  ;;  %v5984_v29 = vmul.f32 0.6931472, %v3443_v5  ;;  %3464 = vlog2.f32 %v1264_v12  ;;  %v9034_v12 = vld [vmem:[#allocation172_spill] sm:$0xff]  ;;  %v3451_v61 = vpop.eup %3450 }
 0x1a0   : > { %vm5977_vm13 = vcmp.lt.f32.partialorder %v9014_v59, 0.0004427343  ;;  %v9019_v20 = vand.u32 2147483647, %v8887_v45  ;;  %v9023_v47 = vand.u32 2147483647, %v5376_v40  ;;  %v6012_v40 = vmul.f32 %v8985_v14, %v1259_v9 }
 0x1a1   : > { %9017 = vst [vmem:[#allocation239_spill] sm:$0xff] %v5982_v27  ;;  %9018 = vst [vmem:[#allocation240_spill] sm:$0xff] %v5984_v29  ;;  %v9024_v59 = vmov 0  ;;  %v1270_v58 = vand.u32 2147483647, %v9011_v15  ;;  %v9040_v14 = vld [vmem:[#allocation203_spill] sm:$0xff] }
 0x1a2   : > { %vm5988_vm14 = vcmp.lt.f32.partialorder %v9019_v20, 0.0004427343  ;;  %vm5994_vm11 = vcmp.lt.f32.partialorder %v9023_v47, 0.0004427343  ;;  %v6003_v45 = vmul.f32 0.6931472, %v3445_v18 }
 0x1a3   : > { %v9021_v13 = vsel %vm5988_vm14, 4294967295, %v9020_v13  ;;  %v9025_v59 = vsel %vm5994_vm11, 4294967295, %v9024_v59  ;;  %v9029_v20 = vand.u32 2147483647, %v5385_v7  ;;  %9033 = vst [vmem:[#allocation245_spill] sm:$0xff] %v6012_v40  ;;  %v1273_v47 = vadd.f32 1.0, %v9034_v12 }
 0x1a4   : > { %9022 = vst [vmem:[#allocation241_spill] sm:$0xff] %v9021_v13  ;;  %9026 = vst [vmem:[#allocation242_spill] sm:$0xff] %v9025_v59  ;;  %v6019_v5 = vmul.f32 0.6931472, %v3447_v41  ;;  %vm6021_vm15 = vcmp.lt.f32.partialorder %v1252_v56, 0.0004427343 }
 0x1a5   : > { %9028 = vst [vmem:[#allocation243_spill] sm:$0xff] %v6003_v45  ;;  %vm6007_vm9 = vcmp.lt.f32.partialorder %v9029_v20, 0.0004427343  ;;  %v9037_v18 = vmov 0  ;;  %v1268_v7 = vadd.f32 1.0, %v1267_v36  ;;  %v1276_v20 = vmul.f32 -0.5, %v9034_v12  ;;  %v3453_v36 = vpop.eup %3452 }
 0x1a6   : > { %v9031_v32 = vsel %vm6007_vm9, 4294967295, %v9030_v32  ;;  %9036 = vst [vmem:[#allocation172_spill] sm:$0xff] %v6019_v5  ;;  %v9038_v18 = vsel %vm6021_vm15, 4294967295, %v9037_v18  ;;  %v6034_v41 = vmul.f32 0.6931472, %v3449_v49  ;;  %v9043_v56 = vmov 0 }
 0x1a7   : > { %9032 = vst [vmem:[#allocation244_spill] sm:$0xff] %v9031_v32  ;;  %9039 = vst [vmem:[#allocation246_spill] sm:$0xff] %v9038_v18  ;;  %vm6036_vm5 = vcmp.lt.f32.partialorder %v1261_v21, 0.0004427343  ;;  %3466 = vlog2.f32 %v1273_v47  ;;  %v6048_v3 = vmul.f32 0.6931472, %v3451_v61  ;;  %v3455_v21 = vpop.eup %3454  ;;  %v6067_v29 = vmul.f32 %v9011_v15, %v1268_v7 }
 0x1a8   : > { %9042 = vst [vmem:[#allocation203_spill] sm:$0xff] %v6034_v41  ;;  %v9044_v56 = vsel %vm6036_vm5, 4294967295, %v9043_v56  ;;  %vm6050_vm6 = vcmp.lt.f32.partialorder %v1270_v58, 0.0004427343  ;;  %v9048_v49 = vmov 0  ;;  %v1277_v34 = vadd.f32 1.0, %v1276_v20  ;;  %v3457_v6 = vpop.eup %3456 }
 0x1a9   : > { %9045 = vst [vmem:[#allocation247_spill] sm:$0xff] %v9044_v56  ;;  %v9049_v49 = vsel %vm6050_vm6, 4294967295, %v9048_v49  ;;  %v9052_v38 = vld [vmem:[#allocation173_spill] sm:$0xff]  ;;  %v6064_v58 = vmul.f32 0.6931472, %v3453_v36  ;;  %9055 = vst [vmem:[#allocation249_spill] sm:$0xff] %v6067_v29  ;;  %v3459_v2 = vpop.eup %3458 }
 0x1aa   : > { %9050 = vst [vmem:[#allocation248_spill] sm:$0xff] %v9049_v49  ;;  %v1282_v23 = vadd.f32 1.0, %v9052_v38  ;;  %v1285_v27 = vmul.f32 -0.5, %v9052_v38  ;;  %v1279_v9 = vand.u32 2147483647, %v9034_v12  ;;  %v9056_v20 = vld [vmem:[#allocation215_spill] sm:$0xff]  ;;  %v3461_v37 = vpop.eup %3460 }
 0x1ab   : > { %9054 = vst [vmem:[#allocation173_spill] sm:$0xff] %v6064_v58  ;;  %v6074_v45 = vmul.f32 0.6931472, %v3455_v21  ;;  %v6076_v47 = vmul.f32 0.6931472, %v3457_v6  ;;  %v9059_v36 = vld [vmem:[#allocation216_spill] sm:$0xff]  ;;  %v3463_v10 = vpop.eup %3462  ;;  %v6088_v21 = vmul.f32 %v9034_v12, %v1277_v34 }
 0x1ac   : > { %3468 = vlog2.f32 %v1282_v23  ;;  %v6082_v7 = vmul.f32 0.6931472, %v3459_v2  ;;  %v1286_v61 = vadd.f32 1.0, %v1285_v27  ;;  %v9061_v5 = vld [vmem:[#allocation174_spill] sm:$0xff]  ;;  %v6085_v30 = vmul.f32 0.6931472, %v3461_v37  ;;  %v3465_v8 = vpop.eup %3464 }
 0x1ad   : > { %9057 = vst [vmem:[#allocation215_spill] sm:$0xff] %v6074_v45  ;;  %9058 = vst [vmem:[#allocation250_spill] sm:$0xff] %v6076_v47  ;;  %v1291_v33 = vadd.f32 1.0, %v9061_v5  ;;  %v1288_v6 = vand.u32 2147483647, %v9052_v38  ;;  %v1294_v23 = vmul.f32 -0.5, %v9061_v5 }
 0x1ae   : > { %9060 = vst [vmem:[#allocation216_spill] sm:$0xff] %v6082_v7  ;;  %9062 = vst [vmem:[#allocation174_spill] sm:$0xff] %v6085_v30  ;;  %v9064_v41 = vld [vmem:[#allocation219_spill] sm:$0xff]  ;;  %v6096_v15 = vmul.f32 0.6931472, %v3463_v10  ;;  %v9066_v27 = vmov 0 }
 0x1af   : > { %9063 = vst [vmem:[#allocation251_spill] sm:$0xff] %v6088_v21  ;;  %vm6098_vm12 = vcmp.lt.f32.partialorder %v1279_v9, 0.0004427343  ;;  %3470 = vlog2.f32 %v1291_v33  ;;  %v6110_v12 = vmul.f32 0.6931472, %v3465_v8  ;;  %v1295_v2 = vadd.f32 1.0, %v1294_v23 }
 0x1b0   : > { %9065 = vst [vmem:[#allocation219_spill] sm:$0xff] %v6096_v15  ;;  %v9067_v27 = vsel %vm6098_vm12, 4294967295, %v9066_v27  ;;  %v6117_v33 = vmul.f32 %v9052_v38, %v1286_v61  ;;  %v9071_v9 = vld [vmem:[#allocation175_spill] sm:$0xff]  ;;  %vm6125_vm11 = vcmp.lt.f32.partialorder %v1288_v6, 0.0004427343  ;;  %v9072_v23 = vmov 0 }
 0x1b1   : > { %9068 = vst [vmem:[#allocation252_spill] sm:$0xff] %v9067_v27  ;;  %9069 = vst [vmem:[#allocation253_spill] sm:$0xff] %v6110_v12  ;;  %v1300_v58 = vadd.f32 1.0, %v9071_v9  ;;  %v1303_v37 = vmul.f32 -0.5, %v9071_v9  ;;  %v3467_v45 = vpop.eup %3466  ;;  %v9073_v23 = vsel %vm6125_vm11, 4294967295, %v9072_v23  ;;  %v9075_v10 = vld [vmem:[#allocation176_spill] sm:$0xff]  ;;  %v6141_v8 = vmul.f32 %v9061_v5, %v1295_v2 }
 0x1b2   : > { %9070 = vst [vmem:[#allocation254_spill] sm:$0xff] %v6117_v33  ;;  %9074 = vst [vmem:[#allocation175_spill] sm:$0xff] %v9073_v23  ;;  %v1297_v34 = vand.u32 2147483647, %v9061_v5  ;;  %v1309_v7 = vadd.f32 1.0, %v9075_v10  ;;  %v1312_v30 = vmul.f32 -0.5, %v9075_v10 }
 0x1b3   : > { %3472 = vlog2.f32 %v1300_v58  ;;  %v1306_v6 = vand.u32 2147483647, %v9071_v9  ;;  %9076 = vst [vmem:[#allocation176_spill] sm:$0xff] %v6141_v8  ;;  %v9077_v60 = vld [vmem:[#allocation177_spill] sm:$0xff]  ;;  %v6145_v22 = vmul.f32 0.6931472, %v3467_v45 }
 0x1b4   : > { %3474 = vlog2.f32 %v1309_v7  ;;  %v1318_v18 = vadd.f32 1.0, %v9077_v60  ;;  %v1304_v56 = vadd.f32 1.0, %v1303_v37  ;;  %v1315_v38 = vand.u32 2147483647, %v9075_v10  ;;  %v9079_v12 = vld [vmem:[#allocation179_spill] sm:$0xff]  ;;  %v9381_v42 = vld [vmem:[#allocation173_spill] sm:$0xff] }
 0x1b5   : > { %9078 = vst [vmem:[#allocation177_spill] sm:$0xff] %v6145_v22  ;;  %v1321_v15 = vmul.f32 -0.5, %v9077_v60  ;;  %v1313_v61 = vadd.f32 1.0, %v1312_v30  ;;  %v1324_v58 = vand.u32 2147483647, %v9077_v60  ;;  %v1327_v5 = vadd.f32 1.0, %v9079_v12 }
 0x1b6   : > { %v3469_v49 = vpop.eup %3468  ;;  %3476 = vlog2.f32 %v1318_v18  ;;  %vm6153_vm6 = vcmp.lt.f32.partialorder %v1297_v34, 0.0004427343  ;;  %v9081_v7 = vmov 0  ;;  %v1330_v37 = vmul.f32 -0.5, %v9079_v12  ;;  %v9087_v18 = vld [vmem:[#allocation181_spill] sm:$0xff]  ;;  %v9397_v4 = vld [vmem:[#allocation250_spill] sm:$0xff] }
 0x1b7   : > { %v6151_v2 = vmul.f32 0.6931472, %v3469_v49  ;;  %v9082_v7 = vsel %vm6153_vm6, 4294967295, %v9081_v7  ;;  %v1322_v45 = vadd.f32 1.0, %v1321_v15  ;;  %vm6158_vm5 = vcmp.lt.f32.partialorder %v1306_v6, 0.0004427343 }
 0x1b8   : > { %9083 = vst [vmem:[#allocation255_spill] sm:$0xff] %v9082_v7  ;;  %v9084_v29 = vmov 0  ;;  %3478 = vlog2.f32 %v1327_v5  ;;  %v1333_v30 = vand.u32 2147483647, %v9079_v12  ;;  %v1336_v40 = vadd.f32 1.0, %v9087_v18  ;;  %v9098_v49 = vld [vmem:[#allocation182_spill] sm:$0xff] }
 0x1b9   : > { %9080 = vst [vmem:[#allocation179_spill] sm:$0xff] %v6151_v2  ;;  %v9085_v29 = vsel %vm6158_vm5, 4294967295, %v9084_v29  ;;  %v3471_v32 = vpop.eup %3470  ;;  %v6169_v34 = vmul.f32 %v9071_v9, %v1304_v56  ;;  %vm6171_vm15 = vcmp.lt.f32.partialorder %v1315_v38, 0.0004427343  ;;  %v9089_v15 = vmov 0 }
 0x1ba   : > { %9086 = vst [vmem:[#allocation256_spill] sm:$0xff] %v9085_v29  ;;  %v9090_v15 = vsel %vm6171_vm15, 4294967295, %v9089_v15  ;;  %v1339_v6 = vmul.f32 -0.5, %v9087_v18  ;;  %v6181_v47 = vmul.f32 %v9075_v10, %v1313_v61  ;;  %vm6183_vm9 = vcmp.lt.f32.partialorder %v1324_v58, 0.0004427343  ;;  %v9102_v58 = vld [vmem:[#allocation183_spill] sm:$0xff] }
 0x1bb   : > { %9088 = vst [vmem:[#allocation181_spill] sm:$0xff] %v6169_v34  ;;  %9091 = vst [vmem:[#allocation257_spill] sm:$0xff] %v9090_v15  ;;  %v9093_v27 = vmov 0  ;;  %v1331_v56 = vadd.f32 1.0, %v1330_v37  ;;  %3480 = vlog2.f32 %v1336_v40  ;;  %v6187_v9 = vmul.f32 0.6931472, %v3471_v32 }
 0x1bc   : > { %9092 = vst [vmem:[#allocation258_spill] sm:$0xff] %v6181_v47  ;;  %v9094_v27 = vsel %vm6183_vm9, 4294967295, %v9093_v27  ;;  %v6190_v38 = vmul.f32 %v9077_v60, %v1322_v45  ;;  %v1345_v22 = vadd.f32 1.0, %v9098_v49  ;;  %v1348_v21 = vmul.f32 -0.5, %v9098_v49 }
 0x1bd   : > { %9095 = vst [vmem:[#allocation259_spill] sm:$0xff] %v9094_v27  ;;  %9096 = vst [vmem:[#allocation260_spill] sm:$0xff] %v6187_v9  ;;  %vm6194_vm12 = vcmp.lt.f32.partialorder %v1333_v30, 0.0004427343  ;;  %v9099_v5 = vmov 0  ;;  %v1340_v10 = vadd.f32 1.0, %v1339_v6  ;;  %v3473_v37 = vpop.eup %3472  ;;  %v6205_v30 = vmul.f32 %v9079_v12, %v1331_v56 }
 0x1be   : > { %9097 = vst [vmem:[#allocation261_spill] sm:$0xff] %v6190_v38  ;;  %v9100_v5 = vsel %vm6194_vm12, 4294967295, %v9099_v5  ;;  %v1342_v61 = vand.u32 2147483647, %v9087_v18  ;;  %v1354_v2 = vadd.f32 1.0, %v9102_v58  ;;  %3482 = vlog2.f32 %v1345_v22  ;;  %v3475_v45 = vpop.eup %3474  ;;  %v9127_v38 = vld [vmem:[#allocation191_spill] sm:$0xff] }
 0x1bf   : > { %9101 = vst [vmem:[#allocation182_spill] sm:$0xff] %v9100_v5  ;;  %v1349_v32 = vadd.f32 1.0, %v1348_v21  ;;  %v1351_v40 = vand.u32 2147483647, %v9098_v49  ;;  %v1357_v60 = vmul.f32 -0.5, %v9102_v58  ;;  %9104 = vst [vmem:[#allocation262_spill] sm:$0xff] %v6205_v30 }
 0x1c0   : > { %v6202_v33 = vmul.f32 0.6931472, %v3473_v37  ;;  %3484 = vlog2.f32 %v1354_v2  ;;  %v1360_v6 = vand.u32 2147483647, %v9102_v58  ;;  %v6212_v22 = vmul.f32 0.6931472, %v3475_v45  ;;  %v3477_v43 = vpop.eup %3476 }
 0x1c1   : > { %v1358_v21 = vadd.f32 1.0, %v1357_v60  ;;  %v1363_v59 = vadd.f32 1.0, %v9106_v52  ;;  %v6216_v37 = vmul.f32 %v9087_v18, %v1340_v10  ;;  %vm6218_vm11 = vcmp.lt.f32.partialorder %v1342_v61, 0.0004427343  ;;  %v9120_v60 = vld [vmem:[#allocation188_spill] sm:$0xff] }
 0x1c2   : > { %9103 = vst [vmem:[#allocation183_spill] sm:$0xff] %v6202_v33  ;;  %9105 = vst [vmem:[#allocation263_spill] sm:$0xff] %v6212_v22  ;;  %v9108_v12 = vmov 0  ;;  %v6223_v2 = vmul.f32 %v9098_v49, %v1349_v32  ;;  %v1366_v56 = vmul.f32 -0.5, %v9106_v52  ;;  %v6230_v45 = vmul.f32 0.6931472, %v3477_v43  ;;  %v3479_v10 = vpop.eup %3478 }
 0x1c3   : > { %9107 = vst [vmem:[#allocation185_spill] sm:$0xff] %v6216_v37  ;;  %v9109_v12 = vsel %vm6218_vm11, 4294967295, %v9108_v12  ;;  %vm6232_vm6 = vcmp.lt.f32.partialorder %v1351_v40, 0.0004427343  ;;  %v9112_v23 = vmov 0  ;;  %3486 = vlog2.f32 %v1363_v59  ;;  %v9117_v32 = vld [vmem:[#allocation187_spill] sm:$0xff] }
 0x1c4   : > { %9110 = vst [vmem:[#allocation264_spill] sm:$0xff] %v9109_v12  ;;  %9111 = vst [vmem:[#allocation265_spill] sm:$0xff] %v6230_v45  ;;  %v9113_v23 = vsel %vm6232_vm6, 4294967295, %v9112_v23  ;;  %v1369_v18 = vand.u32 2147483647, %v9106_v52  ;;  %v9114_v49 = vmov 0  ;;  %v6250_v59 = vmul.f32 %v9102_v58, %v1358_v21 }
 0x1c5   : > { %vm6237_vm14 = vcmp.lt.f32.partialorder %v1360_v6, 0.0004427343  ;;  %v1367_v61 = vadd.f32 1.0, %v1366_v56  ;;  %v1372_v9 = vadd.f32 1.0, %v9117_v32  ;;  %v1375_v29 = vmul.f32 -0.5, %v9117_v32  ;;  %v3481_v33 = vpop.eup %3480  ;;  %v9126_v21 = vld [vmem:[#allocation190_spill] sm:$0xff] }
 0x1c6   : > { %v9115_v49 = vsel %vm6237_vm14, 4294967295, %v9114_v49  ;;  %v6247_v40 = vmul.f32 0.6931472, %v3479_v10  ;;  %9119 = vst [vmem:[#allocation267_spill] sm:$0xff] %v6250_v59  ;;  %v1381_v6 = vadd.f32 1.0, %v9120_v60  ;;  %v1384_v8 = vmul.f32 -0.5, %v9120_v60 }
 0x1c7   : > { %9116 = vst [vmem:[#allocation266_spill] sm:$0xff] %v9115_v49  ;;  %3488 = vlog2.f32 %v1372_v9  ;;  %v1376_v34 = vadd.f32 1.0, %v1375_v29  ;;  %v1378_v56 = vand.u32 2147483647, %v9117_v32  ;;  %v6259_v43 = vmul.f32 0.6931472, %v3481_v33 }
 0x1c8   : > { %9118 = vst [vmem:[#allocation187_spill] sm:$0xff] %v6247_v40  ;;  %vm6261_vm15 = vcmp.lt.f32.partialorder %v1369_v18, 0.0004427343  ;;  %v9122_v10 = vmov 0  ;;  %3490 = vlog2.f32 %v1381_v6  ;;  %v6270_v9 = vmul.f32 %v9106_v52, %v1367_v61  ;;  %v3483_v15 = vpop.eup %3482 }
 0x1c9   : > { %9121 = vst [vmem:[#allocation188_spill] sm:$0xff] %v6259_v43  ;;  %v9123_v10 = vsel %vm6261_vm15, 4294967295, %v9122_v10  ;;  %v1387_v58 = vand.u32 2147483647, %v9120_v60  ;;  %v1390_v27 = vadd.f32 1.0, %v9126_v21  ;;  %v1385_v33 = vadd.f32 1.0, %v1384_v8 }
 0x1ca   : > { %9124 = vst [vmem:[#allocation268_spill] sm:$0xff] %v9123_v10  ;;  %9125 = vst [vmem:[#allocation269_spill] sm:$0xff] %v6270_v9  ;;  %v1393_v18 = vmul.f32 -0.5, %v9126_v21  ;;  %v1396_v45 = vand.u32 2147483647, %v9126_v21  ;;  %v1399_v6 = vadd.f32 1.0, %v9127_v38  ;;  %v3485_v22 = vpop.eup %3484  ;;  %v6280_v29 = vmul.f32 %v9117_v32, %v1376_v34 }
 0x1cb   : > { %v6277_v47 = vmul.f32 0.6931472, %v3483_v15  ;;  %vm6282_vm12 = vcmp.lt.f32.partialorder %v1378_v56, 0.0004427343  ;;  %v9130_v52 = vmov 0  ;;  %3492 = vlog2.f32 %v1390_v27  ;;  %v9136_v56 = vld [vmem:[#allocation193_spill] sm:$0xff] }
 0x1cc   : > { %9129 = vst [vmem:[#allocation191_spill] sm:$0xff] %v6280_v29  ;;  %v9131_v52 = vsel %vm6282_vm12, 4294967295, %v9130_v52  ;;  %v6290_v61 = vmul.f32 0.6931472, %v3485_v22  ;;  %vm6292_vm9 = vcmp.lt.f32.partialorder %v1387_v58, 0.0004427343  ;;  %3494 = vlog2.f32 %v1399_v6 }
 0x1cd   : > { %9128 = vst [vmem:[#allocation190_spill] sm:$0xff] %v6277_v47  ;;  %v9133_v40 = vmov 0  ;;  %v1394_v15 = vadd.f32 1.0, %v1393_v18  ;;  %v1402_v34 = vmul.f32 -0.5, %v9127_v38  ;;  %v1405_v32 = vand.u32 2147483647, %v9127_v38  ;;  %v3487_v27 = vpop.eup %3486 }
 0x1ce   : > { %9132 = vst [vmem:[#allocation270_spill] sm:$0xff] %v6290_v61  ;;  %v9134_v40 = vsel %vm6292_vm9, 4294967295, %v9133_v40  ;;  %v1408_v30 = vadd.f32 1.0, %v9136_v56  ;;  %v6300_v5 = vmul.f32 %v9120_v60, %v1385_v33  ;;  %vm6302_vm5 = vcmp.lt.f32.partialorder %v1396_v45, 0.0004427343  ;;  %v9142_v43 = vld [vmem:[#allocation195_spill] sm:$0xff] }
 0x1cf   : > { %9135 = vst [vmem:[#allocation271_spill] sm:$0xff] %v9134_v40  ;;  %v9138_v8 = vmov 0  ;;  %v1411_v22 = vmul.f32 -0.5, %v9136_v56  ;;  %v1414_v58 = vand.u32 2147483647, %v9136_v56  ;;  %v1403_v45 = vadd.f32 1.0, %v1402_v34 }
 0x1d0   : > { %9137 = vst [vmem:[#allocation193_spill] sm:$0xff] %v6300_v5  ;;  %v9139_v8 = vsel %vm6302_vm5, 4294967295, %v9138_v8  ;;  %v6316_v60 = vmul.f32 0.6931472, %v3487_v27  ;;  %3496 = vlog2.f32 %v1408_v30  ;;  %v1417_v37 = vadd.f32 1.0, %v9142_v43  ;;  %v9147_v6 = vld [vmem:[#allocation197_spill] sm:$0xff] }
 0x1d1   : > { %9140 = vst [vmem:[#allocation272_spill] sm:$0xff] %v9139_v8  ;;  %v1412_v33 = vadd.f32 1.0, %v1411_v22  ;;  %v1420_v12 = vmul.f32 -0.5, %v9142_v43  ;;  %v3489_v7 = vpop.eup %3488  ;;  %v6321_v13 = vmul.f32 %v9126_v21, %v1394_v15  ;;  %vm6323_vm11 = vcmp.lt.f32.partialorder %v1405_v32, 0.0004427343  ;;  %v9161_v9 = vld [vmem:[#allocation199_spill] sm:$0xff] }
 0x1d2   : > { %9141 = vst [vmem:[#allocation273_spill] sm:$0xff] %v6316_v60  ;;  %v9144_v18 = vmov 0  ;;  %v1423_v49 = vand.u32 2147483647, %v9142_v43  ;;  %v1426_v27 = vadd.f32 1.0, %v9147_v6  ;;  %v3491_v61 = vpop.eup %3490  ;;  %v9149_v34 = vmov 0 }
 0x1d3   : > { %9143 = vst [vmem:[#allocation195_spill] sm:$0xff] %v6321_v13  ;;  %v9145_v18 = vsel %vm6323_vm11, 4294967295, %v9144_v18  ;;  %v6329_v30 = vmul.f32 0.6931472, %v3489_v7  ;;  %vm6331_vm14 = vcmp.lt.f32.partialorder %v1414_v58, 0.0004427343  ;;  %3498 = vlog2.f32 %v1417_v37 }
 0x1d4   : > { %9146 = vst [vmem:[#allocation274_spill] sm:$0xff] %v9145_v18  ;;  %v9150_v34 = vsel %vm6331_vm14, 4294967295, %v9149_v34  ;;  %v1421_v22 = vadd.f32 1.0, %v1420_v12  ;;  %v6339_v15 = vmul.f32 0.6931472, %v3491_v61  ;;  %3500 = vlog2.f32 %v1426_v27  ;;  %v9155_v37 = vld [vmem:[#allocation198_spill] sm:$0xff] }
 0x1d5   : > { %9148 = vst [vmem:[#allocation197_spill] sm:$0xff] %v6329_v30  ;;  %9151 = vst [vmem:[#allocation275_spill] sm:$0xff] %v9150_v34  ;;  %v1429_v32 = vmul.f32 -0.5, %v9147_v6  ;;  %v6343_v59 = vmul.f32 %v9127_v38, %v1403_v45  ;;  %v6346_v7 = vmul.f32 %v9136_v56, %v1412_v33  ;;  %v1432_v58 = vand.u32 2147483647, %v9147_v6  ;;  %v3493_v47 = vpop.eup %3492  ;;  %v9172_v5 = vld [vmem:[#allocation202_spill] sm:$0xff] }
 0x1d6   : > { %9152 = vst [vmem:[#allocation276_spill] sm:$0xff] %v6339_v15  ;;  %v1435_v12 = vadd.f32 1.0, %v9155_v37  ;;  %vm6354_vm15 = vcmp.lt.f32.partialorder %v1423_v49, 0.0004427343  ;;  %v9156_v27 = vmov 0  ;;  %v1438_v38 = vmul.f32 -0.5, %v9155_v37  ;;  %v3495_v45 = vpop.eup %3494 }
 0x1d7   : > { %9153 = vst [vmem:[#allocation277_spill] sm:$0xff] %v6343_v59  ;;  %9154 = vst [vmem:[#allocation278_spill] sm:$0xff] %v6346_v7  ;;  %v9157_v27 = vsel %vm6354_vm15, 4294967295, %v9156_v27  ;;  %v1430_v21 = vadd.f32 1.0, %v1429_v32  ;;  %v1441_v56 = vand.u32 2147483647, %v9155_v37  ;;  %v6363_v60 = vmul.f32 %v9142_v43, %v1421_v22 }
 0x1d8   : > { %9158 = vst [vmem:[#allocation198_spill] sm:$0xff] %v9157_v27  ;;  %v6360_v33 = vmul.f32 0.6931472, %v3493_v47  ;;  %3502 = vlog2.f32 %v1435_v12  ;;  %v1444_v10 = vadd.f32 1.0, %v9161_v9  ;;  %v6370_v61 = vmul.f32 0.6931472, %v3495_v45 }
 0x1d9   : > { %9160 = vst [vmem:[#allocation280_spill] sm:$0xff] %v6363_v60  ;;  %v6373_v32 = vmul.f32 %v9147_v6, %v1430_v21  ;;  %vm6375_vm12 = vcmp.lt.f32.partialorder %v1432_v58, 0.0004427343  ;;  %v9164_v30 = vmov 0  ;;  %v1439_v47 = vadd.f32 1.0, %v1438_v38  ;;  %v9170_v6 = vld [vmem:[#allocation200_spill] sm:$0xff] }
 0x1da   : > { %9159 = vst [vmem:[#allocation279_spill] sm:$0xff] %v6360_v33  ;;  %9162 = vst [vmem:[#allocation199_spill] sm:$0xff] %v6370_v61  ;;  %v9165_v30 = vsel %vm6375_vm12, 4294967295, %v9164_v30  ;;  %3504 = vlog2.f32 %v1444_v10  ;;  %v1447_v43 = vmul.f32 -0.5, %v9161_v9  ;;  %v1450_v22 = vand.u32 2147483647, %v9161_v9  ;;  %v3497_v12 = vpop.eup %3496 }
 0x1db   : > { %9163 = vst [vmem:[#allocation281_spill] sm:$0xff] %v6373_v32  ;;  %9166 = vst [vmem:[#allocation282_spill] sm:$0xff] %v9165_v30  ;;  %vm6385_vm9 = vcmp.lt.f32.partialorder %v1441_v56, 0.0004427343  ;;  %v9167_v49 = vmov 0  ;;  %v1453_v21 = vadd.f32 1.0, %v9170_v6  ;;  %v6401_v8 = vmul.f32 %v9155_v37, %v1439_v47 }
 0x1dc   : > { %v9168_v49 = vsel %vm6385_vm9, 4294967295, %v9167_v49  ;;  %v1456_v58 = vmul.f32 -0.5, %v9170_v6  ;;  %v6395_v38 = vmul.f32 0.6931472, %v3497_v12  ;;  %v1448_v15 = vadd.f32 1.0, %v1447_v43  ;;  %v9197_v34 = vld [vmem:[#allocation161_spill] sm:$0xff] }
 0x1dd   : > { %9169 = vst [vmem:[#allocation283_spill] sm:$0xff] %v9168_v49  ;;  %v1462_v40 = vadd.f32 1.0, %v9172_v5  ;;  %3506 = vlog2.f32 %v1453_v21  ;;  %v1459_v56 = vand.u32 2147483647, %v9170_v6  ;;  %v1465_v33 = vmul.f32 -0.5, %v9172_v5  ;;  %v3499_v13 = vpop.eup %3498  ;;  %9173 = vst [vmem:[#allocation202_spill] sm:$0xff] %v6401_v8 }
 0x1de   : > { %9171 = vst [vmem:[#allocation200_spill] sm:$0xff] %v6395_v38  ;;  %v1457_v45 = vadd.f32 1.0, %v1456_v58  ;;  %vm6403_vm5 = vcmp.lt.f32.partialorder %v1450_v22, 0.0004427343  ;;  %v9174_v29 = vmov 0  ;;  %v3501_v43 = vpop.eup %3500  ;;  %v6415_v10 = vmul.f32 %v9161_v9, %v1448_v15  ;;  %v9188_v15 = vld [vmem:[#allocation160_spill] sm:$0xff] }
 0x1df   : > { %v9175_v29 = vsel %vm6403_vm5, 4294967295, %v9174_v29  ;;  %3508 = vlog2.f32 %v1462_v40  ;;  %v1468_v12 = vand.u32 2147483647, %v9172_v5  ;;  %v6412_v58 = vmul.f32 0.6931472, %v3499_v13  ;;  %v9183_v40 = vld [vmem:[#allocation158_spill] sm:$0xff] }
 0x1e0   : > { %9176 = vst [vmem:[#allocation284_spill] sm:$0xff] %v9175_v29  ;;  %9178 = vst [vmem:[#allocation286_spill] sm:$0xff] %v6415_v10  ;;  %v1466_v37 = vadd.f32 1.0, %v1465_v33  ;;  %v6417_v47 = vmul.f32 0.6931472, %v3501_v43  ;;  %v9180_v22 = vmov 0  ;;  %v6426_v18 = vmul.f32 %v9170_v6, %v1457_v45 }
 0x1e1   : > { %9177 = vst [vmem:[#allocation285_spill] sm:$0xff] %v6412_v58  ;;  %vm6419_vm11 = vcmp.lt.f32.partialorder %v1459_v56, 0.0004427343  ;;  %v1471_v61 = vadd.f32 1.0, %v9183_v40  ;;  %v1474_v59 = vmul.f32 -0.5, %v9183_v40  ;;  %v9185_v13 = vmov 0 }
 0x1e2   : > { %9179 = vst [vmem:[#allocation287_spill] sm:$0xff] %v6417_v47  ;;  %v9181_v22 = vsel %vm6419_vm11, 4294967295, %v9180_v22  ;;  %9184 = vst [vmem:[#allocation158_spill] sm:$0xff] %v6426_v18  ;;  %vm6428_vm14 = vcmp.lt.f32.partialorder %v1468_v12, 0.0004427343  ;;  %v1480_v33 = vadd.f32 1.0, %v9188_v15  ;;  %v3503_v43 = vpop.eup %3502  ;;  %v6442_v6 = vmul.f32 %v9172_v5, %v1466_v37 }
 0x1e3   : > { %9182 = vst [vmem:[#allocation288_spill] sm:$0xff] %v9181_v22  ;;  %v9186_v13 = vsel %vm6428_vm14, 4294967295, %v9185_v13  ;;  %v1477_v9 = vand.u32 2147483647, %v9183_v40  ;;  %3510 = vlog2.f32 %v1471_v61  ;;  %v1475_v21 = vadd.f32 1.0, %v1474_v59  ;;  %v9191_v56 = vld [vmem:[#allocation204_spill] sm:$0xff] }
 0x1e4   : > { %9187 = vst [vmem:[#allocation289_spill] sm:$0xff] %v9186_v13  ;;  %v1483_v38 = vmul.f32 -0.5, %v9188_v15  ;;  %v6439_v45 = vmul.f32 0.6931472, %v3503_v43  ;;  %9190 = vst [vmem:[#allocation290_spill] sm:$0xff] %v6442_v6  ;;  %3512 = vlog2.f32 %v1480_v33  ;;  %v3505_v7 = vpop.eup %3504  ;;  %v1489_v61 = vadd.f32 1.0, %v9191_v56 }
 0x1e5   : > { %v1486_v12 = vand.u32 2147483647, %v9188_v15  ;;  %v1492_v59 = vmul.f32 -0.5, %v9191_v56  ;;  %v6451_v58 = vmul.f32 0.6931472, %v3505_v7  ;;  %v6454_v43 = vmul.f32 %v9183_v40, %v1475_v21  ;;  %v9416_v13 = vld [vmem:[#allocation124_spill] sm:$0xff] }
 0x1e6   : > { %9189 = vst [vmem:[#allocation160_spill] sm:$0xff] %v6439_v45  ;;  %v1484_v27 = vadd.f32 1.0, %v1483_v38  ;;  %vm6456_vm15 = vcmp.lt.f32.partialorder %v1477_v9, 0.0004427343  ;;  %v9194_v5 = vmov 0  ;;  %3514 = vlog2.f32 %v1489_v61  ;;  %v9203_v38 = vld [vmem:[#allocation207_spill] sm:$0xff] }
 0x1e7   : > { %9192 = vst [vmem:[#allocation204_spill] sm:$0xff] %v6451_v58  ;;  %9193 = vst [vmem:[#allocation291_spill] sm:$0xff] %v6454_v43  ;;  %v9195_v5 = vsel %vm6456_vm15, 4294967295, %v9194_v5  ;;  %v1495_v37 = vand.u32 2147483647, %v9191_v56  ;;  %v1493_v33 = vadd.f32 1.0, %v1492_v59  ;;  %v3507_v7 = vpop.eup %3506 }
 0x1e8   : > { %9196 = vst [vmem:[#allocation292_spill] sm:$0xff] %v9195_v5  ;;  %v1498_v47 = vadd.f32 1.0, %v9197_v34  ;;  %v6467_v32 = vmul.f32 %v9188_v15, %v1484_v27  ;;  %vm6469_vm12 = vcmp.lt.f32.partialorder %v1486_v12, 0.0004427343  ;;  %v9199_v21 = vmov 0  ;;  %v9214_v58 = vld [vmem:[#allocation163_spill] sm:$0xff] }
 0x1e9   : > { %v9200_v21 = vsel %vm6469_vm12, 4294967295, %v9199_v21  ;;  %v1501_v40 = vmul.f32 -0.5, %v9197_v34  ;;  %v1504_v9 = vand.u32 2147483647, %v9197_v34  ;;  %v3509_v30 = vpop.eup %3508  ;;  %v6479_v59 = vmul.f32 0.6931472, %v3507_v7 }
 0x1ea   : > { %9198 = vst [vmem:[#allocation161_spill] sm:$0xff] %v6467_v32  ;;  %9201 = vst [vmem:[#allocation293_spill] sm:$0xff] %v9200_v21  ;;  %3516 = vlog2.f32 %v1498_v47  ;;  %v1507_v27 = vadd.f32 1.0, %v9203_v38  ;;  %v6482_v15 = vmul.f32 0.6931472, %v3509_v30  ;;  %v6485_v12 = vmul.f32 %v9191_v56, %v1493_v33  ;;  %v9212_v7 = vld [vmem:[#allocation162_spill] sm:$0xff] }
 0x1eb   : > { %9202 = vst [vmem:[#allocation294_spill] sm:$0xff] %v6479_v59  ;;  %vm6487_vm9 = vcmp.lt.f32.partialorder %v1495_v37, 0.0004427343  ;;  %v9206_v45 = vmov 0  ;;  %v1502_v8 = vadd.f32 1.0, %v1501_v40  ;;  %v1510_v49 = vmul.f32 -0.5, %v9203_v38 }
 0x1ec   : > { %9204 = vst [vmem:[#allocation207_spill] sm:$0xff] %v6482_v15  ;;  %9205 = vst [vmem:[#allocation295_spill] sm:$0xff] %v6485_v12  ;;  %v9207_v45 = vsel %vm6487_vm9, 4294967295, %v9206_v45  ;;  %vm6492_vm6 = vcmp.lt.f32.partialorder %v1504_v9, 0.0004427343  ;;  %v9209_v29 = vmov 0  ;;  %3518 = vlog2.f32 %v1507_v27 }
 0x1ed   : > { %9208 = vst [vmem:[#allocation296_spill] sm:$0xff] %v9207_v45  ;;  %v9210_v29 = vsel %vm6492_vm6, 4294967295, %v9209_v29  ;;  %v1513_v47 = vand.u32 2147483647, %v9203_v38  ;;  %v1516_v30 = vadd.f32 1.0, %v9212_v7  ;;  %v1511_v33 = vadd.f32 1.0, %v1510_v49  ;;  %v3511_v9 = vpop.eup %3510 }
 0x1ee   : > { %9211 = vst [vmem:[#allocation297_spill] sm:$0xff] %v9210_v29  ;;  %v1519_v40 = vmul.f32 -0.5, %v9212_v7  ;;  %v6508_v27 = vmul.f32 %v9197_v34, %v1502_v8  ;;  %v1522_v61 = vand.u32 2147483647, %v9212_v7  ;;  %v1525_v10 = vadd.f32 1.0, %v9214_v58  ;;  %v3513_v60 = vpop.eup %3512  ;;  %v9235_v29 = vld [vmem:[#allocation165_spill] sm:$0xff] }
 0x1ef   : > { %3520 = vlog2.f32 %v1516_v30  ;;  %v6512_v22 = vmul.f32 0.6931472, %v3511_v9  ;;  %vm6514_vm11 = vcmp.lt.f32.partialorder %v1513_v47, 0.0004427343  ;;  %v9216_v56 = vmov 0  ;;  %v9221_v9 = vld [vmem:[#allocation164_spill] sm:$0xff] }
 0x1f0   : > { %9213 = vst [vmem:[#allocation162_spill] sm:$0xff] %v6508_v27  ;;  %v9217_v56 = vsel %vm6514_vm11, 4294967295, %v9216_v56  ;;  %v1520_v37 = vadd.f32 1.0, %v1519_v40  ;;  %v1528_v49 = vmul.f32 -0.5, %v9214_v58  ;;  %v6519_v15 = vmul.f32 0.6931472, %v3513_v60  ;;  %v3515_v60 = vpop.eup %3514 }
 0x1f1   : > { %9215 = vst [vmem:[#allocation163_spill] sm:$0xff] %v6512_v22  ;;  %v6522_v8 = vmul.f32 %v9203_v38, %v1511_v33  ;;  %3522 = vlog2.f32 %v1525_v10  ;;  %v1531_v34 = vand.u32 2147483647, %v9214_v58  ;;  %vm6529_vm14 = vcmp.lt.f32.partialorder %v1522_v61, 0.0004427343  ;;  %v9309_v22 = vld [vmem:[#allocation108_spill] sm:$0xff] }
 0x1f2   : > { %9218 = vst [vmem:[#allocation298_spill] sm:$0xff] %v6519_v15  ;;  %v1529_v40 = vadd.f32 1.0, %v1528_v49  ;;  %v1534_v6 = vadd.f32 1.0, %v9221_v9  ;;  %v6539_v38 = vmul.f32 %v9212_v7, %v1520_v37  ;;  %v1537_v33 = vmul.f32 -0.5, %v9221_v9  ;;  %v9225_v49 = vld [vmem:[#allocation211_spill] sm:$0xff] }
 0x1f3   : > { %v1540_v30 = vand.u32 2147483647, %v9221_v9  ;;  %v6543_v61 = vmul.f32 0.6931472, %v3515_v60  ;;  %vm6545_vm15 = vcmp.lt.f32.partialorder %v1531_v34, 0.0004427343  ;;  %vm9256_vm11 = vnez %v8904_v44 }
 0x1f4   : > { %3524 = vlog2.f32 %v1534_v6  ;;  %v1543_v43 = vadd.f32 1.0, %v9225_v49  ;;  %v3517_v5 = vpop.eup %3516  ;;  %v6551_v21 = vmul.f32 %v9214_v58, %v1529_v40  ;;  %v1538_v10 = vadd.f32 1.0, %v1537_v33  ;;  %v9229_v34 = vld [vmem:[#allocation213_spill] sm:$0xff] }
 0x1f5   : > { %9222 = vst [vmem:[#allocation164_spill] sm:$0xff] %v6543_v61  ;;  %v1546_v7 = vmul.f32 -0.5, %v9225_v49  ;;  %v1549_v37 = vand.u32 2147483647, %v9225_v49  ;;  %v6555_v15 = vmul.f32 0.6931472, %v3517_v5 }
 0x1f6   : > { %vm6557_vm12 = vcmp.lt.f32.partialorder %v1540_v30, 0.0004427343  ;;  %3526 = vlog2.f32 %v1543_v43  ;;  %v1552_v6 = vadd.f32 1.0, %v9229_v34  ;;  %v3519_v32 = vpop.eup %3518  ;;  %v6567_v40 = vmul.f32 %v9221_v9, %v1538_v10  ;;  %v9236_v30 = vld [vmem:[#allocation217_spill] sm:$0xff] }
 0x1f7   : > { %9226 = vst [vmem:[#allocation211_spill] sm:$0xff] %v6555_v15  ;;  %v1547_v33 = vadd.f32 1.0, %v1546_v7  ;;  %v1555_v5 = vmul.f32 -0.5, %v9229_v34  ;;  %v6574_v43 = vmul.f32 0.6931472, %v3519_v32  ;;  %v9232_v7 = vld [vmem:[#allocation94_spill] sm:$0xff]  ;;  %v9237_v32 = vsel %vm5638_vm0, %v9235_v29, %v9236_v30 }
 0x1f8   : > { %vm6576_vm5 = vcmp.lt.f32.partialorder %v1549_v37, 0.0004427343  ;;  %3528 = vlog2.f32 %v1552_v6  ;;  %v1558_v58 = vand.u32 2147483647, %v9229_v34  ;;  %v9233_v12 = vmax.f32 %v9232_v7, 0.0  ;;  %v9238_v37 = vld [vmem:[#allocation95_spill] sm:$0xff] }
 0x1f9   : > { %v3521_v61 = vpop.eup %3520  ;;  %v6582_v9 = vmul.f32 %v9225_v49, %v1547_v33  ;;  %v1556_v10 = vadd.f32 1.0, %v1555_v5  ;;  %v9239_v27 = vmax.f32 %v9238_v37, 0.0  ;;  %v9240_v6 = vld [vmem:[#allocation220_spill] sm:$0xff]  ;;  %vm9246_vm0 = vnez %v8896_v0  ;;  %v9249_v30 = vld [vmem:[#allocation97_spill] sm:$0xff]  ;;  %v9254_v37 = vld [vmem:[#allocation98_spill] sm:$0xff] }
 0x1fa   : > { %v6591_v15 = vadd.f32 %v9237_v32, %v9233_v12  ;;  %v9241_v59 = vsel %vm5649_vm1, %v8948_v50, %v9240_v6  ;;  %v6606_v45 = vmul.f32 0.6931472, %v3521_v61  ;;  %vm6608_vm6 = vcmp.lt.f32.partialorder %v1558_v58, 0.0004427343  ;;  %v9244_v12 = vld [vmem:[#allocation96_spill] sm:$0xff]  ;;  %v9252_v58 = vld [vmem:[#allocation223_spill] sm:$0xff] }
 0x1fb   : > { %v6600_v18 = vadd.f32 %v9241_v59, %v9239_v27  ;;  %v9245_v33 = vmax.f32 %v9244_v12, 0.0  ;;  %v9248_v50 = vsel %vm9246_vm0, %v8954_v24, %v9247_v54  ;;  %v3523_v27 = vpop.eup %3522  ;;  %v6622_v5 = vmul.f32 %v9229_v34, %v1556_v10  ;;  %v9258_v34 = vld [vmem:[#allocation99_spill] sm:$0xff]  ;;  %v9260_v12 = vld [vmem:[#allocation214_spill] sm:$0xff] }
 0x1fc   : > { %v9250_v61 = vmax.f32 %v9249_v30, 0.0  ;;  %vm9251_vm1 = vnez %v8899_v17  ;;  %v9255_v0 = vmax.f32 %v9254_v37, 0.0  ;;  %v9257_v24 = vsel %vm9256_vm11, %v5419_v39, %v5768_v1  ;;  %v9262_v17 = vld [vmem:[#allocation226_spill] sm:$0xff]  ;;  %v9273_v37 = vld [vmem:[#allocation167_spill] sm:$0xff] }
 0x1fd   : > { %v6619_v59 = vadd.f32 %v9248_v50, %v9245_v33  ;;  %v9253_v7 = vsel %vm9251_vm1, %v8955_v11, %v9252_v58  ;;  %v9259_v10 = vmax.f32 %v9258_v34, 0.0  ;;  %vm9261_vm0 = vnez %v9260_v12  ;;  %v9264_v50 = vld [vmem:[#allocation100_spill] sm:$0xff]  ;;  %v9270_v58 = vld [vmem:[#allocation218_spill] sm:$0xff] }
 0x1fe   : > { %v6631_v32 = vadd.f32 %v9253_v7, %v9250_v61  ;;  %v6640_v6 = vadd.f32 %v9257_v24, %v9255_v0  ;;  %v9263_v33 = vsel %vm9261_vm0, %v5433_v16, %v9262_v17  ;;  %v6655_v44 = vmul.f32 0.6931472, %v3523_v27  ;;  %v9268_v61 = vld [vmem:[#allocation101_spill] sm:$0xff]  ;;  %v9272_v7 = vld [vmem:[#allocation178_spill] sm:$0xff] }
 0x1ff   : > { %v6649_v54 = vadd.f32 %v9263_v33, %v9259_v10  ;;  %v9265_v39 = vmax.f32 %v9264_v50, 0.0  ;;  %vm9266_vm11 = vnez %v8912_v31  ;;  %v9269_v16 = vmax.f32 %v9268_v61, 0.0  ;;  %v9275_v27 = vld [vmem:[#allocation102_spill] sm:$0xff]  ;;  %v9278_v31 = vld [vmem:[#allocation171_spill] sm:$0xff]  ;;  %v9284_v50 = vld [vmem:[#allocation104_spill] sm:$0xff] }
 0x200   : > { %v9267_v1 = vsel %vm9266_vm11, %v5450_v26, %v5807_v25  ;;  %vm9271_vm1 = vnez %v9270_v58  ;;  %v9276_v34 = vmax.f32 %v9275_v27, 0.0  ;;  %vm9277_vm0 = vnez %v8923_v57  ;;  %v9280_v26 = vld [vmem:[#allocation103_spill] sm:$0xff]  ;;  %v9288_v57 = vld [vmem:[#allocation230_spill] sm:$0xff] }
 0x201   : > { %v6664_v30 = vadd.f32 %v9267_v1, %v9265_v39  ;;  %v9274_v0 = vsel %vm9271_vm1, %v9272_v7, %v9273_v37  ;;  %v9279_v10 = vsel %vm9277_vm0, %v8986_v48, %v9278_v31  ;;  %v9281_v25 = vmax.f32 %v9280_v26, 0.0  ;;  %v9286_v1 = vld [vmem:[#allocation224_spill] sm:$0xff]  ;;  %v9290_v48 = vld [vmem:[#allocation105_spill] sm:$0xff]  ;;  %v9464_v29 = vld [vmem:[#allocation130_spill] sm:$0xff] }
 0x202   : > { %v6673_v24 = vadd.f32 %v9274_v0, %v9269_v16  ;;  %v6682_v12 = vadd.f32 %v9279_v10, %v9276_v34  ;;  %vm9282_vm11 = vnez %v8926_v63  ;;  %v9285_v39 = vmax.f32 %v9284_v50, 0.0  ;;  %v9293_v63 = vld [vmem:[#allocation231_spill] sm:$0xff]  ;;  %v9295_v0 = vld [vmem:[#allocation106_spill] sm:$0xff]  ;;  %v9299_v34 = vld [vmem:[#allocation192_spill] sm:$0xff] }
 0x203   : > { %v9283_v17 = vsel %vm9282_vm11, %v8987_v55, %v5843_v35  ;;  %vm9287_vm1 = vnez %v9286_v1  ;;  %v9291_v58 = vmax.f32 %v9290_v48, 0.0  ;;  %vm9292_vm0 = vnez %v8936_v19  ;;  %v3525_v35 = vpop.eup %3524  ;;  %v9300_v31 = vld [vmem:[#allocation232_spill] sm:$0xff]  ;;  %v9302_v19 = vld [vmem:[#allocation107_spill] sm:$0xff]  ;;  %v9307_v50 = vld [vmem:[#allocation234_spill] sm:$0xff] }
 0x204   : > { %v6691_v33 = vadd.f32 %v9283_v17, %v9281_v25  ;;  %v9289_v61 = vsel %vm9287_vm1, %v8993_v62, %v9288_v57  ;;  %v9294_v7 = vsel %vm9292_vm0, %v8999_v51, %v9293_v63  ;;  %v1533_v55 = vsel %vm6545_vm15, %v6551_v21, %v6655_v44  ;;  %v9297_v62 = vld [vmem:[#allocation225_spill] sm:$0xff]  ;;  %v9304_v51 = vld [vmem:[#allocation227_spill] sm:$0xff]  ;;  %v9306_v17 = vld [vmem:[#allocation194_spill] sm:$0xff] }
 0x205   : > { %v6700_v16 = vadd.f32 %v9289_v61, %v9285_v39  ;;  %v6709_v37 = vadd.f32 %v9294_v7, %v9291_v58  ;;  %v9296_v27 = vmax.f32 %v9295_v0, 0.0  ;;  %vm9298_vm11 = vnez %v9297_v62  ;;  %v9311_v44 = vld [vmem:[#allocation166_spill] sm:$0xff]  ;;  %v9313_v57 = vld [vmem:[#allocation196_spill] sm:$0xff]  ;;  %v9314_v61 = vld [vmem:[#allocation169_spill] sm:$0xff] }
 0x206   : > { %v9301_v10 = vsel %vm9298_vm11, %v9299_v34, %v9300_v31  ;;  %v9303_v25 = vmax.f32 %v9302_v19, 0.0  ;;  %vm9305_vm1 = vnez %v9304_v51  ;;  %v9310_v21 = vmax.f32 %v9309_v22, 0.0  ;;  %v9316_v7 = vld [vmem:[#allocation109_spill] sm:$0xff]  ;;  %v9320_v62 = vld [vmem:[#allocation159_spill] sm:$0xff]  ;;  %v9323_v19 = vld [vmem:[#allocation110_spill] sm:$0xff] }
 0x207   : > { %v6722_v26 = vadd.f32 %v9301_v10, %v9296_v27  ;;  %v9308_v39 = vsel %vm9305_vm1, %v9306_v17, %v9307_v50  ;;  %vm9312_vm15 = vnez %v9311_v44  ;;  %v1536_v63 = vmul.f32 0.6931472, %v3525_v35  ;;  %v9318_v27 = vld [vmem:[#allocation229_spill] sm:$0xff]  ;;  %v9330_v22 = vld [vmem:[#allocation111_spill] sm:$0xff] }
 0x208   : > { %v6731_v1 = vadd.f32 %v9308_v39, %v9303_v25  ;;  %v9315_v48 = vsel %vm9312_vm15, %v9313_v57, %v9314_v61  ;;  %v9317_v0 = vmax.f32 %v9316_v7, 0.0  ;;  %vm9319_vm0 = vnez %v9318_v27  ;;  %v9321_v34 = vld [vmem:[#allocation189_spill] sm:$0xff]  ;;  %v3527_v61 = vpop.eup %3526  ;;  %v9339_v27 = vld [vmem:[#allocation238_spill] sm:$0xff] }
 0x209   : > { %v6740_v58 = vadd.f32 %v9315_v48, %v9310_v21  ;;  %v9322_v31 = vsel %vm9319_vm0, %v9320_v62, %v9321_v34  ;;  %v9324_v25 = vmax.f32 %v9323_v19, 0.0  ;;  %vm9325_vm11 = vnez %v8966_v28  ;;  %v9326_v51 = vld [vmem:[#allocation201_spill] sm:$0xff]  ;;  %v9332_v21 = vld [vmem:[#allocation170_spill] sm:$0xff]  ;;  %v9334_v48 = vld [vmem:[#allocation112_spill] sm:$0xff]  ;;  %v3529_v60 = vpop.eup %3528 }
 0x20a   : > { %v6749_v10 = vadd.f32 %v9322_v31, %v9317_v0  ;;  %v9327_v17 = vld [vmem:[#allocation237_spill] sm:$0xff]  ;;  %v9331_v35 = vmax.f32 %v9330_v22, 0.0  ;;  %v9333_v44 = vsel %vm5871_vm4, %v9040_v14, %v9332_v21  ;;  %v9335_v7 = vmax.f32 %v9334_v48, 0.0  ;;  %v9351_v21 = vld [vmem:[#allocation208_spill] sm:$0xff] }
 0x20b   : > { %v9328_v50 = vsel %vm9325_vm11, %v9326_v51, %v9327_v17  ;;  %v9336_v0 = vld [vmem:[#allocation233_spill] sm:$0xff]  ;;  %v9346_v51 = vld [vmem:[#allocation239_spill] sm:$0xff] }
 0x20c   : > { %v6758_v39 = vadd.f32 %v9328_v50, %v9324_v25  ;;  %v6767_v57 = vadd.f32 %v9333_v44, %v9331_v35  ;;  %vm9337_vm1 = vnez %v9336_v0  ;;  %v9338_v28 = vld [vmem:[#allocation205_spill] sm:$0xff]  ;;  %v9347_v17 = vsel %vm5891_vm3, %v9345_v46, %v9346_v51  ;;  %v9348_v50 = vld [vmem:[#allocation114_spill] sm:$0xff]  ;;  %v9352_v44 = vld [vmem:[#allocation240_spill] sm:$0xff] }
 0x20d   : > { %v9340_v62 = vsel %vm9337_vm1, %v9338_v28, %v9339_v27  ;;  %v9342_v31 = vld [vmem:[#allocation113_spill] sm:$0xff]  ;;  %v9349_v22 = vmax.f32 %v9348_v50, 0.0  ;;  %v9353_v48 = vsel %vm5897_vm2, %v9351_v21, %v9352_v44  ;;  %v1545_v46 = vmul.f32 0.6931472, %v3527_v61  ;;  %v9362_v51 = vld [vmem:[#allocation116_spill] sm:$0xff] }
 0x20e   : > { %9329 = vst [vmem:[#allocation213_spill] sm:$0xff] %v6758_v39  ;;  %v6776_v34 = vadd.f32 %v9340_v62, %v9335_v7  ;;  %v9343_v19 = vmax.f32 %v9342_v31, 0.0  ;;  %v9355_v7 = vld [vmem:[#allocation115_spill] sm:$0xff]  ;;  %v9358_v62 = vld [vmem:[#allocation210_spill] sm:$0xff]  ;;  %v9366_v35 = vld [vmem:[#allocation172_spill] sm:$0xff]  ;;  %vm9376_vm2 = vnez %v9008_v53 }
 0x20f   : > { %v6794_v0 = vadd.f32 %v9353_v48, %v9349_v22  ;;  %v9356_v28 = vmax.f32 %v9355_v7, 0.0  ;;  %v9359_v31 = vld [vmem:[#allocation243_spill] sm:$0xff]  ;;  %v9365_v22 = vld [vmem:[#allocation212_spill] sm:$0xff]  ;;  %v9369_v48 = vld [vmem:[#allocation117_spill] sm:$0xff]  ;;  %v9377_v61 = vsel %vm9376_vm2, %v9059_v36, %v6048_v3 }
 0x210   : > { %9341 = vst [vmem:[#allocation94_spill] sm:$0xff] %v6776_v34  ;;  %v6785_v14 = vadd.f32 %v9347_v17, %v9343_v19  ;;  %v9360_v25 = vsel %vm5915_vm7, %v9358_v62, %v9359_v31  ;;  %v1542_v19 = vsel %vm6557_vm12, %v6567_v40, %v1536_v63  ;;  %v9363_v17 = vmax.f32 %v9362_v51, 0.0  ;;  %v9374_v40 = vld [vmem:[#allocation118_spill] sm:$0xff]  ;;  %v9384_v50 = vld [vmem:[#allocation120_spill] sm:$0xff]  ;;  %v9389_v53 = vld [vmem:[#allocation215_spill] sm:$0xff] }
 0x211   : > { %9354 = vst [vmem:[#allocation209_spill] sm:$0xff] %v6794_v0  ;;  %v6803_v11 = vadd.f32 %v9360_v25, %v9356_v28  ;;  %v9367_v21 = vsel %vm5926_vm8, %v9365_v22, %v9366_v35  ;;  %v9370_v7 = vmax.f32 %v9369_v48, 0.0  ;;  %v9371_v28 = vld [vmem:[#allocation203_spill] sm:$0xff]  ;;  %v9375_v63 = vmax.f32 %v9374_v40, 0.0  ;;  %v9386_v35 = vld [vmem:[#allocation241_spill] sm:$0xff] }
 0x212   : > { %v6815_v44 = vadd.f32 %v9367_v21, %v9363_v17  ;;  %v9372_v27 = vsel %vm5945_vm10, %v9056_v20, %v9371_v28  ;;  %v9379_v25 = vld [vmem:[#allocation119_spill] sm:$0xff]  ;;  %v9382_v17 = vsel %vm5977_vm13, %v9064_v41, %v9381_v42  ;;  %v9385_v22 = vmax.f32 %v9384_v50, 0.0  ;;  %v9388_v21 = vld [vmem:[#allocation221_spill] sm:$0xff]  ;;  %v9394_v28 = vld [vmem:[#allocation242_spill] sm:$0xff] }
 0x213   : > { %9361 = vst [vmem:[#allocation165_spill] sm:$0xff] %v6803_v11  ;;  %v6824_v62 = vadd.f32 %v9372_v27, %v9370_v7  ;;  %v6833_v31 = vadd.f32 %v9377_v61, %v9375_v63  ;;  %v9380_v51 = vmax.f32 %v9379_v25, 0.0  ;;  %vm9387_vm3 = vnez %v9386_v35  ;;  %v9392_v3 = vld [vmem:[#allocation121_spill] sm:$0xff]  ;;  %v9396_v27 = vld [vmem:[#allocation228_spill] sm:$0xff]  ;;  %v9400_v25 = vld [vmem:[#allocation122_spill] sm:$0xff] }
 0x214   : > { %9368 = vst [vmem:[#allocation217_spill] sm:$0xff] %v6815_v44  ;;  %v9390_v48 = vsel %vm9387_vm3, %v9388_v21, %v9389_v53  ;;  %v9393_v36 = vmax.f32 %v9392_v3, 0.0  ;;  %vm9395_vm4 = vnez %v9394_v28  ;;  %v1551_v41 = vsel %vm6576_vm5, %v6582_v9, %v1545_v46  ;;  %v9402_v42 = vld [vmem:[#allocation244_spill] sm:$0xff]  ;;  %v9408_v21 = vld [vmem:[#allocation123_spill] sm:$0xff]  ;;  %v9412_v3 = vld [vmem:[#allocation186_spill] sm:$0xff] }
 0x215   : > { %9373 = vst [vmem:[#allocation95_spill] sm:$0xff] %v6824_v62  ;;  %9378 = vst [vmem:[#allocation220_spill] sm:$0xff] %v6833_v31  ;;  %v6842_v20 = vadd.f32 %v9382_v17, %v9380_v51  ;;  %v6851_v7 = vadd.f32 %v9390_v48, %v9385_v22  ;;  %v9398_v40 = vsel %vm9395_vm4, %v9396_v27, %v9397_v4  ;;  %v1554_v61 = vmul.f32 0.6931472, %v3529_v60  ;;  %v9404_v17 = vld [vmem:[#allocation168_spill] sm:$0xff]  ;;  %v9410_v48 = vld [vmem:[#allocation246_spill] sm:$0xff] }
 0x216   : > { %v6860_v63 = vadd.f32 %v9398_v40, %v9393_v36  ;;  %v9401_v51 = vmax.f32 %v9400_v25, 0.0  ;;  %vm9403_vm7 = vnez %v9402_v42  ;;  %v9405_v50 = vld [vmem:[#allocation216_spill] sm:$0xff]  ;;  %v9409_v53 = vmax.f32 %v9408_v21, 0.0  ;;  %v9413_v36 = vld [vmem:[#allocation174_spill] sm:$0xff]  ;;  %v9418_v46 = vld [vmem:[#allocation247_spill] sm:$0xff] }
 0x217   : > { %9383 = vst [vmem:[#allocation96_spill] sm:$0xff] %v6842_v20  ;;  %9391 = vst [vmem:[#allocation222_spill] sm:$0xff] %v6851_v7  ;;  %v9406_v22 = vsel %vm9403_vm7, %v9404_v17, %v9405_v50  ;;  %vm9411_vm8 = vnez %v9410_v48  ;;  %v9417_v9 = vmax.f32 %v9416_v13, 0.0  ;;  %vm9419_vm5 = vnez %v9418_v46  ;;  %v9420_v60 = vld [vmem:[#allocation245_spill] sm:$0xff]  ;;  %v9421_v4 = vld [vmem:[#allocation219_spill] sm:$0xff] }
 0x218   : > { %9399 = vst [vmem:[#allocation97_spill] sm:$0xff] %v6860_v63  ;;  %v6872_v35 = vadd.f32 %v9406_v22, %v9401_v51  ;;  %v9414_v28 = vsel %vm9411_vm8, %v9412_v3, %v9413_v36  ;;  %v9422_v40 = vsel %vm9419_vm5, %v9420_v60, %v9421_v4  ;;  %v9424_v51 = vld [vmem:[#allocation125_spill] sm:$0xff]  ;;  %v9426_v17 = vld [vmem:[#allocation248_spill] sm:$0xff]  ;;  %v9442_v4 = vld [vmem:[#allocation175_spill] sm:$0xff]  ;;  %vm9498_vm3 = vnez %v9113_v23 }
 0x219   : > { %v6881_v27 = vadd.f32 %v9414_v28, %v9409_v53  ;;  %v6890_v25 = vadd.f32 %v9422_v40, %v9417_v9  ;;  %v9425_v42 = vmax.f32 %v9424_v51, 0.0  ;;  %vm9427_vm10 = vnez %v9426_v17  ;;  %v9428_v50 = vld [vmem:[#allocation249_spill] sm:$0xff]  ;;  %v9432_v53 = vld [vmem:[#allocation126_spill] sm:$0xff]  ;;  %v9434_v36 = vld [vmem:[#allocation252_spill] sm:$0xff] }
 0x21a   : > { %9407 = vst [vmem:[#allocation223_spill] sm:$0xff] %v6872_v35  ;;  %v9429_v22 = vld [vmem:[#allocation253_spill] sm:$0xff]  ;;  %v9433_v3 = vmax.f32 %v9432_v53, 0.0  ;;  %vm9435_vm12 = vnez %v9434_v36  ;;  %v9436_v28 = vld [vmem:[#allocation251_spill] sm:$0xff]  ;;  %vm9443_vm13 = vnez %v9442_v4  ;;  %v9444_v40 = vld [vmem:[#allocation254_spill] sm:$0xff]  ;;  %vm9520_vm8 = vnez %v9131_v52 }
 0x21b   : > { %9415 = vst [vmem:[#allocation98_spill] sm:$0xff] %v6881_v27  ;;  %9423 = vst [vmem:[#allocation99_spill] sm:$0xff] %v6890_v25  ;;  %v9430_v21 = vsel %vm9427_vm10, %v9428_v50, %v9429_v22  ;;  %v9437_v13 = vld [vmem:[#allocation177_spill] sm:$0xff]  ;;  %v9440_v9 = vld [vmem:[#allocation127_spill] sm:$0xff] }
 0x21c   : > { %v6899_v48 = vadd.f32 %v9430_v21, %v9425_v42  ;;  %v9438_v46 = vsel %vm9435_vm12, %v9436_v28, %v9437_v13  ;;  %v9441_v60 = vmax.f32 %v9440_v9, 0.0  ;;  %v9445_v51 = vld [vmem:[#allocation179_spill] sm:$0xff]  ;;  %v1560_v42 = vsel %vm6608_vm6, %v6622_v5, %v1554_v61  ;;  %v9448_v50 = vld [vmem:[#allocation128_spill] sm:$0xff]  ;;  %v9456_v13 = vld [vmem:[#allocation129_spill] sm:$0xff] }
 0x21d   : > { %v6908_v49 = vadd.f32 %v9438_v46, %v9433_v3  ;;  %v9446_v17 = vsel %vm9443_vm13, %v9444_v40, %v9445_v51  ;;  %v9449_v22 = vmax.f32 %v9448_v50, 0.0  ;;  %v9450_v21 = vld [vmem:[#allocation255_spill] sm:$0xff]  ;;  %v9452_v53 = vld [vmem:[#allocation176_spill] sm:$0xff]  ;;  %v9457_v46 = vmax.f32 %v9456_v13, 0.0  ;;  %v9460_v4 = vld [vmem:[#allocation181_spill] sm:$0xff] }
 0x21e   : > { %9431 = vst [vmem:[#allocation214_spill] sm:$0xff] %v6899_v48  ;;  %v6917_v25 = vadd.f32 %v9446_v17, %v9441_v60  ;;  %vm9451_vm15 = vnez %v9450_v21  ;;  %v9453_v3 = vld [vmem:[#allocation260_spill] sm:$0xff]  ;;  %v9461_v60 = vld [vmem:[#allocation183_spill] sm:$0xff]  ;;  %v9465_v5 = vmax.f32 %v9464_v29, 0.0  ;;  %v9466_v61 = vld [vmem:[#allocation257_spill] sm:$0xff] }
 0x21f   : > { %9439 = vst [vmem:[#allocation226_spill] sm:$0xff] %v6908_v49  ;;  %v9454_v36 = vsel %vm9451_vm15, %v9452_v53, %v9453_v3  ;;  %v9458_v9 = vld [vmem:[#allocation256_spill] sm:$0xff]  ;;  %vm9467_vm6 = vnez %v9466_v61  ;;  %v9468_v17 = vld [vmem:[#allocation258_spill] sm:$0xff]  ;;  %v9469_v50 = vld [vmem:[#allocation263_spill] sm:$0xff] }
 0x220   : > { %9447 = vst [vmem:[#allocation100_spill] sm:$0xff] %v6917_v25  ;;  %v6929_v28 = vadd.f32 %v9454_v36, %v9449_v22  ;;  %vm9459_vm0 = vnez %v9458_v9  ;;  %v9470_v21 = vsel %vm9467_vm6, %v9468_v17, %v9469_v50  ;;  %v9472_v22 = vld [vmem:[#allocation131_spill] sm:$0xff]  ;;  %v9476_v36 = vld [vmem:[#allocation261_spill] sm:$0xff]  ;;  %v9490_v50 = vld [vmem:[#allocation264_spill] sm:$0xff] }
 0x221   : > { %v9462_v40 = vsel %vm9459_vm0, %v9460_v4, %v9461_v60  ;;  %v6947_v49 = vadd.f32 %v9470_v21, %v9465_v5  ;;  %v9473_v53 = vmax.f32 %v9472_v22, 0.0  ;;  %v9474_v3 = vld [vmem:[#allocation259_spill] sm:$0xff]  ;;  %v9477_v13 = vld [vmem:[#allocation265_spill] sm:$0xff]  ;;  %v9482_v60 = vld [vmem:[#allocation182_spill] sm:$0xff]  ;;  %vm9491_vm2 = vnez %v9490_v50 }
 0x222   : > { %9455 = vst [vmem:[#allocation101_spill] sm:$0xff] %v6929_v28  ;;  %v6938_v51 = vadd.f32 %v9462_v40, %v9457_v46  ;;  %vm9475_vm11 = vnez %v9474_v3  ;;  %v9480_v46 = vld [vmem:[#allocation132_spill] sm:$0xff]  ;;  %vm9483_vm1 = vnez %v9482_v60  ;;  %v9484_v40 = vld [vmem:[#allocation262_spill] sm:$0xff]  ;;  %v9485_v29 = vld [vmem:[#allocation187_spill] sm:$0xff] }
 0x223   : > { %9471 = vst [vmem:[#allocation178_spill] sm:$0xff] %v6947_v49  ;;  %v9478_v9 = vsel %vm9475_vm11, %v9476_v36, %v9477_v13  ;;  %v9481_v4 = vmax.f32 %v9480_v46, 0.0  ;;  %v9486_v61 = vsel %vm9483_vm1, %v9484_v40, %v9485_v29  ;;  %v9488_v5 = vld [vmem:[#allocation133_spill] sm:$0xff]  ;;  %v9493_v22 = vld [vmem:[#allocation188_spill] sm:$0xff]  ;;  %v9499_v13 = vld [vmem:[#allocation190_spill] sm:$0xff] }
 0x224   : > { %9463 = vst [vmem:[#allocation218_spill] sm:$0xff] %v6938_v51  ;;  %v6956_v28 = vadd.f32 %v9478_v9, %v9473_v53  ;;  %v9489_v17 = vmax.f32 %v9488_v5, 0.0  ;;  %v9492_v21 = vld [vmem:[#allocation185_spill] sm:$0xff]  ;;  %v9496_v53 = vld [vmem:[#allocation134_spill] sm:$0xff]  ;;  %v9500_v9 = vsel %vm9498_vm3, %v6223_v2, %v9499_v13  ;;  %v9506_v29 = vld [vmem:[#allocation267_spill] sm:$0xff] }
 0x225   : > { %v6965_v51 = vadd.f32 %v9486_v61, %v9481_v4  ;;  %v9494_v3 = vsel %vm9491_vm2, %v9492_v21, %v9493_v22  ;;  %v9497_v36 = vmax.f32 %v9496_v53, 0.0  ;;  %v9502_v4 = vld [vmem:[#allocation135_spill] sm:$0xff]  ;;  %v9504_v40 = vld [vmem:[#allocation266_spill] sm:$0xff]  ;;  %v9512_v22 = vld [vmem:[#allocation268_spill] sm:$0xff] }
 0x226   : > { %9479 = vst [vmem:[#allocation167_spill] sm:$0xff] %v6956_v28  ;;  %v6974_v49 = vadd.f32 %v9494_v3, %v9489_v17  ;;  %v9503_v60 = vmax.f32 %v9502_v4, 0.0  ;;  %vm9505_vm4 = vnez %v9504_v40  ;;  %v9507_v61 = vld [vmem:[#allocation270_spill] sm:$0xff]  ;;  %v9510_v17 = vld [vmem:[#allocation136_spill] sm:$0xff]  ;;  %vm9513_vm7 = vnez %v9512_v22  ;;  %v9514_v3 = vld [vmem:[#allocation269_spill] sm:$0xff] }
 0x227   : > { %9487 = vst [vmem:[#allocation102_spill] sm:$0xff] %v6965_v51  ;;  %v6983_v46 = vadd.f32 %v9500_v9, %v9497_v36  ;;  %v9508_v5 = vsel %vm9505_vm4, %v9506_v29, %v9507_v61  ;;  %v9511_v21 = vmax.f32 %v9510_v17, 0.0  ;;  %v9515_v23 = vld [vmem:[#allocation273_spill] sm:$0xff]  ;;  %v9521_v13 = vld [vmem:[#allocation191_spill] sm:$0xff]  ;;  %v9530_v17 = vld [vmem:[#allocation276_spill] sm:$0xff] }
 0x228   : > { %9495 = vst [vmem:[#allocation171_spill] sm:$0xff] %v6974_v49  ;;  %v6992_v50 = vadd.f32 %v9508_v5, %v9503_v60  ;;  %v9516_v53 = vsel %vm9513_vm7, %v9514_v3, %v9515_v23  ;;  %v9518_v2 = vld [vmem:[#allocation137_spill] sm:$0xff]  ;;  %v9525_v60 = vld [vmem:[#allocation138_spill] sm:$0xff]  ;;  %v9527_v61 = vld [vmem:[#allocation271_spill] sm:$0xff] }
 0x229   : > { %9501 = vst [vmem:[#allocation103_spill] sm:$0xff] %v6983_v46  ;;  %v7001_v51 = vadd.f32 %v9516_v53, %v9511_v21  ;;  %v9519_v36 = vmax.f32 %v9518_v2, 0.0  ;;  %v9522_v9 = vld [vmem:[#allocation197_spill] sm:$0xff]  ;;  %v9526_v29 = vmax.f32 %v9525_v60, 0.0  ;;  %vm9528_vm5 = vnez %v9527_v61  ;;  %v9533_v21 = vld [vmem:[#allocation139_spill] sm:$0xff]  ;;  %v9535_v23 = vld [vmem:[#allocation272_spill] sm:$0xff] }
 0x22a   : > { %9509 = vst [vmem:[#allocation104_spill] sm:$0xff] %v6992_v50  ;;  %v9523_v4 = vsel %vm9520_vm8, %v9521_v13, %v9522_v9  ;;  %v9529_v5 = vld [vmem:[#allocation193_spill] sm:$0xff]  ;;  %v9534_v3 = vmax.f32 %v9533_v21, 0.0  ;;  %vm9536_vm10 = vnez %v9535_v23  ;;  %v9537_v53 = vld [vmem:[#allocation195_spill] sm:$0xff]  ;;  %v9543_v9 = vld [vmem:[#allocation274_spill] sm:$0xff]  ;;  %vm9638_vm8 = vnez %v9217_v56 }
 0x22b   : > { %9517 = vst [vmem:[#allocation224_spill] sm:$0xff] %v7001_v51  ;;  %v7010_v40 = vadd.f32 %v9523_v4, %v9519_v36  ;;  %v9531_v22 = vsel %vm9528_vm5, %v9529_v5, %v9530_v17  ;;  %v9538_v52 = vld [vmem:[#allocation279_spill] sm:$0xff]  ;;  %v9541_v36 = vld [vmem:[#allocation140_spill] sm:$0xff]  ;;  %vm9544_vm12 = vnez %v9543_v9  ;;  %v9545_v4 = vld [vmem:[#allocation277_spill] sm:$0xff] }
 0x22c   : > { %v7019_v46 = vadd.f32 %v9531_v22, %v9526_v29  ;;  %v9539_v2 = vsel %vm9536_vm10, %v9537_v53, %v9538_v52  ;;  %v9542_v13 = vmax.f32 %v9541_v36, 0.0  ;;  %v9546_v60 = vld [vmem:[#allocation199_spill] sm:$0xff]  ;;  %v9549_v29 = vld [vmem:[#allocation141_spill] sm:$0xff]  ;;  %v9553_v22 = vld [vmem:[#allocation278_spill] sm:$0xff] }
 0x22d   : > { %9524 = vst [vmem:[#allocation230_spill] sm:$0xff] %v7010_v40  ;;  %v7028_v51 = vadd.f32 %v9539_v2, %v9534_v3  ;;  %v9547_v61 = vsel %vm9544_vm12, %v9545_v4, %v9546_v60  ;;  %v9550_v5 = vmax.f32 %v9549_v29, 0.0  ;;  %v9551_v17 = vld [vmem:[#allocation275_spill] sm:$0xff]  ;;  %v9554_v21 = vld [vmem:[#allocation200_spill] sm:$0xff]  ;;  %v9557_v3 = vld [vmem:[#allocation142_spill] sm:$0xff] }
 0x22e   : > { %9532 = vst [vmem:[#allocation105_spill] sm:$0xff] %v7019_v46  ;;  %v7037_v40 = vadd.f32 %v9547_v61, %v9542_v13  ;;  %vm9552_vm13 = vnez %v9551_v17  ;;  %v9558_v53 = vmax.f32 %v9557_v3, 0.0  ;;  %v9559_v52 = vld [vmem:[#allocation198_spill] sm:$0xff]  ;;  %v9561_v2 = vld [vmem:[#allocation280_spill] sm:$0xff]  ;;  %v9562_v36 = vld [vmem:[#allocation285_spill] sm:$0xff] }
 0x22f   : > { %9540 = vst [vmem:[#allocation231_spill] sm:$0xff] %v7028_v51  ;;  %v9555_v23 = vsel %vm9552_vm13, %v9553_v22, %v9554_v21  ;;  %vm9560_vm15 = vnez %v9559_v52  ;;  %v9565_v13 = vld [vmem:[#allocation143_spill] sm:$0xff]  ;;  %v9567_v60 = vld [vmem:[#allocation282_spill] sm:$0xff]  ;;  %v9569_v61 = vld [vmem:[#allocation281_spill] sm:$0xff] }
 0x230   : > { %9548 = vst [vmem:[#allocation106_spill] sm:$0xff] %v7037_v40  ;;  %v7046_v46 = vadd.f32 %v9555_v23, %v9550_v5  ;;  %v9563_v9 = vsel %vm9560_vm15, %v9561_v2, %v9562_v36  ;;  %v9566_v4 = vmax.f32 %v9565_v13, 0.0  ;;  %vm9568_vm0 = vnez %v9567_v60  ;;  %v9570_v29 = vld [vmem:[#allocation287_spill] sm:$0xff]  ;;  %v9573_v5 = vld [vmem:[#allocation144_spill] sm:$0xff]  ;;  %v9577_v3 = vld [vmem:[#allocation202_spill] sm:$0xff] }
 0x231   : > { %v7055_v51 = vadd.f32 %v9563_v9, %v9558_v53  ;;  %v9571_v17 = vsel %vm9568_vm0, %v9569_v61, %v9570_v29  ;;  %v9574_v21 = vmax.f32 %v9573_v5, 0.0  ;;  %v9575_v23 = vld [vmem:[#allocation283_spill] sm:$0xff]  ;;  %v9578_v52 = vld [vmem:[#allocation160_spill] sm:$0xff]  ;;  %v9581_v2 = vld [vmem:[#allocation145_spill] sm:$0xff] }
 0x232   : > { %9556 = vst [vmem:[#allocation225_spill] sm:$0xff] %v7046_v46  ;;  %v7064_v22 = vadd.f32 %v9571_v17, %v9566_v4  ;;  %vm9576_vm6 = vnez %v9575_v23  ;;  %v9582_v36 = vmax.f32 %v9581_v2, 0.0  ;;  %v9583_v9 = vld [vmem:[#allocation284_spill] sm:$0xff]  ;;  %v9585_v13 = vld [vmem:[#allocation286_spill] sm:$0xff] }
 0x233   : > { %9564 = vst [vmem:[#allocation192_spill] sm:$0xff] %v7055_v51  ;;  %v9579_v40 = vsel %vm9576_vm6, %v9577_v3, %v9578_v52  ;;  %vm9584_vm11 = vnez %v9583_v9  ;;  %v9586_v60 = vld [vmem:[#allocation204_spill] sm:$0xff]  ;;  %v9589_v4 = vld [vmem:[#allocation146_spill] sm:$0xff]  ;;  %v9599_v52 = vld [vmem:[#allocation289_spill] sm:$0xff] }
 0x234   : > { %9572 = vst [vmem:[#allocation232_spill] sm:$0xff] %v7064_v22  ;;  %v7073_v53 = vadd.f32 %v9579_v40, %v9574_v21  ;;  %v9587_v61 = vsel %vm9584_vm11, %v9585_v13, %v9586_v60  ;;  %v9590_v17 = vmax.f32 %v9589_v4, 0.0  ;;  %v9591_v5 = vld [vmem:[#allocation288_spill] sm:$0xff]  ;;  %v9593_v23 = vld [vmem:[#allocation158_spill] sm:$0xff]  ;;  %v9597_v40 = vld [vmem:[#allocation147_spill] sm:$0xff]  ;;  %vm9600_vm2 = vnez %v9599_v52 }
 0x235   : > { %v7082_v29 = vadd.f32 %v9587_v61, %v9582_v36  ;;  %vm9592_vm1 = vnez %v9591_v5  ;;  %v9594_v51 = vld [vmem:[#allocation294_spill] sm:$0xff]  ;;  %v9598_v21 = vmax.f32 %v9597_v40, 0.0  ;;  %v9602_v9 = vld [vmem:[#allocation207_spill] sm:$0xff]  ;;  %v9605_v36 = vld [vmem:[#allocation148_spill] sm:$0xff] }
 0x236   : > { %9580 = vst [vmem:[#allocation107_spill] sm:$0xff] %v7073_v53  ;;  %v9595_v22 = vsel %vm9592_vm1, %v9593_v23, %v9594_v51  ;;  %v9601_v2 = vld [vmem:[#allocation290_spill] sm:$0xff]  ;;  %v9606_v13 = vmax.f32 %v9605_v36, 0.0  ;;  %v9607_v60 = vld [vmem:[#allocation292_spill] sm:$0xff]  ;;  %v9609_v61 = vld [vmem:[#allocation291_spill] sm:$0xff] }
 0x237   : > { %9588 = vst [vmem:[#allocation227_spill] sm:$0xff] %v7082_v29  ;;  %v7091_v3 = vadd.f32 %v9595_v22, %v9590_v17  ;;  %v9603_v53 = vsel %vm9600_vm2, %v9601_v2, %v9602_v9  ;;  %vm9608_vm3 = vnez %v9607_v60  ;;  %v9610_v4 = vld [vmem:[#allocation163_spill] sm:$0xff]  ;;  %v9613_v51 = vld [vmem:[#allocation149_spill] sm:$0xff]  ;;  %v9618_v40 = vld [vmem:[#allocation298_spill] sm:$0xff]  ;;  %v9643_v2 = vsel %vm6529_vm14, %v6539_v38, %v6606_v45 }
 0x238   : > { %v7100_v46 = vadd.f32 %v9603_v53, %v9598_v21  ;;  %v9611_v5 = vsel %vm9608_vm3, %v9609_v61, %v9610_v4  ;;  %v9614_v22 = vmax.f32 %v9613_v51, 0.0  ;;  %v9615_v17 = vld [vmem:[#allocation293_spill] sm:$0xff]  ;;  %v9621_v53 = vld [vmem:[#allocation150_spill] sm:$0xff]  ;;  %v9624_v9 = vld [vmem:[#allocation295_spill] sm:$0xff]  ;;  %v3987_v38 = vmov (!%p2848_p6), 0.0  }
 0x239   : > { %9596 = vst [vmem:[#allocation194_spill] sm:$0xff] %v7091_v3  ;;  %v7109_v29 = vadd.f32 %v9611_v5, %v9606_v13  ;;  %vm9616_vm4 = vnez %v9615_v17  ;;  %v9617_v23 = vld [vmem:[#allocation161_spill] sm:$0xff]  ;;  %v9622_v21 = vmax.f32 %v9621_v53, 0.0  ;;  %v9625_v36 = vld [vmem:[#allocation164_spill] sm:$0xff]  ;;  %v9628_v13 = vld [vmem:[#allocation151_spill] sm:$0xff] }
 0x23a   : > { %9604 = vst [vmem:[#allocation234_spill] sm:$0xff] %v7100_v46  ;;  %v9619_v52 = vsel %vm9616_vm4, %v9617_v23, %v9618_v40  ;;  %v9626_v60 = vsel %vm6487_vm9, %v9624_v9, %v9625_v36  ;;  %v9629_v61 = vmax.f32 %v9628_v13, 0.0  ;;  %v9630_v4 = vld [vmem:[#allocation297_spill] sm:$0xff]  ;;  %v9632_v5 = vld [vmem:[#allocation162_spill] sm:$0xff]  ;;  %v9633_v51 = vld [vmem:[#allocation211_spill] sm:$0xff]  ;;  %v9639_v40 = vsel %vm9638_vm8, %v6522_v8, %v6574_v43 }
 0x23b   : > { %9612 = vst [vmem:[#allocation108_spill] sm:$0xff] %v7109_v29  ;;  %v7118_v3 = vadd.f32 %v9619_v52, %v9614_v22  ;;  %v7127_v46 = vadd.f32 %v9626_v60, %v9622_v21  ;;  %vm9631_vm7 = vnez %v9630_v4  ;;  %v9636_v22 = vld [vmem:[#allocation152_spill] sm:$0xff]  ;;  %v9641_v53 = vld [vmem:[#allocation153_spill] sm:$0xff]  ;;  %v9645_v36 = vld [vmem:[#allocation154_spill] sm:$0xff] }
 0x23c   : > { %v9634_v17 = vsel %vm9631_vm7, %v9632_v5, %v9633_v51  ;;  %v9637_v23 = vmax.f32 %v9636_v22, 0.0  ;;  %v9642_v21 = vmax.f32 %v9641_v53, 0.0  ;;  %v9646_v60 = vmax.f32 %v9645_v36, 0.0  ;;  %v9651_v8 = vld [vmem:[#allocation156_spill] sm:$0xff]  ;;  %v9654_v51 = vld [vmem:[#allocation157_spill] sm:$0xff]  ;;  %1628 = sbr.rel (%p2848_p6) target bundleno = 580 (0x244), region = 68 }
 0x23d   : > { %9620 = vst [vmem:[#allocation166_spill] sm:$0xff] %v7118_v3  ;;  %9627 = vst [vmem:[#allocation196_spill] sm:$0xff] %v7127_v46  ;;  %v7136_v29 = vadd.f32 %v9634_v17, %v9629_v61  ;;  %v9648_v61 = vld [vmem:[#allocation155_spill] sm:$0xff]  ;;  %v9652_v43 = vmax.f32 %v9651_v8, 0.0  ;;  %v9655_v17 = vmax.f32 %v9654_v51, 0.0 }
 0x23e   : > { %v7145_v52 = vadd.f32 %v9639_v40, %v9637_v23  ;;  %v7154_v9 = vadd.f32 %v9643_v2, %v9642_v21  ;;  %v7158_v13 = vadd.f32 %v1533_v55, %v9646_v60  ;;  %v9649_v56 = vmax.f32 %v9648_v61, 0.0  ;;  %1629 = vst [vmem:[#allocation2] sm:$0xff] (!%p2848_p6), %v3987_v38  ;;  %1630 = vst [vmem:[#allocation2 + $0x8] sm:$0xff] (!%p2848_p6), %v3987_v38 }
 0x23f   : > { %9635 = vst [vmem:[#allocation169_spill] sm:$0xff] %v7136_v29  ;;  %v7166_v5 = vadd.f32 %v1551_v41, %v9652_v43  ;;  %v7170_v47 = vadd.f32 %v1560_v42, %v9655_v17  ;;  %1631 = vst [vmem:[#allocation3] sm:$0xff] (!%p2848_p6), %v3987_v38 }
 0x240   : > { %9640 = vst [vmem:[#allocation109_spill] sm:$0xff] %v7145_v52  ;;  %9644 = vst [vmem:[#allocation229_spill] sm:$0xff] %v7154_v9  ;;  %v7162_v4 = vadd.f32 %v1542_v19, %v9649_v56 }
 0x241   : > { %9647 = vst [vmem:[#allocation159_spill] sm:$0xff] %v7158_v13  ;;  %9653 = vst [vmem:[#allocation110_spill] sm:$0xff] %v7166_v5 }
 0x242   : > { %9650 = vst [vmem:[#allocation189_spill] sm:$0xff] %v7162_v4  ;;  %9656 = vst [vmem:[#allocation201_spill] sm:$0xff] %v7170_v47 }
 0x243   : > { %1632 = vst [vmem:[#allocation3 + $0x8] sm:$0xff] %v3987_v38 }
 0x244 PF: > { %v9660_v45 = vld [vmem:[#allocation31_spill] sm:$0xff]  ;;  %v9661_v55 = vld [vmem:[#allocation33_spill] sm:$0xff]  ;;  %v9662_v41 = vld [vmem:[#allocation30_spill] sm:$0xff]  ;;  %v1715_v34 = vmul.f32 %v6600_v18, %v6600_v18  ;;  %v1717_v28 = vmul.f32 %v6631_v32, %v6631_v32  ;;  %v1714_v52 = vmul.f32 %v6591_v15, %v6591_v15  ;;  %v1716_v20 = vmul.f32 %v6619_v59, %v6619_v59 }
 0x245   : > { %v2930_v19 = vpack.c.bf16 %v9661_v55, %v9660_v45  ;;  %v9663_v42 = vld [vmem:[#allocation32_spill] sm:$0xff]  ;;  %v9664_v23 = vld [vmem:[#allocation35_spill] sm:$0xff]  ;;  %v9665_v40 = vld [vmem:[#allocation37_spill] sm:$0xff]  ;;  %v2046_v17 = vmul.f32 %v9660_v45, %v9660_v45  ;;  %v2048_v13 = vmul.f32 %v9661_v55, %v9661_v55  ;;  %3530 = vlog2.f32 %v6591_v15 }
 0x246   : > { %v2932_v22 = vpack.c.bf16 %v9663_v42, %v9662_v41  ;;  %v2934_v53 = vpack.c.bf16 %v9665_v40, %v9664_v23  ;;  %v9666_v21 = vld [vmem:[#allocation29_spill] sm:$0xff]  ;;  %v9667_v2 = vld [vmem:[#allocation34_spill] sm:$0xff]  ;;  %v9668_v36 = vld [vmem:[#allocation36_spill] sm:$0xff]  ;;  %v2045_v0 = vmul.f32 %v9662_v41, %v9662_v41  ;;  %v2994_v63 = vpack.c.bf16 %v1717_v28, %v1715_v34 }
 0x247   : > { %1699 = vmatprep.mubr.f32.mxu0 %v9666_v21  ;;  %2931 = vmatprep.subr.bf16.mxu0 %v2930_v19  ;;  %v2936_v60 = vpack.c.bf16 %v9668_v36, %v9667_v2  ;;  %v9669_v61 = vld [vmem:[#allocation39_spill] sm:$0xff]  ;;  %v9670_v56 = vld [vmem:[#allocation41_spill] sm:$0xff]  ;;  %v9671_v43 = vld [vmem:[#allocation38_spill] sm:$0xff]  ;;  %3532 = vlog2.f32 %v6619_v59  ;;  %v2996_v25 = vpack.c.bf16 %v1716_v20, %v1714_v52  ;;  %v2047_v15 = vmul.f32 %v9663_v42, %v9663_v42 }
 0x248   : > { %2933 = vmatpush1.bf16.xpose.msra.mxu0 %v2932_v22  ;;  %v2938_v8 = vpack.c.bf16 %v9670_v56, %v9669_v61  ;;  %v9672_v51 = vld [vmem:[#allocation40_spill] sm:$0xff]  ;;  %v9673_v38 = vld [vmem:[#allocation43_spill] sm:$0xff]  ;;  %v9674_v5 = vld [vmem:[#allocation45_spill] sm:$0xff]  ;;  %3534 = vlog2.f32 %v6600_v18  ;;  %2995 = vmatprep.subr.bf16.mxu1 %v2994_v63  ;;  %v2110_v19 = vadd.f32 %v2046_v17, %v1715_v34  ;;  %v1719_v59 = vmul.f32 %v6649_v54, %v6649_v54 }
 0x249   : > { %v9675_v47 = vld [vmem:[#allocation42_spill] sm:$0xff]  ;;  %v9676_v4 = vld [vmem:[#allocation44_spill] sm:$0xff]  ;;  %2935 = vmatprep.subr.bf16.mxu0 %v2934_v53  ;;  %v9677_v46 = vld [vmem:[#allocation47_spill] sm:$0xff]  ;;  %3536 = vlog2.f32 %v6631_v32  ;;  %2997 = vmatpush1.bf16.xpose.msra.mxu1 %v2996_v25  ;;  %v2109_v31 = vadd.f32 %v2045_v0, %v1714_v52  ;;  %v1721_v45 = vmul.f32 %v6673_v24, %v6673_v24  ;;  %v2050_v18 = vmul.f32 %v9664_v23, %v9664_v23 }
 0x24a   : > { %v9678_v21 = vld [vmem:[#allocation49_spill] sm:$0xff]  ;;  %v9679_v9 = vld [vmem:[#allocation46_spill] sm:$0xff]  ;;  %v9680_v29 = vld [vmem:[#allocation48_spill] sm:$0xff]  ;;  %v2052_v42 = vmul.f32 %v9665_v40, %v9665_v40  ;;  %v1718_v34 = vmul.f32 %v6640_v6, %v6640_v6  ;;  %v1720_v32 = vmul.f32 %v6664_v30, %v6664_v30  ;;  %v2049_v63 = vmul.f32 %v9667_v2, %v9667_v2 }
 0x24b   : > { %v9681_v22 = vld [vmem:[#allocation51_spill] sm:$0xff]  ;;  %v9682_v50 = vld [vmem:[#allocation53_spill] sm:$0xff]  ;;  %v9695_v11 = vld [vmem:[#allocation62_spill] sm:$0xff]  ;;  %v2111_v25 = vadd.f32 %v2047_v15, %v1716_v20  ;;  %v2998_v0 = vpack.c.bf16 %v1721_v45, %v1719_v59  ;;  %v2051_v52 = vmul.f32 %v9668_v36, %v9668_v36  ;;  %3538 = vlog2.f32 %v6649_v54 }
 0x24c   : > { %v9694_v3 = vld [vmem:[#allocation65_spill] sm:$0xff]  ;;  %v9696_v49 = vld [vmem:[#allocation64_spill] sm:$0xff]  ;;  %v9697_v39 = vld [vmem:[#allocation67_spill] sm:$0xff]  ;;  %v2116_v17 = vadd.f32 %v2052_v42, %v1721_v45  ;;  %v2113_v40 = vadd.f32 %v2049_v63, %v1718_v34  ;;  %v2174_v53 = vmul.f32 0.5, %v2110_v19  ;;  %v3000_v41 = vpack.c.bf16 %v1720_v32, %v1718_v34 }
 0x24d   : > { %v9698_v35 = vld [vmem:[#allocation69_spill] sm:$0xff]  ;;  %v9711_v44 = vld [vmem:[#allocation78_spill] sm:$0xff]  ;;  %v9712_v7 = vld [vmem:[#allocation80_spill] sm:$0xff]  ;;  %2999 = vmatprep.subr.bf16.mxu1 %v2998_v0  ;;  %v2115_v27 = vadd.f32 %v2051_v52, %v1720_v32  ;;  %3540 = vlog2.f32 %v6673_v24  ;;  %v1723_v20 = vmul.f32 %v6691_v33, %v6691_v33  ;;  %v1725_v36 = vmul.f32 %v6709_v37, %v6709_v37 }
 0x24e   : > { %v9710_v62 = vld [vmem:[#allocation81_spill] sm:$0xff]  ;;  %v9713_v55 = vld [vmem:[#allocation83_spill] sm:$0xff]  ;;  %3542 = vlog2.f32 %v6640_v6  ;;  %v9719_v45 = vpack.c.bf16 %v9672_v51, %v9671_v43  ;;  %v2173_v54 = vmul.f32 0.5, %v2109_v31  ;;  %v2175_v19 = vmul.f32 0.5, %v2111_v25 }
 0x24f   : > { %v9714_v48 = vld [vmem:[#allocation85_spill] sm:$0xff]  ;;  %v3531_v15 = vpop.eup %3530  ;;  %3544 = vlog2.f32 %v6664_v30  ;;  %v9720_v6 = vpack.c.bf16 %v9674_v5, %v9673_v38  ;;  %v2180_v42 = vmul.f32 0.5, %v2116_v17  ;;  %v3002_v34 = vpack.c.bf16 %v1725_v36, %v1723_v20 }
 0x250   : > { %2937 = vmatpush1.bf16.xpose.msra.mxu0 %v2936_v60  ;;  %v2112_v60 = vadd.f32 %v2048_v13, %v1717_v28  ;;  %v2114_v28 = vadd.f32 %v2050_v18, %v1719_v59  ;;  %v9718_v23 = vld [vmem:[#allocation89_spill] sm:$0xff]  ;;  %v7292_v18 = vmul.f32 0.5, %v2113_v40  ;;  %v7294_v0 = vmul.f32 0.5, %v2115_v27 }
 0x251   : > { %2939 = vmatprep.subr.bf16.mxu0 %v2938_v8  ;;  %v3533_v24 = vpop.eup %3532  ;;  %3001 = vmatpush1.bf16.xpose.msra.mxu1 %v3000_v41  ;;  %v2054_v31 = vmul.f32 %v9669_v61, %v9669_v61  ;;  %v2056_v30 = vmul.f32 %v9670_v56, %v9670_v56  ;;  %v1722_v40 = vmul.f32 %v6682_v12, %v6682_v12  ;;  %3546 = vlog2.f32 %v6691_v33 }
 0x252   : > { %v2176_v2 = vmul.f32 0.5, %v2112_v60  ;;  %v2178_v59 = vmul.f32 0.5, %v2114_v28  ;;  %v1854_v60 = vmul.f32 0.6931472, %v3531_v15  ;;  %v3535_v32 = vpop.eup %3534  ;;  %v1858_v63 = vmul.f32 0.6931472, %v3533_v24  ;;  %3003 = vmatprep.subr.bf16.mxu1 %v3002_v34 }
 0x253   : > { %v3537_v25 = vpop.eup %3536  ;;  %v1856_v52 = vmul.f32 0.6931472, %v3535_v32  ;;  %v2053_v17 = vmul.f32 %v9671_v43, %v9671_v43  ;;  %v1724_v27 = vmul.f32 %v6700_v16, %v6700_v16  ;;  %v2055_v56 = vmul.f32 %v9672_v51, %v9672_v51 }
 0x254   : > { %v1981_v28 = vsub.f32 0.0, %v1854_v60  ;;  %v1983_v15 = vsub.f32 0.0, %v1858_v63  ;;  %v1860_v41 = vmul.f32 0.6931472, %v3537_v25  ;;  %3548 = vlog2.f32 %v6709_v37 }
 0x255   : > { %v2118_v60 = vadd.f32 %v2054_v31, %v1723_v20  ;;  %v3004_v34 = vpack.c.bf16 %v1724_v27, %v1722_v40  ;;  %v3539_v32 = vpop.eup %3538  ;;  %v2120_v25 = vadd.f32 %v2056_v30, %v1725_v36  ;;  %v2117_v8 = vadd.f32 %v2053_v17, %v1722_v40 }
 0x256   : > { %v2237_v61 = vadd.f32 %v2173_v54, %v1981_v28  ;;  %v2239_v24 = vadd.f32 %v2175_v19, %v1983_v15  ;;  %v9721_v33 = vpack.c.bf16 %v9676_v4, %v9675_v47  ;;  %v1864_v28 = vmul.f32 0.6931472, %v3539_v32 }
 0x257   : > { %v3541_v13 = vpop.eup %3540  ;;  %3550 = vlog2.f32 %v6682_v12  ;;  %v9722_v20 = vpack.c.bf16 %v9678_v21, %v9677_v46  ;;  %v2119_v36 = vadd.f32 %v2055_v56, %v1724_v27  ;;  %v1727_v15 = vmul.f32 %v6731_v1, %v6731_v1 }
 0x258   : > { %2941 = vmatpush1.bf16.xpose.msra.mxu0 %v9719_v45  ;;  %v1982_v45 = vsub.f32 0.0, %v1856_v52  ;;  %v7310_v43 = vadd.f32 -0.5, %v2237_v61  ;;  %v7315_v54 = vadd.f32 -0.5, %v2239_v24  ;;  %v3543_v37 = vpop.eup %3542  ;;  %3552 = vlog2.f32 %v6700_v16 }
 0x259   : > { %2943 = vmatprep.subr.bf16.mxu0 %v9720_v6  ;;  %v1984_v6 = vsub.f32 0.0, %v1860_v41  ;;  %v3545_v31 = vpop.eup %3544  ;;  %v1986_v52 = vsub.f32 0.0, %v1864_v28  ;;  %v1862_v40 = vmul.f32 0.6931472, %v3543_v37  ;;  %3005 = vmatpush1.bf16.xpose.msra.mxu1 %v3004_v34  ;;  %v2182_v61 = vmul.f32 0.5, %v2118_v60 }
 0x25a   : > { %v2238_v63 = vadd.f32 %v2174_v53, %v1982_v45  ;;  %v1868_v53 = vmul.f32 0.6931472, %v3541_v13  ;;  %v1866_v17 = vmul.f32 0.6931472, %v3545_v31  ;;  %v1729_v13 = vmul.f32 %v6749_v10, %v6749_v10  ;;  %v9744_v31 = vld [vmem:[#allocation217_spill] sm:$0xff] }
 0x25b   : > { %v2240_v51 = vadd.f32 %v2176_v2, %v1984_v6  ;;  %v2242_v41 = vadd.f32 %v2178_v59, %v1986_v52  ;;  %v1985_v27 = vsub.f32 0.0, %v1862_v40  ;;  %v2184_v24 = vmul.f32 0.5, %v2120_v25  ;;  %v3547_v32 = vpop.eup %3546 }
 0x25c   : > { %v7321_v19 = vadd.f32 -0.5, %v2238_v63  ;;  %v1988_v12 = vsub.f32 0.0, %v1868_v53  ;;  %v1987_v56 = vsub.f32 0.0, %v1866_v17  ;;  %v3006_v6 = vpack.c.bf16 %v1729_v13, %v1727_v15 }
 0x25d   : > { %v7324_v30 = vadd.f32 -0.5, %v2240_v51  ;;  %v7334_v34 = vadd.f32 -0.5, %v2242_v41  ;;  %v2241_v63 = vadd.f32 %v7292_v18, %v1985_v27  ;;  %v1726_v51 = vmul.f32 %v6722_v26, %v6722_v26 }
 0x25e   : > { %v2244_v45 = vadd.f32 %v2180_v42, %v1988_v12  ;;  %v3549_v28 = vpop.eup %3548  ;;  %v2243_v59 = vadd.f32 %v7294_v0, %v1987_v56  ;;  %v1872_v42 = vmul.f32 0.6931472, %v3547_v32  ;;  %3007 = vmatprep.subr.bf16.mxu1 %v3006_v6  ;;  %v1728_v60 = vmul.f32 %v6740_v58, %v6740_v58 }
 0x25f   : > { %v9723_v25 = vpack.c.bf16 %v9680_v29, %v9679_v9  ;;  %v7349_v18 = vadd.f32 -0.5, %v2241_v63  ;;  %v2059_v53 = vmul.f32 %v9676_v4, %v9676_v4  ;;  %v9725_v0 = vpack.c.bf16 %v9682_v50, %v9681_v22 }
 0x260   : > { %2945 = vmatpush1.bf16.xpose.msra.mxu0 %v9721_v33  ;;  %v2058_v33 = vmul.f32 %v9673_v38, %v9673_v38  ;;  %v7341_v37 = vadd.f32 -0.5, %v2244_v45  ;;  %v1876_v38 = vmul.f32 0.6931472, %v3549_v28  ;;  %v7360_v52 = vadd.f32 -0.5, %v2243_v59 }
 0x261   : > { %2947 = vmatprep.subr.bf16.mxu0 %v9722_v20  ;;  %9724 = vst [vmem:[#allocation237_spill] sm:$0xff] %v7349_v18  ;;  %v2057_v20 = vmul.f32 %v9675_v47, %v9675_v47  ;;  %v1990_v40 = vsub.f32 0.0, %v1872_v42  ;;  %v3008_v12 = vpack.c.bf16 %v1728_v60, %v1726_v51  ;;  %v3551_v17 = vpop.eup %3550  ;;  %v2181_v41 = vmul.f32 0.5, %v2117_v8 }
 0x262   : > { %v2183_v27 = vmul.f32 0.5, %v2119_v36  ;;  %v1992_v45 = vsub.f32 0.0, %v1876_v38  ;;  %3554 = vlog2.f32 %v6731_v1  ;;  %v3553_v47 = vpop.eup %3552  ;;  %v1870_v6 = vmul.f32 0.6931472, %v3551_v17 }
 0x263   : > { %v2246_v56 = vadd.f32 %v2182_v61, %v1990_v40  ;;  %3009 = vmatpush1.bf16.xpose.msra.mxu1 %v3008_v12  ;;  %3556 = vlog2.f32 %v6749_v10  ;;  %v1874_v63 = vmul.f32 0.6931472, %v3553_v47  ;;  %v2060_v28 = vmul.f32 %v9674_v5, %v9674_v5 }
 0x264   : > { %v2248_v32 = vadd.f32 %v2184_v24, %v1992_v45  ;;  %v2122_v59 = vadd.f32 %v2058_v33, %v1727_v15  ;;  %v1989_v36 = vsub.f32 0.0, %v1870_v6  ;;  %v2121_v42 = vadd.f32 %v2057_v20, %v1726_v51  ;;  %v9728_v24 = vld [vmem:[#allocation52_spill] sm:$0xff]  ;;  %v9729_v33 = vld [vmem:[#allocation50_spill] sm:$0xff] }
 0x265   : > { %v7368_v8 = vadd.f32 -0.5, %v2246_v56  ;;  %v2123_v1 = vadd.f32 %v2059_v53, %v1728_v60  ;;  %v1991_v38 = vsub.f32 0.0, %v1874_v63  ;;  %3558 = vlog2.f32 %v6722_v26  ;;  %v9736_v45 = vld [vmem:[#allocation94_spill] sm:$0xff]  ;;  %v9743_v60 = vld [vmem:[#allocation209_spill] sm:$0xff] }
 0x266   : > { %v1731_v61 = vmul.f32 %v6767_v57, %v6767_v57  ;;  %v2245_v10 = vadd.f32 %v2181_v41, %v1989_v36  ;;  %3560 = vlog2.f32 %v6740_v58  ;;  %v1733_v5 = vmul.f32 %v6785_v14, %v6785_v14  ;;  %v9732_v58 = vld [vmem:[#allocation55_spill] sm:$0xff] }
 0x267   : > { %9726 = vst [vmem:[#allocation111_spill] sm:$0xff] %v7368_v8  ;;  %v2062_v15 = vmul.f32 %v9677_v46, %v9677_v46  ;;  %v9730_v51 = vpack.c.bf16 %v9728_v24, %v9729_v33  ;;  %v2247_v26 = vadd.f32 %v2183_v27, %v1991_v38  ;;  %v2124_v20 = vadd.f32 %v2060_v28, %v1729_v13  ;;  %v9735_v46 = vld [vmem:[#allocation213_spill] sm:$0xff] }
 0x268   : > { %2949 = vmatpush1.bf16.xpose.msra.mxu0 %v9723_v25  ;;  %v7370_v25 = vadd.f32 -0.5, %v2248_v32  ;;  %v2064_v53 = vmul.f32 %v9678_v21, %v9678_v21  ;;  %v7390_v12 = vadd.f32 -0.5, %v2245_v10  ;;  %v3010_v17 = vpack.c.bf16 %v1733_v5, %v1731_v61 }
 0x269   : > { %2951 = vmatprep.subr.bf16.mxu0 %v9725_v0  ;;  %v9731_v0 = vld [vmem:[#allocation57_spill] sm:$0xff]  ;;  %v1730_v41 = vmul.f32 %v9735_v46, %v9735_v46  ;;  %v1732_v47 = vmul.f32 %v9736_v45, %v9736_v45  ;;  %v7396_v56 = vadd.f32 -0.5, %v2247_v26  ;;  %v2185_v27 = vmul.f32 0.5, %v2121_v42 }
 0x26a   : > { %9727 = vst [vmem:[#allocation170_spill] sm:$0xff] %v7370_v25  ;;  %v9733_v40 = vpack.c.bf16 %v9731_v0, %v9732_v58  ;;  %9734 = vst [vmem:[#allocation112_spill] sm:$0xff] %v7390_v12  ;;  %v2187_v13 = vmul.f32 0.5, %v2123_v1  ;;  %v2126_v6 = vadd.f32 %v2062_v15, %v1731_v61  ;;  %3011 = vmatprep.subr.bf16.mxu1 %v3010_v17  ;;  %3562 = vlog2.f32 %v6767_v57  ;;  %v9738_v61 = vld [vmem:[#allocation165_spill] sm:$0xff]  ;;  %v9739_v15 = vld [vmem:[#allocation95_spill] sm:$0xff] }
 0x26b   : > { %9737 = vst [vmem:[#allocation233_spill] sm:$0xff] %v7396_v56  ;;  %v3012_v21 = vpack.c.bf16 %v1732_v47, %v1730_v41  ;;  %v2061_v32 = vmul.f32 %v9679_v9, %v9679_v9  ;;  %v2063_v63 = vmul.f32 %v9680_v29, %v9680_v29  ;;  %v2186_v38 = vmul.f32 0.5, %v2122_v59  ;;  %v9740_v17 = vld [vmem:[#allocation56_spill] sm:$0xff] }
 0x26c   : > { %v3555_v28 = vpop.eup %3554  ;;  %v2128_v10 = vadd.f32 %v2064_v53, %v1733_v5  ;;  %3564 = vlog2.f32 %v6785_v14  ;;  %v1735_v9 = vmul.f32 %v9738_v61, %v9738_v61  ;;  %v1737_v29 = vmul.f32 %v9739_v15, %v9739_v15 }
 0x26d   : > { %v3557_v42 = vpop.eup %3556  ;;  %v1880_v1 = vmul.f32 0.6931472, %v3555_v28  ;;  %3013 = vmatpush1.bf16.xpose.msra.mxu1 %v3012_v21  ;;  %3566 = vlog2.f32 %v9735_v46  ;;  %v2190_v26 = vmul.f32 0.5, %v2126_v6  ;;  %v2125_v5 = vadd.f32 %v2061_v32, %v1730_v41  ;;  %v9741_v21 = vld [vmem:[#allocation54_spill] sm:$0xff] }
 0x26e   : > { %v1884_v57 = vmul.f32 0.6931472, %v3557_v42  ;;  %3568 = vlog2.f32 %v9736_v45  ;;  %v2127_v53 = vadd.f32 %v2063_v63, %v1732_v47  ;;  %v3014_v14 = vpack.c.bf16 %v1737_v29, %v1735_v9  ;;  %v9745_v42 = vld [vmem:[#allocation61_spill] sm:$0xff]  ;;  %v9746_v45 = vld [vmem:[#allocation59_spill] sm:$0xff] }
 0x26f   : > { %v1994_v59 = vsub.f32 0.0, %v1880_v1  ;;  %v9742_v28 = vpack.c.bf16 %v9740_v17, %v9741_v21  ;;  %v2192_v36 = vmul.f32 0.5, %v2128_v10  ;;  %v1734_v4 = vmul.f32 %v9743_v60, %v9743_v60 }
 0x270   : > { %2953 = vmatpush1.bf16.xpose.msra.mxu0 %v9730_v51  ;;  %v2188_v51 = vmul.f32 0.5, %v2124_v20  ;;  %v1996_v46 = vsub.f32 0.0, %v1884_v57  ;;  %v1736_v20 = vmul.f32 %v9744_v31, %v9744_v31  ;;  %v9747_v1 = vpack.c.bf16 %v9745_v42, %v9746_v45  ;;  %3015 = vmatprep.subr.bf16.mxu1 %v3014_v14 }
 0x271   : > { %2955 = vmatprep.subr.bf16.mxu0 %v9733_v40  ;;  %v3559_v40 = vpop.eup %3558  ;;  %v2250_v41 = vadd.f32 %v2186_v38, %v1994_v59  ;;  %v2066_v32 = vmul.f32 %v9681_v22, %v9681_v22  ;;  %v2068_v63 = vmul.f32 %v9682_v50, %v9682_v50  ;;  %v2065_v2 = vmul.f32 %v9729_v33, %v9729_v33 }
 0x272   : > { %v3561_v6 = vpop.eup %3560  ;;  %v1878_v47 = vmul.f32 0.6931472, %v3559_v40  ;;  %v2252_v10 = vadd.f32 %v2188_v51, %v1996_v46  ;;  %v2067_v38 = vmul.f32 %v9728_v24, %v9728_v24  ;;  %3570 = vlog2.f32 %v9738_v61 }
 0x273   : > { %v1882_v57 = vmul.f32 0.6931472, %v3561_v6  ;;  %v7428_v16 = vadd.f32 -0.5, %v2250_v41  ;;  %v2189_v14 = vmul.f32 0.5, %v2125_v5  ;;  %3572 = vlog2.f32 %v9739_v15 }
 0x274   : > { %v1993_v12 = vsub.f32 0.0, %v1878_v47  ;;  %v7433_v59 = vadd.f32 -0.5, %v2252_v10  ;;  %v3563_v50 = vpop.eup %3562  ;;  %v2191_v40 = vmul.f32 0.5, %v2127_v53  ;;  %v2130_v46 = vadd.f32 %v2066_v32, %v1735_v9 }
 0x275   : > { %9748 = vst [vmem:[#allocation205_spill] sm:$0xff] %v7428_v16  ;;  %v1995_v22 = vsub.f32 0.0, %v1882_v57  ;;  %v2132_v6 = vadd.f32 %v2068_v63, %v1737_v29  ;;  %v1888_v24 = vmul.f32 0.6931472, %v3563_v50  ;;  %v2129_v47 = vadd.f32 %v2065_v2, %v1734_v4  ;;  %v9755_v2 = vld [vmem:[#allocation63_spill] sm:$0xff] }
 0x276   : > { %9749 = vst [vmem:[#allocation238_spill] sm:$0xff] %v7433_v59  ;;  %v2249_v51 = vadd.f32 %v2185_v27, %v1993_v12  ;;  %v3565_v33 = vpop.eup %3564  ;;  %v2131_v5 = vadd.f32 %v2067_v38, %v1736_v20  ;;  %3574 = vlog2.f32 %v9743_v60  ;;  %v9751_v12 = vld [vmem:[#allocation60_spill] sm:$0xff]  ;;  %v9752_v27 = vld [vmem:[#allocation58_spill] sm:$0xff] }
 0x277   : > { %v2251_v41 = vadd.f32 %v2187_v13, %v1995_v22  ;;  %v3567_v61 = vpop.eup %3566  ;;  %v1892_v57 = vmul.f32 0.6931472, %v3565_v33  ;;  %v9753_v9 = vpack.c.bf16 %v9751_v12, %v9752_v27  ;;  %v1998_v53 = vsub.f32 0.0, %v1888_v24 }
 0x278   : > { %2957 = vmatpush1.bf16.xpose.msra.mxu0 %v9742_v28  ;;  %v3016_v28 = vpack.c.bf16 %v1736_v20, %v1734_v4  ;;  %v7438_v10 = vadd.f32 -0.5, %v2249_v51  ;;  %v3569_v15 = vpop.eup %3568  ;;  %v1886_v32 = vmul.f32 0.6931472, %v3567_v61  ;;  %3576 = vlog2.f32 %v9744_v31  ;;  %v9757_v20 = vld [vmem:[#allocation96_spill] sm:$0xff] }
 0x279   : > { %2959 = vmatprep.subr.bf16.mxu0 %v9747_v1  ;;  %v7444_v29 = vadd.f32 -0.5, %v2251_v41  ;;  %v9756_v4 = vpack.c.bf16 %v9694_v3, %v9755_v2  ;;  %v2000_v13 = vsub.f32 0.0, %v1892_v57  ;;  %v1890_v63 = vmul.f32 0.6931472, %v3569_v15 }
 0x27a   : > { %3017 = vmatpush1.bf16.xpose.msra.mxu1 %v3016_v28  ;;  %9750 = vst [vmem:[#allocation113_spill] sm:$0xff] %v7438_v10  ;;  %v1739_v60 = vmul.f32 %v9757_v20, %v9757_v20  ;;  %v9758_v28 = vld [vmem:[#allocation97_spill] sm:$0xff]  ;;  %v2254_v50 = vadd.f32 %v2190_v26, %v1998_v53  ;;  %v1997_v51 = vsub.f32 0.0, %v1886_v32  ;;  %v2194_v33 = vmul.f32 0.5, %v2130_v46  ;;  %v9761_v26 = vld [vmem:[#allocation220_spill] sm:$0xff]  ;;  %v9762_v46 = vld [vmem:[#allocation222_spill] sm:$0xff] }
 0x27b   : > { %9754 = vst [vmem:[#allocation235_spill] sm:$0xff] %v7444_v29  ;;  %v1741_v38 = vmul.f32 %v9758_v28, %v9758_v28  ;;  %v2256_v41 = vadd.f32 %v2192_v36, %v2000_v13  ;;  %v1999_v31 = vsub.f32 0.0, %v1890_v63  ;;  %v2196_v24 = vmul.f32 0.5, %v2132_v6 }
 0x27c   : > { %v2253_v57 = vadd.f32 %v2189_v14, %v1997_v51  ;;  %v2070_v15 = vmul.f32 %v9732_v58, %v9732_v58  ;;  %v3571_v1 = vpop.eup %3570  ;;  %v1738_v36 = vmul.f32 %v9761_v26, %v9761_v26  ;;  %v1740_v6 = vmul.f32 %v9762_v46, %v9762_v46 }
 0x27d   : > { %v3018_v61 = vpack.c.bf16 %v1741_v38, %v1739_v60  ;;  %v7462_v16 = vadd.f32 -0.5, %v2256_v41  ;;  %v2255_v22 = vadd.f32 %v2191_v40, %v1999_v31  ;;  %v3573_v53 = vpop.eup %3572  ;;  %v1896_v14 = vmul.f32 0.6931472, %v3571_v1 }
 0x27e   : > { %v7468_v32 = vadd.f32 -0.5, %v2253_v57  ;;  %v2069_v58 = vmul.f32 %v9741_v21, %v9741_v21  ;;  %3578 = vlog2.f32 %v9757_v20  ;;  %v1900_v13 = vmul.f32 0.6931472, %v3573_v53 }
 0x27f   : > { %9760 = vst [vmem:[#allocation239_spill] sm:$0xff] %v7462_v16  ;;  %3019 = vmatprep.subr.bf16.mxu1 %v3018_v61  ;;  %v7475_v40 = vadd.f32 -0.5, %v2255_v22  ;;  %v3020_v63 = vpack.c.bf16 %v1740_v6, %v1738_v36  ;;  %v2193_v51 = vmul.f32 0.5, %v2129_v47  ;;  %v2195_v41 = vmul.f32 0.5, %v2131_v5 }
 0x280   : > { %2961 = vmatpush1.bf16.xpose.msra.mxu0 %v9753_v9  ;;  %v7456_v9 = vadd.f32 -0.5, %v2254_v50  ;;  %9763 = vst [vmem:[#allocation114_spill] sm:$0xff] %v7468_v32  ;;  %v9765_v50 = vpack.c.bf16 %v9696_v49, %v9695_v11  ;;  %v2002_v31 = vsub.f32 0.0, %v1896_v14  ;;  %3580 = vlog2.f32 %v9758_v28  ;;  %v3575_v1 = vpop.eup %3574  ;;  %v9791_v32 = vld [vmem:[#allocation77_spill] sm:$0xff] }
 0x281   : > { %2963 = vmatprep.subr.bf16.mxu0 %v9756_v4  ;;  %v2072_v4 = vmul.f32 %v9731_v0, %v9731_v0  ;;  %9764 = vst [vmem:[#allocation236_spill] sm:$0xff] %v7475_v40  ;;  %v9766_v21 = vpack.c.bf16 %v9698_v35, %v9697_v39  ;;  %v2004_v22 = vsub.f32 0.0, %v1900_v13  ;;  %v2134_v61 = vadd.f32 %v2070_v15, %v1739_v60  ;;  %v9769_v60 = vld [vmem:[#allocation214_spill] sm:$0xff]  ;;  %v9792_v40 = vld [vmem:[#allocation75_spill] sm:$0xff] }
 0x282   : > { %9759 = vst [vmem:[#allocation206_spill] sm:$0xff] %v7456_v9  ;;  %3021 = vmatpush1.bf16.xpose.msra.mxu1 %v3020_v63  ;;  %v2071_v57 = vmul.f32 %v9740_v17, %v9740_v17  ;;  %v3577_v53 = vpop.eup %3576  ;;  %v2258_v47 = vadd.f32 %v2194_v33, %v2002_v31  ;;  %v1894_v5 = vmul.f32 0.6931472, %v3575_v1  ;;  %3582 = vlog2.f32 %v9761_v26  ;;  %v9767_v9 = vld [vmem:[#allocation98_spill] sm:$0xff]  ;;  %v9772_v63 = vld [vmem:[#allocation99_spill] sm:$0xff] }
 0x283   : > { %v2136_v14 = vadd.f32 %v2072_v4, %v1741_v38  ;;  %v2260_v28 = vadd.f32 %v2196_v24, %v2004_v22  ;;  %v1898_v0 = vmul.f32 0.6931472, %v3577_v53  ;;  %3584 = vlog2.f32 %v9762_v46  ;;  %v9774_v53 = vld [vmem:[#allocation66_spill] sm:$0xff] }
 0x284   : > { %v7491_v16 = vadd.f32 -0.5, %v2258_v47  ;;  %v2001_v13 = vsub.f32 0.0, %v1894_v5  ;;  %v1745_v17 = vmul.f32 %v9769_v60, %v9769_v60  ;;  %v2135_v38 = vadd.f32 %v2071_v57, %v1740_v6  ;;  %v9773_v57 = vld [vmem:[#allocation68_spill] sm:$0xff] }
 0x285   : > { %v7496_v15 = vadd.f32 -0.5, %v2260_v28  ;;  %v2003_v33 = vsub.f32 0.0, %v1898_v0  ;;  %v2074_v24 = vmul.f32 %v9746_v45, %v9746_v45  ;;  %v1744_v31 = vmul.f32 %v9772_v63, %v9772_v63 }
 0x286   : > { %9768 = vst [vmem:[#allocation208_spill] sm:$0xff] %v7491_v16  ;;  %v2257_v4 = vadd.f32 %v2193_v51, %v2001_v13  ;;  %v2198_v22 = vmul.f32 0.5, %v2134_v61  ;;  %v2076_v0 = vmul.f32 %v9745_v42, %v9745_v42  ;;  %v9775_v45 = vpack.c.bf16 %v9773_v57, %v9774_v53  ;;  %v9778_v61 = vld [vmem:[#allocation71_spill] sm:$0xff] }
 0x287   : > { %9770 = vst [vmem:[#allocation240_spill] sm:$0xff] %v7496_v15  ;;  %v2259_v1 = vadd.f32 %v2195_v41, %v2003_v33  ;;  %v2073_v5 = vmul.f32 %v9752_v27, %v9752_v27  ;;  %v2075_v28 = vmul.f32 %v9751_v12, %v9751_v12  ;;  %v9777_v41 = vld [vmem:[#allocation73_spill] sm:$0xff]  ;;  %v2200_v46 = vmul.f32 0.5, %v2136_v14 }
 0x288   : > { %2965 = vmatpush1.bf16.xpose.msra.mxu0 %v9765_v50  ;;  %v2133_v50 = vadd.f32 %v2069_v58, %v1738_v36  ;;  %v9771_v36 = vld [vmem:[#allocation223_spill] sm:$0xff]  ;;  %v3579_v6 = vpop.eup %3578  ;;  %v7511_v51 = vadd.f32 -0.5, %v2257_v4  ;;  %v9779_v13 = vpack.c.bf16 %v9777_v41, %v9778_v61  ;;  %3586 = vlog2.f32 %v9767_v9 }
 0x289   : > { %2967 = vmatprep.subr.bf16.mxu0 %v9766_v21  ;;  %v1743_v21 = vmul.f32 %v9767_v9, %v9767_v9  ;;  %v1742_v58 = vmul.f32 %v9771_v36, %v9771_v36  ;;  %v7520_v42 = vadd.f32 -0.5, %v2259_v1  ;;  %v1904_v33 = vmul.f32 0.6931472, %v3579_v6 }
 0x28a   : > { %9776 = vst [vmem:[#allocation115_spill] sm:$0xff] %v7511_v51  ;;  %v3581_v4 = vpop.eup %3580  ;;  %3588 = vlog2.f32 %v9769_v60  ;;  %v2140_v1 = vadd.f32 %v2076_v0, %v1745_v17  ;;  %v2139_v6 = vadd.f32 %v2075_v28, %v1744_v31  ;;  %v9787_v28 = vld [vmem:[#allocation70_spill] sm:$0xff] }
 0x28b   : > { %v3022_v26 = vpack.c.bf16 %v1745_v17, %v1743_v21  ;;  %v3024_v47 = vpack.c.bf16 %v1744_v31, %v1742_v58  ;;  %9780 = vst [vmem:[#allocation180_spill] sm:$0xff] %v7520_v42  ;;  %v2138_v20 = vadd.f32 %v2074_v24, %v1743_v21  ;;  %v1908_v27 = vmul.f32 0.6931472, %v3581_v4  ;;  %v9782_v24 = vld [vmem:[#allocation218_spill] sm:$0xff] }
 0x28c   : > { %v2006_v16 = vsub.f32 0.0, %v1904_v33  ;;  %3590 = vlog2.f32 %v9771_v36  ;;  %v3583_v9 = vpop.eup %3582  ;;  %v1749_v60 = vmul.f32 %v9782_v24, %v9782_v24  ;;  %v2078_v33 = vmul.f32 %v9755_v2, %v9755_v2  ;;  %v9783_v36 = vld [vmem:[#allocation226_spill] sm:$0xff] }
 0x28d   : > { %3023 = vmatprep.subr.bf16.mxu1 %v3022_v26  ;;  %v2199_v26 = vmul.f32 0.5, %v2135_v38  ;;  %3592 = vlog2.f32 %v9772_v63  ;;  %v2008_v14 = vsub.f32 0.0, %v1908_v27  ;;  %v9781_v38 = vld [vmem:[#allocation100_spill] sm:$0xff]  ;;  %v1902_v12 = vmul.f32 0.6931472, %v3583_v9  ;;  %v9789_v27 = vld [vmem:[#allocation86_spill] sm:$0xff] }
 0x28e   : > { %3025 = vmatpush1.bf16.xpose.msra.mxu1 %v3024_v47  ;;  %v1747_v21 = vmul.f32 %v9781_v38, %v9781_v38  ;;  %v3585_v47 = vpop.eup %3584  ;;  %v1746_v17 = vmul.f32 %v9783_v36, %v9783_v36  ;;  %v9790_v9 = vld [vmem:[#allocation88_spill] sm:$0xff]  ;;  %v2080_v42 = vmul.f32 %v9694_v3, %v9694_v3  ;;  %3594 = vlog2.f32 %v9781_v38 }
 0x28f   : > { %v2264_v31 = vadd.f32 %v2200_v46, %v2008_v14  ;;  %v2005_v2 = vsub.f32 0.0, %v1902_v12  ;;  %v9793_v46 = vpack.c.bf16 %v9791_v32, %v9792_v40  ;;  %v9794_v14 = vld [vmem:[#allocation91_spill] sm:$0xff]  ;;  %v2204_v12 = vmul.f32 0.5, %v2140_v1 }
 0x290   : > { %2969 = vmatpush1.bf16.xpose.msra.mxu0 %v9775_v45  ;;  %v2197_v45 = vmul.f32 0.5, %v2133_v50  ;;  %v2262_v50 = vadd.f32 %v2198_v22, %v2006_v16  ;;  %v1906_v22 = vmul.f32 0.6931472, %v3585_v47  ;;  %v3026_v0 = vpack.c.bf16 %v1749_v60, %v1747_v21 }
 0x291   : > { %2971 = vmatprep.subr.bf16.mxu0 %v9779_v13  ;;  %v2137_v13 = vadd.f32 %v2073_v5, %v1742_v58  ;;  %v9784_v58 = vld [vmem:[#allocation101_spill] sm:$0xff]  ;;  %v9786_v5 = vld [vmem:[#allocation72_spill] sm:$0xff]  ;;  %v7555_v10 = vadd.f32 -0.5, %v2264_v31  ;;  %v2142_v25 = vadd.f32 %v2078_v33, %v1747_v21  ;;  %3596 = vlog2.f32 %v9782_v24 }
 0x292   : > { %v7538_v63 = vmul.f32 %v9784_v58, %v9784_v58  ;;  %v7540_v16 = vadd.f32 -0.5, %v2262_v50  ;;  %v9788_v4 = vpack.c.bf16 %v9786_v5, %v9787_v28  ;;  %v9795_v50 = vld [vmem:[#allocation93_spill] sm:$0xff]  ;;  %v2007_v29 = vsub.f32 0.0, %v1906_v22  ;;  %3027 = vmatprep.subr.bf16.mxu1 %v3026_v0  ;;  %v3587_v3 = vpop.eup %3586 }
 0x293   : > { %v2261_v59 = vadd.f32 %v2197_v45, %v2005_v2  ;;  %v2201_v51 = vmul.f32 0.5, %v2137_v13  ;;  %v1912_v31 = vmul.f32 0.6931472, %v3587_v3  ;;  %v2144_v22 = vadd.f32 %v2080_v42, %v1749_v60  ;;  %v9798_v13 = vld [vmem:[#allocation167_spill] sm:$0xff] }
 0x294   : > { %9785 = vst [vmem:[#allocation210_spill] sm:$0xff] %v7540_v16  ;;  %v3028_v15 = vpack.c.bf16 %v7538_v63, %v1746_v17  ;;  %v2263_v8 = vadd.f32 %v2199_v26, %v2007_v29  ;;  %v3589_v18 = vpop.eup %3588  ;;  %v2077_v1 = vmul.f32 %v9695_v11, %v9695_v11  ;;  %v1751_v38 = vmul.f32 %v9798_v13, %v9798_v13  ;;  %v9801_v11 = vld [vmem:[#allocation74_spill] sm:$0xff]  ;;  %v9803_v3 = vld [vmem:[#allocation79_spill] sm:$0xff] }
 0x295   : > { %v7560_v47 = vadd.f32 -0.5, %v2261_v59  ;;  %v2010_v26 = vsub.f32 0.0, %v1912_v31  ;;  %3598 = vlog2.f32 %v9783_v36  ;;  %v9799_v59 = vld [vmem:[#allocation171_spill] sm:$0xff]  ;;  %v2079_v2 = vmul.f32 %v9696_v49, %v9696_v49 }
 0x296   : > { %3029 = vmatpush1.bf16.xpose.msra.mxu1 %v3028_v15  ;;  %v7563_v45 = vadd.f32 -0.5, %v2263_v8  ;;  %v1916_v15 = vmul.f32 0.6931472, %v3589_v18  ;;  %v1753_v42 = vmul.f32 %v9799_v59, %v9799_v59  ;;  %3600 = vlog2.f32 %v9784_v58  ;;  %v9800_v18 = vld [vmem:[#allocation76_spill] sm:$0xff]  ;;  %v9817_v16 = vld [vmem:[#allocation103_spill] sm:$0xff] }
 0x297   : > { %9796 = vst [vmem:[#allocation243_spill] sm:$0xff] %v7560_v47  ;;  %v9802_v60 = vpack.c.bf16 %v9800_v18, %v9801_v11  ;;  %v9804_v31 = vpack.c.bf16 %v9710_v62, %v9803_v3  ;;  %v2082_v58 = vmul.f32 %v9697_v39, %v9697_v39  ;;  %v9809_v47 = vld [vmem:[#allocation92_spill] sm:$0xff]  ;;  %v2208_v39 = vmul.f32 0.5, %v2144_v22 }
 0x298   : > { %2973 = vmatpush1.bf16.xpose.msra.mxu0 %v9788_v4  ;;  %v2202_v4 = vmul.f32 0.5, %v2138_v20  ;;  %v3591_v20 = vpop.eup %3590  ;;  %9797 = vst [vmem:[#allocation116_spill] sm:$0xff] %v7563_v45  ;;  %v2012_v8 = vsub.f32 0.0, %v1916_v15  ;;  %v3030_v36 = vpack.c.bf16 %v1753_v42, %v1751_v38  ;;  %v2141_v15 = vadd.f32 %v2077_v1, %v1746_v17 }
 0x299   : > { %2975 = vmatprep.subr.bf16.mxu0 %v9793_v46  ;;  %v2203_v46 = vmul.f32 0.5, %v2139_v6  ;;  %v3593_v29 = vpop.eup %3592  ;;  %v1910_v6 = vmul.f32 0.6931472, %v3591_v20  ;;  %v2206_v17 = vmul.f32 0.5, %v2142_v25  ;;  %3602 = vlog2.f32 %v9798_v13 }
 0x29a   : > { %v1914_v24 = vmul.f32 0.6931472, %v3593_v29  ;;  %v2266_v33 = vadd.f32 %v2202_v4, %v2010_v26  ;;  %v2268_v20 = vadd.f32 %v2204_v12, %v2012_v8  ;;  %3031 = vmatprep.subr.bf16.mxu1 %v3030_v36  ;;  %v9806_v4 = vld [vmem:[#allocation178_spill] sm:$0xff]  ;;  %v3595_v1 = vpop.eup %3594  ;;  %v2084_v25 = vmul.f32 %v9698_v35, %v9698_v35 }
 0x29b   : > { %v2009_v0 = vsub.f32 0.0, %v1910_v6  ;;  %v1750_v26 = vmul.f32 %v9806_v4, %v9806_v4  ;;  %v9807_v6 = vld [vmem:[#allocation102_spill] sm:$0xff]  ;;  %v1920_v36 = vmul.f32 0.6931472, %v3595_v1  ;;  %v3597_v45 = vpop.eup %3596  ;;  %3604 = vlog2.f32 %v9799_v59 }
 0x29c   : > { %v2011_v21 = vsub.f32 0.0, %v1914_v24  ;;  %v7585_v29 = vadd.f32 -0.5, %v2266_v33  ;;  %v1752_v49 = vmul.f32 %v9807_v6, %v9807_v6  ;;  %v1924_v22 = vmul.f32 0.6931472, %v3597_v45 }
 0x29d   : > { %v2265_v56 = vadd.f32 %v2201_v51, %v2009_v0  ;;  %v2143_v0 = vadd.f32 %v2079_v2, %v7538_v63  ;;  %v2014_v13 = vsub.f32 0.0, %v1920_v36  ;;  %v9813_v63 = vpack.c.bf16 %v9712_v7, %v9711_v44  ;;  %v9815_v2 = vld [vmem:[#allocation230_spill] sm:$0xff] }
 0x29e   : > { %9805 = vst [vmem:[#allocation184_spill] sm:$0xff] %v7585_v29  ;;  %v2267_v12 = vadd.f32 %v2203_v46, %v2011_v21  ;;  %v3032_v24 = vpack.c.bf16 %v1752_v49, %v1750_v26  ;;  %v2146_v46 = vadd.f32 %v2082_v58, %v1751_v38  ;;  %v2081_v21 = vmul.f32 %v9774_v53, %v9774_v53  ;;  %v9814_v38 = vld [vmem:[#allocation104_spill] sm:$0xff] }
 0x29f   : > { %v7595_v8 = vadd.f32 -0.5, %v2265_v56  ;;  %v2083_v35 = vmul.f32 %v9773_v57, %v9773_v57  ;;  %3606 = vlog2.f32 %v9806_v4  ;;  %v1755_v59 = vmul.f32 %v9814_v38, %v9814_v38 }
 0x2a0   : > { %2977 = vmatpush1.bf16.xpose.msra.mxu0 %v9802_v60  ;;  %v9808_v60 = vld [vmem:[#allocation90_spill] sm:$0xff]  ;;  %v7600_v33 = vadd.f32 -0.5, %v2267_v12  ;;  %3033 = vmatpush1.bf16.xpose.msra.mxu1 %v3032_v24  ;;  %v3599_v12 = vpop.eup %3598  ;;  %v1757_v45 = vmul.f32 %v9815_v2, %v9815_v2  ;;  %v9816_v53 = vpack.c.bf16 %v9714_v48, %v9713_v55  ;;  %v2016_v58 = vsub.f32 0.0, %v1924_v22  ;;  %v9818_v22 = vld [vmem:[#allocation224_spill] sm:$0xff] }
 0x2a1   : > { %2979 = vmatprep.subr.bf16.mxu0 %v9804_v31  ;;  %v7593_v31 = vadd.f32 -0.5, %v2268_v20  ;;  %9811 = vst [vmem:[#allocation172_spill] sm:$0xff] %v7595_v8  ;;  %v2205_v20 = vmul.f32 0.5, %v2141_v15  ;;  %v3601_v15 = vpop.eup %3600  ;;  %v2270_v1 = vadd.f32 %v2206_v17, %v2014_v13  ;;  %v1918_v24 = vmul.f32 0.6931472, %v3599_v12 }
 0x2a2   : > { %9812 = vst [vmem:[#allocation117_spill] sm:$0xff] %v7600_v33  ;;  %3608 = vlog2.f32 %v9807_v6  ;;  %v2207_v36 = vmul.f32 0.5, %v2143_v0  ;;  %v1922_v57 = vmul.f32 0.6931472, %v3601_v15  ;;  %v3034_v4 = vpack.c.bf16 %v1757_v45, %v1755_v59 }
 0x2a3   : > { %9810 = vst [vmem:[#allocation212_spill] sm:$0xff] %v7593_v31  ;;  %v2272_v56 = vadd.f32 %v2208_v39, %v2016_v58  ;;  %v7624_v51 = vadd.f32 -0.5, %v2270_v1  ;;  %v2013_v8 = vsub.f32 0.0, %v1918_v24  ;;  %v2145_v33 = vadd.f32 %v2081_v21, %v1750_v26  ;;  %v3603_v39 = vpop.eup %3602  ;;  %v9820_v58 = vld [vmem:[#allocation84_spill] sm:$0xff] }
 0x2a4   : > { %v2015_v29 = vsub.f32 0.0, %v1922_v57  ;;  %v2147_v31 = vadd.f32 %v2083_v35, %v1752_v49  ;;  %3035 = vmatprep.subr.bf16.mxu1 %v3034_v4  ;;  %v1756_v17 = vmul.f32 %v9818_v22, %v9818_v22  ;;  %v2210_v0 = vmul.f32 0.5, %v2146_v46 }
 0x2a5   : > { %v7630_v13 = vadd.f32 -0.5, %v2272_v56  ;;  %v2269_v6 = vadd.f32 %v2205_v20, %v2013_v8  ;;  %3610 = vlog2.f32 %v9814_v38  ;;  %v2209_v35 = vmul.f32 0.5, %v2145_v33  ;;  %v3605_v56 = vpop.eup %3604  ;;  %v9821_v8 = vld [vmem:[#allocation82_spill] sm:$0xff]  ;;  %v9824_v38 = vld [vmem:[#allocation87_spill] sm:$0xff] }
 0x2a6   : > { %v1928_v15 = vmul.f32 0.6931472, %v3603_v39  ;;  %v9822_v20 = vpack.c.bf16 %v9820_v58, %v9821_v8  ;;  %3612 = vlog2.f32 %v9815_v2  ;;  %v9825_v33 = vpack.c.bf16 %v9718_v23, %v9824_v38 }
 0x2a7   : > { %v7637_v21 = vadd.f32 -0.5, %v2269_v6  ;;  %v1932_v1 = vmul.f32 0.6931472, %v3605_v56  ;;  %3614 = vlog2.f32 %v9817_v16 }
 0x2a8   : > { %2981 = vmatpush1.bf16.xpose.msra.mxu0 %v9813_v63  ;;  %v2148_v63 = vadd.f32 %v2084_v25, %v1753_v42  ;;  %v2086_v42 = vmul.f32 %v9778_v61, %v9778_v61  ;;  %v2271_v25 = vadd.f32 %v2207_v36, %v2015_v29  ;;  %v2088_v61 = vmul.f32 %v9777_v41, %v9777_v41 }
 0x2a9   : > { %2983 = vmatprep.subr.bf16.mxu0 %v9816_v53  ;;  %v1754_v53 = vmul.f32 %v9817_v16, %v9817_v16  ;;  %9819 = vst [vmem:[#allocation203_spill] sm:$0xff] %v7637_v21  ;;  %v2085_v29 = vmul.f32 %v9787_v28, %v9787_v28  ;;  %v2018_v24 = vsub.f32 0.0, %v1928_v15  ;;  %v3607_v57 = vpop.eup %3606  ;;  %v2087_v41 = vmul.f32 %v9786_v5, %v9786_v5  ;;  %v9826_v28 = vld [vmem:[#allocation231_spill] sm:$0xff]  ;;  %v9828_v21 = vld [vmem:[#allocation105_spill] sm:$0xff] }
 0x2aa   : > { %v2212_v12 = vmul.f32 0.5, %v2148_v63  ;;  %v7642_v46 = vadd.f32 -0.5, %v2271_v25  ;;  %v2150_v36 = vadd.f32 %v2086_v42, %v1755_v59  ;;  %3616 = vlog2.f32 %v9818_v22 }
 0x2ab   : > { %v3036_v26 = vpack.c.bf16 %v1756_v17, %v1754_v53  ;;  %v1759_v2 = vmul.f32 %v9826_v28, %v9826_v28  ;;  %v2020_v6 = vsub.f32 0.0, %v1932_v1  ;;  %v2274_v39 = vadd.f32 %v2210_v0, %v2018_v24  ;;  %v9829_v1 = vld [vmem:[#allocation106_spill] sm:$0xff] }
 0x2ac   : > { %9823 = vst [vmem:[#allocation118_spill] sm:$0xff] %v7642_v46  ;;  %v3609_v4 = vpop.eup %3608  ;;  %v1926_v25 = vmul.f32 0.6931472, %v3607_v57  ;;  %v2211_v16 = vmul.f32 0.5, %v2147_v31  ;;  %v2152_v15 = vadd.f32 %v2088_v61, %v1757_v45  ;;  %v2149_v56 = vadd.f32 %v2085_v29, %v1754_v53 }
 0x2ad   : > { %3037 = vmatpush1.bf16.xpose.msra.mxu1 %v3036_v26  ;;  %v9827_v26 = vld [vmem:[#allocation225_spill] sm:$0xff]  ;;  %v1930_v42 = vmul.f32 0.6931472, %v3609_v4  ;;  %v2151_v49 = vadd.f32 %v2087_v41, %v1756_v17  ;;  %v1758_v46 = vmul.f32 %v9828_v21, %v9828_v21  ;;  %v1760_v0 = vmul.f32 %v9829_v1, %v9829_v1 }
 0x2ae   : > { %v1761_v59 = vmul.f32 %v9827_v26, %v9827_v26  ;;  %v2017_v5 = vsub.f32 0.0, %v1926_v25  ;;  %v2214_v31 = vmul.f32 0.5, %v2150_v36  ;;  %v2090_v45 = vmul.f32 %v9792_v40, %v9792_v40 }
 0x2af   : > { %v2019_v22 = vsub.f32 0.0, %v1930_v42  ;;  %v3611_v53 = vpop.eup %3610  ;;  %v2216_v61 = vmul.f32 0.5, %v2152_v15  ;;  %v3040_v29 = vpack.c.bf16 %v1760_v0, %v1758_v46  ;;  %3618 = vlog2.f32 %v9826_v28 }
 0x2b0   : > { %2985 = vmatpush1.bf16.xpose.msra.mxu0 %v9822_v20  ;;  %v2276_v20 = vadd.f32 %v2212_v12, %v2020_v6  ;;  %v3038_v63 = vpack.c.bf16 %v1761_v59, %v1759_v2  ;;  %v2273_v57 = vadd.f32 %v2209_v35, %v2017_v5  ;;  %v9830_v12 = vpack.c.bf16 %v9790_v9, %v9789_v27  ;;  %v3613_v4 = vpop.eup %3612 }
 0x2b1   : > { %2987 = vmatprep.subr.bf16.mxu0 %v9825_v33  ;;  %v7662_v33 = vadd.f32 -0.5, %v2274_v39  ;;  %v2275_v17 = vadd.f32 %v2211_v16, %v2019_v22  ;;  %v9831_v41 = vpack.c.bf16 %v9795_v50, %v9794_v14  ;;  %v1936_v40 = vmul.f32 0.6931472, %v3611_v53  ;;  %v3615_v28 = vpop.eup %3614 }
 0x2b2   : > { %v7668_v24 = vadd.f32 -0.5, %v2276_v20  ;;  %3039 = vmatprep.subr.bf16.mxu1 %v3038_v63  ;;  %v7681_v36 = vadd.f32 -0.5, %v2273_v57  ;;  %v2092_v63 = vmul.f32 %v9791_v32, %v9791_v32  ;;  %v2213_v39 = vmul.f32 0.5, %v2149_v56 }
 0x2b3   : > { %v7685_v6 = vadd.f32 -0.5, %v2275_v17  ;;  %v2215_v25 = vmul.f32 0.5, %v2151_v49  ;;  %3620 = vlog2.f32 %v9827_v26  ;;  %v1940_v16 = vmul.f32 0.6931472, %v3613_v4 }
 0x2b4   : > { %v3094_v35 = vpack.c.bf16 %v7668_v24, %v7662_v33  ;;  %v2022_v42 = vsub.f32 0.0, %v1936_v40  ;;  %v2154_v15 = vadd.f32 %v2090_v45, %v1759_v2  ;;  %3622 = vlog2.f32 %v9828_v21  ;;  %v3617_v20 = vpop.eup %3616  ;;  %v9832_v45 = vld [vmem:[#allocation232_spill] sm:$0xff] }
 0x2b5   : > { %3041 = vmatpush1.bf16.xpose.msra.mxu1 %v3040_v29  ;;  %v3096_v5 = vpack.c.bf16 %v7685_v6, %v7681_v36  ;;  %v1934_v22 = vmul.f32 0.6931472, %v3615_v28  ;;  %v2089_v32 = vmul.f32 %v9801_v11, %v9801_v11  ;;  %3624 = vlog2.f32 %v9829_v1  ;;  %v1633_v24 = vld [vmem:[#allocation2] sm:$0xff] }
 0x2b6   : > { %v2024_v49 = vsub.f32 0.0, %v1940_v16  ;;  %v2278_v56 = vadd.f32 %v2214_v31, %v2022_v42  ;;  %v1938_v57 = vmul.f32 0.6931472, %v3617_v20  ;;  %v2156_v26 = vadd.f32 %v2092_v63, %v1761_v59  ;;  %v9836_v16 = vld [vmem:[#allocation192_spill] sm:$0xff] }
 0x2b7   : > { %v2021_v53 = vsub.f32 0.0, %v1934_v22  ;;  %v2091_v2 = vmul.f32 %v9800_v18, %v9800_v18  ;;  %v1763_v21 = vmul.f32 %v9832_v45, %v9832_v45  ;;  %v2218_v40 = vmul.f32 0.5, %v2154_v15  ;;  %v9837_v15 = vld [vmem:[#allocation107_spill] sm:$0xff] }
 0x2b8   : > { %2989 = vmatpush1.bf16.xpose.msra.mxu0 %v9830_v12  ;;  %v9833_v12 = vld [vmem:[#allocation227_spill] sm:$0xff]  ;;  %v2280_v29 = vadd.f32 %v2216_v61, %v2024_v49  ;;  %v2023_v11 = vsub.f32 0.0, %v1938_v57  ;;  %v9834_v1 = vpack.c.bf16 %v9809_v47, %v9808_v60  ;;  %v2153_v31 = vadd.f32 %v2089_v32, %v1758_v46 }
 0x2b9   : > { %2991 = vmatprep.subr.bf16.mxu0 %v9831_v41  ;;  %v1765_v17 = vmul.f32 %v9833_v12, %v9833_v12  ;;  %v7700_v41 = vadd.f32 -0.5, %v2278_v56  ;;  %v2277_v59 = vadd.f32 %v2213_v39, %v2021_v53  ;;  %v2094_v18 = vmul.f32 %v9803_v3, %v9803_v3  ;;  %v3619_v22 = vpop.eup %3618 }
 0x2ba   : > { %v9835_v4 = vpack.c.bf16 %v7324_v30, %v7321_v19  ;;  %v7710_v28 = vadd.f32 -0.5, %v2280_v29  ;;  %v2279_v61 = vadd.f32 %v2215_v25, %v2023_v11  ;;  %v1762_v42 = vmul.f32 %v9836_v16, %v9836_v16 }
 0x2bb   : > { %v3042_v63 = vpack.c.bf16 %v1765_v17, %v1763_v21  ;;  %v1764_v20 = vmul.f32 %v9837_v15, %v9837_v15  ;;  %v7716_v39 = vadd.f32 -0.5, %v2277_v59  ;;  %v2155_v46 = vadd.f32 %v2091_v2, %v1760_v0 }
 0x2bc   : > { %v2220_v32 = vmul.f32 0.5, %v2156_v26  ;;  %3626 = vlog2.f32 %v9832_v45  ;;  %v3098_v19 = vpack.c.bf16 %v7710_v28, %v7700_v41  ;;  %v7721_v30 = vadd.f32 -0.5, %v2279_v61  ;;  %v1710_v28 = vld [vmem:[#allocation3] sm:$0xff] }
 0x2bd   : > { %3043 = vmatprep.subr.bf16.mxu1 %v3042_v63  ;;  %v1944_v3 = vmul.f32 0.6931472, %v3619_v22  ;;  %v3044_v25 = vpack.c.bf16 %v1764_v20, %v1762_v42  ;;  %v3621_v49 = vpop.eup %3620  ;;  %v2217_v56 = vmul.f32 0.5, %v2153_v31  ;;  %v2096_v57 = vmul.f32 %v9710_v62, %v9710_v62  ;;  %v9841_v22 = vld [vmem:[#allocation166_spill] sm:$0xff] }
 0x2be   : > { %v2158_v53 = vadd.f32 %v2094_v18, %v1763_v21  ;;  %3628 = vlog2.f32 %v9833_v12  ;;  %v3623_v0 = vpop.eup %3622  ;;  %v3100_v26 = vpack.c.bf16 %v7721_v30, %v7716_v39  ;;  %v1948_v2 = vmul.f32 0.6931472, %v3621_v49  ;;  %v9838_v21 = vld [vmem:[#allocation28_spill] sm:$0xff]  ;;  %v1711_v39 = vld [vmem:[#allocation3 + $0x8] sm:$0xff] }
 0x2bf   : > { %v2026_v45 = vsub.f32 0.0, %v1944_v3  ;;  %3045 = vmatpush1.bf16.xpose.msra.mxu1 %v3044_v25  ;;  %3630 = vlog2.f32 %v9836_v16  ;;  %v3625_v29 = vpop.eup %3624  ;;  %v1942_v11 = vmul.f32 0.6931472, %v3623_v0  ;;  %v2095_v62 = vmul.f32 %v9712_v7, %v9712_v7  ;;  %v9840_v16 = vld [vmem:[#allocation234_spill] sm:$0xff] }
 0x2c0   : > { %2993 = vmatpush1.bf16.xpose.msra.mxu0 %v9834_v1  ;;  %v2093_v1 = vmul.f32 %v9711_v44, %v9711_v44  ;;  %3632 = vlog2.f32 %v9837_v15  ;;  %v2219_v12 = vmul.f32 0.5, %v2155_v46  ;;  %v2028_v59 = vsub.f32 0.0, %v1948_v2  ;;  %v9843_v2 = vld [vmem:[#allocation194_spill] sm:$0xff] }
 0x2c1   : > { %3059 = vmatprep.subr.bf16.mxu0 %v9835_v4  ;;  %v2282_v31 = vadd.f32 %v2218_v40, %v2026_v45  ;;  %v1946_v63 = vmul.f32 0.6931472, %v3625_v29  ;;  %v9839_v18 = vpack.c.bf16 %v7315_v54, %v7310_v43  ;;  %v2025_v4 = vsub.f32 0.0, %v1942_v11  ;;  %v9844_v29 = vld [vmem:[#allocation108_spill] sm:$0xff] }
 0x2c2   : > { %v2160_v61 = vadd.f32 %v2096_v57, %v1765_v17  ;;  %v1767_v44 = vmul.f32 %v9840_v16, %v9840_v16  ;;  %v1769_v7 = vmul.f32 %v9841_v22, %v9841_v22  ;;  %v9842_v15 = vpack.c.bf16 %v7341_v37, %v7334_v34 }
 0x2c3   : > { %v2284_v46 = vadd.f32 %v2220_v32, %v2028_v59  ;;  %v7745_v3 = vadd.f32 -0.5, %v2282_v31  ;;  %v2027_v40 = vsub.f32 0.0, %v1946_v63  ;;  %v2222_v25 = vmul.f32 0.5, %v2158_v53 }
 0x2c4   : > { %v2281_v49 = vadd.f32 %v2217_v56, %v2025_v4  ;;  %v2157_v43 = vadd.f32 %v2093_v1, %v1762_v42  ;;  %v2159_v54 = vadd.f32 %v2095_v62, %v1764_v20  ;;  %v3046_v0 = vpack.c.bf16 %v1769_v7, %v1767_v44 }
 0x2c5   : > { %v7747_v17 = vadd.f32 -0.5, %v2284_v46  ;;  %v2283_v57 = vadd.f32 %v2219_v12, %v2027_v40  ;;  %v1766_v45 = vmul.f32 %v9843_v2, %v9843_v2  ;;  %v1768_v11 = vmul.f32 %v9844_v29, %v9844_v29 }
 0x2c6   : > { %v3627_v34 = vpop.eup %3626  ;;  %v7753_v37 = vadd.f32 -0.5, %v2281_v49  ;;  %3047 = vmatprep.subr.bf16.mxu1 %v3046_v0  ;;  %v2098_v32 = vmul.f32 %v9713_v55, %v9713_v55  ;;  %v2100_v42 = vmul.f32 %v9714_v48, %v9714_v48  ;;  %3634 = vlog2.f32 %v9840_v16  ;;  %v9845_v16 = vld [vmem:[#allocation237_spill] sm:$0xff]  ;;  %v9848_v49 = vld [vmem:[#allocation111_spill] sm:$0xff] }
 0x2c7   : > { %1700 = vmatmul.mubr.f32.vlgmr.msra.gmra.mrb[0].mxu0 %v9838_v21  ;;  %v3102_v20 = vpack.c.bf16 %v7747_v17, %v7745_v3  ;;  %v7762_v56 = vadd.f32 -0.5, %v2283_v57  ;;  %v1952_v53 = vmul.f32 0.6931472, %v3627_v34  ;;  %v3048_v1 = vpack.c.bf16 %v1768_v11, %v1766_v45 }
 0x2c8   : > { %3061 = vmatpush1.bf16.xpose.msra.mxu0 %v9839_v18  ;;  %v3629_v62 = vpop.eup %3628  ;;  %v2221_v12 = vmul.f32 0.5, %v2157_v43  ;;  %v2223_v59 = vmul.f32 0.5, %v2159_v54  ;;  %v2224_v31 = vmul.f32 0.5, %v2160_v61  ;;  %3636 = vlog2.f32 %v9841_v22  ;;  %v9847_v22 = vld [vmem:[#allocation170_spill] sm:$0xff] }
 0x2c9   : > { %3063 = vmatprep.subr.bf16.mxu0 %v9842_v15  ;;  %v3631_v63 = vpop.eup %3630  ;;  %v3104_v55 = vpack.c.bf16 %v7762_v56, %v7753_v37  ;;  %v1956_v48 = vmul.f32 0.6931472, %v3629_v62  ;;  %v2030_v18 = vsub.f32 0.0, %v1952_v53  ;;  %3049 = vmatpush1.bf16.xpose.msra.mxu1 %v3048_v1  ;;  %3638 = vlog2.f32 %v9843_v2  ;;  %v9850_v53 = vld [vmem:[#allocation169_spill] sm:$0xff] }
 0x2ca   : > { %v3633_v4 = vpop.eup %3632  ;;  %v9846_v15 = vpack.c.bf16 %v7360_v52, %v9845_v16  ;;  %v1950_v46 = vmul.f32 0.6931472, %v3631_v63  ;;  %v2162_v40 = vadd.f32 %v2098_v32, %v1767_v44  ;;  %v2097_v61 = vmul.f32 %v9821_v8, %v9821_v8  ;;  %v9851_v32 = vld [vmem:[#allocation229_spill] sm:$0xff] }
 0x2cb   : > { %3640 = vlog2.f32 %v9844_v29  ;;  %v9849_v43 = vpack.c.bf16 %v9847_v22, %v9848_v49  ;;  %v2032_v54 = vsub.f32 0.0, %v1956_v48  ;;  %v2286_v0 = vadd.f32 %v2222_v25, %v2030_v18 }
 0x2cc   : > { %v1954_v57 = vmul.f32 0.6931472, %v3633_v4  ;;  %v2164_v2 = vadd.f32 %v2100_v42, %v1769_v7  ;;  %v2029_v34 = vsub.f32 0.0, %v1950_v46  ;;  %v2099_v52 = vmul.f32 %v9820_v58, %v9820_v58  ;;  %v9852_v42 = vld [vmem:[#allocation196_spill] sm:$0xff]  ;;  %v9853_v4 = vld [vmem:[#allocation109_spill] sm:$0xff] }
 0x2cd   : > { %v1771_v44 = vmul.f32 %v9850_v53, %v9850_v53  ;;  %v1773_v8 = vmul.f32 %v9851_v32, %v9851_v32  ;;  %v2288_v1 = vadd.f32 %v2224_v31, %v2032_v54  ;;  %v7783_v29 = vadd.f32 -0.5, %v2286_v0  ;;  %v9855_v54 = vld [vmem:[#allocation112_spill] sm:$0xff] }
 0x2ce   : > { %v2031_v62 = vsub.f32 0.0, %v1954_v57  ;;  %v2285_v63 = vadd.f32 %v2221_v12, %v2029_v34  ;;  %v2161_v16 = vadd.f32 %v2097_v61, %v1766_v45  ;;  %v2226_v48 = vmul.f32 0.5, %v2162_v40  ;;  %v9864_v45 = vld [vmem:[#allocation235_spill] sm:$0xff] }
 0x2cf   : > { %v3050_v25 = vpack.c.bf16 %v1773_v8, %v1771_v44  ;;  %v7785_v18 = vadd.f32 -0.5, %v2288_v1  ;;  %v1770_v58 = vmul.f32 %v9852_v42, %v9852_v42  ;;  %v2163_v31 = vadd.f32 %v2099_v52, %v1768_v11  ;;  %v9857_v52 = vld [vmem:[#allocation238_spill] sm:$0xff] }
 0x2d0   : > { %3065 = vmatpush1.bf16.xpose.msra.mxu0 %v9846_v15  ;;  %v2287_v7 = vadd.f32 %v2223_v59, %v2031_v62  ;;  %v1772_v15 = vmul.f32 %v9853_v4, %v9853_v4  ;;  %v3635_v46 = vpop.eup %3634  ;;  %v7791_v22 = vadd.f32 -0.5, %v2285_v63  ;;  %v2228_v49 = vmul.f32 0.5, %v2164_v2 }
 0x2d1   : > { %3067 = vmatprep.subr.bf16.mxu0 %v9849_v43  ;;  %3051 = vmatprep.subr.bf16.mxu1 %v3050_v25  ;;  %3642 = vlog2.f32 %v9850_v53  ;;  %v1960_v59 = vmul.f32 0.6931472, %v3635_v46  ;;  %v9854_v43 = vld [vmem:[#allocation233_spill] sm:$0xff]  ;;  %v2225_v57 = vmul.f32 0.5, %v2161_v16  ;;  %v2102_v11 = vmul.f32 %v9824_v38, %v9824_v38 }
 0x2d2   : > { %v7796_v12 = vadd.f32 -0.5, %v2287_v7  ;;  %v3052_v40 = vpack.c.bf16 %v1772_v15, %v1770_v58  ;;  %v3637_v61 = vpop.eup %3636  ;;  %v9856_v0 = vpack.c.bf16 %v9854_v43, %v9855_v54  ;;  %v2104_v2 = vmul.f32 %v9718_v23, %v9718_v23  ;;  %v9858_v53 = vld [vmem:[#allocation205_spill] sm:$0xff] }
 0x2d3   : > { %3644 = vlog2.f32 %v9851_v32  ;;  %v3639_v34 = vpop.eup %3638  ;;  %v9859_v1 = vpack.c.bf16 %v9857_v52, %v9858_v53  ;;  %v1964_v63 = vmul.f32 0.6931472, %v3637_v61  ;;  %v2034_v25 = vsub.f32 0.0, %v1960_v59  ;;  %v9860_v59 = vld [vmem:[#allocation189_spill] sm:$0xff] }
 0x2d4   : > { %3053 = vmatpush1.bf16.xpose.msra.mxu1 %v3052_v40  ;;  %3646 = vlog2.f32 %v9852_v42  ;;  %v1958_v38 = vmul.f32 0.6931472, %v3639_v34  ;;  %v2101_v23 = vmul.f32 %v9789_v27, %v9789_v27  ;;  %v2103_v32 = vmul.f32 %v9790_v9, %v9790_v9  ;;  %v9861_v42 = vld [vmem:[#allocation201_spill] sm:$0xff] }
 0x2d5   : > { %v3641_v16 = vpop.eup %3640  ;;  %3648 = vlog2.f32 %v9853_v4  ;;  %v2227_v7 = vmul.f32 0.5, %v2163_v31  ;;  %v2036_v46 = vsub.f32 0.0, %v1964_v63  ;;  %v2290_v43 = vadd.f32 %v2226_v48, %v2034_v25  ;;  %v9862_v25 = vld [vmem:[#allocation159_spill] sm:$0xff] }
 0x2d6   : > { %v1962_v54 = vmul.f32 0.6931472, %v3641_v16  ;;  %v2166_v61 = vadd.f32 %v2102_v11, %v1771_v44  ;;  %v1775_v40 = vmul.f32 %v9860_v59, %v9860_v59  ;;  %v1777_v34 = vmul.f32 %v9861_v42, %v9861_v42  ;;  %v9863_v11 = vld [vmem:[#allocation110_spill] sm:$0xff] }
 0x2d7   : > { %v2292_v52 = vadd.f32 %v2228_v49, %v2036_v46  ;;  %v7821_v53 = vadd.f32 -0.5, %v2290_v43  ;;  %v2165_v62 = vadd.f32 %v2101_v23, %v1770_v58  ;;  %v2167_v4 = vadd.f32 %v2103_v32, %v1772_v15  ;;  %v9865_v49 = vld [vmem:[#allocation113_spill] sm:$0xff]  ;;  %v9867_v15 = vld [vmem:[#allocation239_spill] sm:$0xff] }
 0x2d8   : > { %3069 = vmatpush1.bf16.xpose.msra.mxu0 %v9856_v0  ;;  %v2033_v0 = vsub.f32 0.0, %v1958_v38  ;;  %v2035_v27 = vsub.f32 0.0, %v1962_v54  ;;  %v3054_v31 = vpack.c.bf16 %v1777_v34, %v1775_v40  ;;  %v1774_v44 = vmul.f32 %v9862_v25, %v9862_v25 }
 0x2d9   : > { %3071 = vmatprep.subr.bf16.mxu0 %v9859_v1  ;;  %v2168_v1 = vadd.f32 %v2104_v2, %v1773_v8  ;;  %v7823_v63 = vadd.f32 -0.5, %v2292_v52  ;;  %v1776_v16 = vmul.f32 %v9863_v11, %v9863_v11  ;;  %v9866_v46 = vpack.c.bf16 %v9864_v45, %v9865_v49 }
 0x2da   : > { %v2289_v9 = vadd.f32 %v2225_v57, %v2033_v0  ;;  %v2291_v48 = vadd.f32 %v2227_v7, %v2035_v27  ;;  %v2230_v8 = vmul.f32 0.5, %v2166_v61  ;;  %3055 = vmatprep.subr.bf16.mxu1 %v3054_v31  ;;  %v2106_v58 = vmul.f32 %v9794_v14, %v9794_v14  ;;  %v9868_v57 = vld [vmem:[#allocation206_spill] sm:$0xff] }
 0x2db   : > { %v3643_v38 = vpop.eup %3642  ;;  %3650 = vlog2.f32 %v9860_v59  ;;  %v9869_v2 = vpack.c.bf16 %v9867_v15, %v9868_v57  ;;  %v3110_v23 = vpack.c.bf16 %v7823_v63, %v7821_v53  ;;  %v3056_v7 = vpack.c.bf16 %v1776_v16, %v1774_v44 }
 0x2dc   : > { %v7832_v43 = vadd.f32 -0.5, %v2289_v9  ;;  %v7842_v32 = vadd.f32 -0.5, %v2291_v48  ;;  %v1968_v45 = vmul.f32 0.6931472, %v3643_v38  ;;  %v2229_v0 = vmul.f32 0.5, %v2165_v62 }
 0x2dd   : > { %v3645_v54 = vpop.eup %3644  ;;  %v2231_v61 = vmul.f32 0.5, %v2167_v4  ;;  %v2232_v52 = vmul.f32 0.5, %v2168_v1  ;;  %3652 = vlog2.f32 %v9861_v42  ;;  %3057 = vmatpush1.bf16.xpose.msra.mxu1 %v3056_v7  ;;  %v2108_v38 = vmul.f32 %v9795_v50, %v9795_v50  ;;  %v9870_v4 = vld [vmem:[#allocation29_spill] sm:$0xff] }
 0x2de   : > { %v3647_v14 = vpop.eup %3646  ;;  %v1972_v27 = vmul.f32 0.6931472, %v3645_v54  ;;  %v2038_v9 = vsub.f32 0.0, %v1968_v45  ;;  %3654 = vlog2.f32 %v9862_v25  ;;  %v2170_v49 = vadd.f32 %v2106_v58, %v1775_v40 }
 0x2df   : > { %v3649_v31 = vpop.eup %3648  ;;  %v1966_v48 = vmul.f32 0.6931472, %v3647_v14  ;;  %3656 = vlog2.f32 %v9863_v11  ;;  %v2105_v57 = vmul.f32 %v9808_v60, %v9808_v60  ;;  %v1712_v25 = vmul.f32 %v9838_v21, %v9838_v21  ;;  %v9871_v11 = vld [vmem:[#allocation236_spill] sm:$0xff] }
 0x2e0   : > { %3073 = vmatpush1.bf16.xpose.msra.mxu0 %v9866_v46  ;;  %v2040_v62 = vsub.f32 0.0, %v1972_v27  ;;  %v2294_v1 = vadd.f32 %v2230_v8, %v2038_v9  ;;  %v1970_v42 = vmul.f32 0.6931472, %v3649_v31  ;;  %v1713_v46 = vmul.f32 %v9870_v4, %v9870_v4  ;;  %v9872_v8 = vld [vmem:[#allocation114_spill] sm:$0xff]  ;;  %v9874_v14 = vld [vmem:[#allocation240_spill] sm:$0xff] }
 0x2e1   : > { %3075 = vmatprep.subr.bf16.mxu0 %v9869_v2  ;;  %v2037_v15 = vsub.f32 0.0, %v1966_v48  ;;  %v2107_v50 = vmul.f32 %v9809_v47, %v9809_v47  ;;  %v3988_v40 = vmov 1.0   ;;  %v9873_v58 = vpack.c.bf16 %v9871_v11, %v9872_v8  ;;  %v9875_v27 = vld [vmem:[#allocation208_spill] sm:$0xff] }
 0x2e2   : > { %v2296_v2 = vadd.f32 %v2232_v52, %v2040_v62  ;;  %v2906_v45 = vadd.f32 -0.5, %v2294_v1  ;;  %v2039_v7 = vsub.f32 0.0, %v1970_v42  ;;  %1842 = vmatprep.mubr.f32.mxu1 %v1713_v46  ;;  %2429 = vmatprep.mubr.f32.mxu0 %v3988_v40  ;;  %v9876_v60 = vpack.c.bf16 %v9874_v14, %v9875_v27 }
 0x2e3   : > { %v2293_v54 = vadd.f32 %v2229_v0, %v2037_v15  ;;  %v2172_v52 = vadd.f32 %v2108_v38, %v1777_v34  ;;  %v2169_v62 = vadd.f32 %v2105_v57, %v1774_v44  ;;  %v2234_v1 = vmul.f32 0.5, %v2170_v49  ;;  %v9877_v44 = vld [vmem:[#allocation180_spill] sm:$0xff]  ;;  %v9878_v49 = vld [vmem:[#allocation115_spill] sm:$0xff] }
 0x2e4   : > { %v2908_v9 = vadd.f32 -0.5, %v2296_v2  ;;  %v2295_v21 = vadd.f32 %v2231_v61, %v2039_v7  ;;  %1843 = vmatmul.mubr.f32.vlgmr.msra.gmra.mrb[0].mxu1 %v1712_v25  ;;  %v2171_v4 = vadd.f32 %v2107_v50, %v1776_v16  ;;  %v9879_v57 = vpack.c.bf16 %v9877_v44, %v9878_v49  ;;  %v9880_v16 = vld [vmem:[#allocation210_spill] sm:$0xff] }
 0x2e5   : > { %v3651_v31 = vpop.eup %3650  ;;  %v2905_v48 = vadd.f32 -0.5, %v2293_v54  ;;  %v2233_v27 = vmul.f32 0.5, %v2169_v62  ;;  %v9897_v33 = vpack.c.bf16 %v7842_v32, %v7832_v43 }
 0x2e6   : > { %v3114_v47 = vpack.c.bf16 %v2908_v9, %v2906_v45  ;;  %v2907_v42 = vadd.f32 -0.5, %v2295_v21  ;;  %v1976_v46 = vmul.f32 0.6931472, %v3651_v31  ;;  %v2235_v61 = vmul.f32 0.5, %v2171_v4 }
 0x2e7   : > { %v3653_v59 = vpop.eup %3652  ;;  %v9881_v45 = vpack.c.bf16 %v7555_v10, %v9880_v16  ;;  %v9888_v10 = vld [vmem:[#allocation117_spill] sm:$0xff]  ;;  %v2465_v16 = vlaneseq (!%p2848_p6) }
 0x2e8   : > { %3077 = vmatpush1.bf16.xpose.msra.mxu0 %v9873_v58  ;;  %v3655_v11 = vpop.eup %3654  ;;  %v3116_v8 = vpack.c.bf16 %v2907_v42, %v2905_v48  ;;  %v1980_v0 = vmul.f32 0.6931472, %v3653_v59  ;;  %v2042_v15 = vsub.f32 0.0, %v1976_v46  ;;  %v2236_v58 = vmul.f32 0.5, %v2172_v52  ;;  %v9883_v42 = vld [vmem:[#allocation243_spill] sm:$0xff]  ;;  %v9885_v46 = vld [vmem:[#allocation212_spill] sm:$0xff] }
 0x2e9   : > { %3079 = vmatprep.subr.bf16.mxu0 %v9876_v60  ;;  %v3657_v14 = vpop.eup %3656  ;;  %v1974_v2 = vmul.f32 0.6931472, %v3655_v11  ;;  %v9886_v11 = vld [vmem:[#allocation184_spill] sm:$0xff]  ;;  %vm2467_vm14 = vcmp.lt.s32.totalorder (!%p2848_p6), %v2465_v16, 256 }
 0x2ea   : > { %v2044_v34 = vsub.f32 0.0, %v1980_v0  ;;  %v2298_v38 = vadd.f32 %v2234_v1, %v2042_v15  ;;  %v1978_v7 = vmul.f32 0.6931472, %v3657_v14  ;;  %v9882_v1 = vld [vmem:[#allocation116_spill] sm:$0xff]  ;;  %v9887_v0 = vpack.c.bf16 %v9885_v46, %v9886_v11 }
 0x2eb   : > { %v2041_v25 = vsub.f32 0.0, %v1974_v2  ;;  %v9884_v4 = vpack.c.bf16 %v9882_v1, %v9883_v42  ;;  %v9889_v15 = vld [vmem:[#allocation172_spill] sm:$0xff]  ;;  %v9891_v14 = vpack.c.bf16 %v7630_v13, %v7624_v51  ;;  %v9893_v2 = vld [vmem:[#allocation203_spill] sm:$0xff]  ;;  %v9895_v51 = vpack.c.bf16 %v7785_v18, %v7783_v29 }
 0x2ec   : > { %v2300_v50 = vadd.f32 %v2236_v58, %v2044_v34  ;;  %v2910_v59 = vadd.f32 -0.5, %v2298_v38  ;;  %v2043_v54 = vsub.f32 0.0, %v1978_v7  ;;  %v9890_v58 = vpack.c.bf16 %v9888_v10, %v9889_v15  ;;  %v2439_v34 = vld [vmem:[%s4438_s21] sm:$0x3] (!%p2848_p6) }
 0x2ed   : > { %v2297_v60 = vadd.f32 %v2233_v27, %v2041_v25  ;;  %v9892_v27 = vld [vmem:[#allocation118_spill] sm:$0xff]  ;;  %v9896_v13 = vpack.c.bf16 %v7796_v12, %v7791_v22  ;;  %v2460_v7 = vmul.f32 (!%p2848_p6), %v2439_v34, %v2439_v34 }
 0x2ee   : > { %v2912_v9 = vadd.f32 -0.5, %v2300_v50  ;;  %v2299_v21 = vadd.f32 %v2235_v61, %v2043_v54  ;;  %v9894_v61 = vpack.c.bf16 %v9892_v27, %v9893_v2 }
 0x2ef   : > { %v2909_v52 = vadd.f32 -0.5, %v2297_v60 }
 0x2f0   : > { %3081 = vmatpush1.bf16.xpose.msra.mxu0 %v9879_v57  ;;  %v3118_v31 = vpack.c.bf16 %v2912_v9, %v2910_v59  ;;  %v2911_v48 = vadd.f32 -0.5, %v2299_v21 }
 0x2f1   : > { %3083 = vmatprep.subr.bf16.mxu0 %v9881_v45 }
 0x2f2   : > { %v3120_v62 = vpack.c.bf16 %v2911_v48, %v2909_v52 }
 0x2f8   : > { %3085 = vmatpush1.bf16.xpose.msra.mxu0 %v9884_v4 }
 0x2f9   : > { %3087 = vmatprep.subr.bf16.mxu0 %v9887_v0 }
 0x300   : > { %3089 = vmatpush1.bf16.xpose.msra.mxu0 %v9890_v58 }
 0x301   : > { %3091 = vmatprep.subr.bf16.mxu0 %v9891_v14 }
 0x308   : > { %3093 = vmatpush1.bf16.xpose.msra.mxu0 %v9894_v61 }
 0x309   : > { %3095 = vmatprep.subr.bf16.mxu0 %v3094_v35  ;;  %v1634_v35 = vld [vmem:[#allocation2 + $0x8] sm:$0xff] }
 0x310   : > { %3097 = vmatpush1.bf16.xpose.msra.mxu0 %v3096_v5 }
 0x311   : > { %3099 = vmatprep.subr.bf16.mxu0 %v3098_v19 }
 0x318   : > { %3101 = vmatpush1.bf16.xpose.msra.mxu0 %v3100_v26 }
 0x319   : > { %3103 = vmatprep.subr.bf16.mxu0 %v3102_v20  ;;  %v2440_v20 = vld [vmem:[%s4444_s23] sm:$0x3] (!%p2848_p6) }
 0x31a   : > { %v2442_v56 = vand.u32 (!%p2848_p6), 2147483647, %v2440_v20  ;;  %v2441_v32 = vmax.f32 (!%p2848_p6), %v2440_v20, 0.0 }
 0x320   : > { %3105 = vmatpush1.bf16.xpose.msra.mxu0 %v3104_v55  ;;  %v2443_v55 = vsub.f32 (!%p2848_p6), 0.0, %v2442_v56 }
 0x321   : > { %3107 = vmatprep.subr.bf16.mxu0 %v9895_v51 }
 0x322   : > { %v2444_v29 = vmul.f32 (!%p2848_p6), 1.442695, %v2443_v55 }
 0x324   : > { %3658 = vpow2.f32 (!%p2848_p6), %v2444_v29 }
 0x328   : > { %3109 = vmatpush1.bf16.xpose.msra.mxu0 %v9896_v13 }
 0x329   : > { %3111 = vmatprep.subr.bf16.mxu0 %v3110_v23 }
 0x32e   : > { %v3659_v18 = vpop.eup (!%p2848_p6), %3658 }
 0x32f   : > { %v2446_v22 = vadd.f32 (!%p2848_p6), 1.0, %v3659_v18  ;;  %v2449_v12 = vmul.f32 (!%p2848_p6), -0.5, %v3659_v18  ;;  %v2452_v63 = vand.u32 (!%p2848_p6), 2147483647, %v3659_v18 }
 0x330   : > { %3113 = vmatpush1.bf16.xpose.msra.mxu0 %v9897_v33 }
 0x331   : > { %3115 = vmatprep.subr.bf16.mxu0 %v3114_v47  ;;  %3660 = vlog2.f32 (!%p2848_p6), %v2446_v22  ;;  %v2450_v53 = vadd.f32 (!%p2848_p6), 1.0, %v2449_v12  ;;  %vm2453_vm9 = vcmp.lt.f32.partialorder (!%p2848_p6), %v2452_v63, 0.0004427343 }
 0x333   : > { %v2451_v43 = vmul.f32 (!%p2848_p6), %v3659_v18, %v2450_v53 }
 0x338   : > { %3117 = vmatpush1.bf16.xpose.msra.mxu0 %v3116_v8 }
 0x339   : > { %3119 = vmatprep.subr.bf16.mxu0 %v3118_v31 }
 0x33b   : > { %v3661_v23 = vpop.eup (!%p2848_p6), %3660 }
 0x340   : > { %3121 = vmatpush1.bf16.xpose.msra.mxu0 %v3120_v62 }
 0x347   : > { %2430 = vmatmul.mubr.f32.vlgmr.msra.gmra.mrb[2].mxu0 %v3988_v40  ;;  %v2448_v40 = vmul.f32 (!%p2848_p6), 0.6931472, %v3661_v23 }
 0x349   : > { %v2454_v47 = vsel (!%p2848_p6), %vm2453_vm9, %v2451_v43, %v2448_v40 }
 0x34a   : > { %v2455_v8 = vadd.f32 (!%p2848_p6), %v2454_v47, %v2441_v32 }
 0x34c   : > { %3662 = vlog2.f32 (!%p2848_p6), %v2455_v8  ;;  %v2459_v38 = vmul.f32 (!%p2848_p6), %v2455_v8, %v2455_v8 }
 0x34e   : > { %v2461_v44 = vadd.f32 (!%p2848_p6), %v2460_v7, %v2459_v38 }
 0x350   : > { %v2462_v25 = vmul.f32 (!%p2848_p6), 0.5, %v2461_v44 }
 0x356   : > { %v3663_v49 = vpop.eup (!%p2848_p6), %3662 }
 0x357   : > { %v2457_v57 = vmul.f32 (!%p2848_p6), 0.6931472, %v3663_v49 }
 0x359   : > { %v2458_v45 = vsub.f32 (!%p2848_p6), 0.0, %v2457_v57 }
 0x35b   : > { %v2463_v50 = vadd.f32 (!%p2848_p6), %v2462_v25, %v2458_v45 }
 0x35d   : > { %v2914_v59 = vadd.f32 (!%p2848_p6), -0.5, %v2463_v50 }
 0x35f   : > { %2469 = vst.msk [vmem:[%s7178_s7] sm:$0x3] (!%p2848_p6), %vm2467_vm14, %v2914_v59 }
 0x39a   : > { %v1701_v36 = vpop.f32.mrb[0].mxu0 }
 0x39b   : > { %v1706_v6 = vadd.f32 %v1701_v36, %v1633_v24  ;;  %v1703_v5 = vpop.f32.mrb[1].mxu0 }
 0x39c   : > { %v1707_v41 = vadd.f32 %v1703_v5, %v1634_v35 }
 0x39d   : > { %1708 = vst [vmem:[#allocation2] sm:$0xff] %v1706_v6 }
 0x39e   : > { %1709 = vst [vmem:[#allocation2 + $0x8] sm:$0xff] %v1707_v41 }
 0x3b7   : > { %v1844_v19 = vpop.f32.mrb[0].mxu1 }
 0x3b8   : > { %v1849_v30 = vadd.f32 %v1844_v19, %v1710_v28  ;;  %v1846_v26 = vpop.f32.mrb[1].mxu1 }
 0x3b9   : > { %v1850_v3 = vadd.f32 %v1846_v26, %v1711_v39 }
 0x3ba   : > { %1851 = vst [vmem:[#allocation3] sm:$0xff] %v1849_v30 }
 0x3bb   : > { %1852 = vst [vmem:[#allocation3 + $0x8] sm:$0xff] %v1850_v3 }
 0x415   : > { %2438 = sbr.rel (%p2848_p6) target bundleno = 1052 (0x41c), region = 72 }
 0x41a   : > { %v2431_v17 = vpop.f32.mrb[2].mxu0 }
 0x41b   : > { %v2433_v37 = vpop.f32.mrb[3].mxu0 }
 0x41c PF: > { %v2477_v54 = vlaneseq  ;;  %v3989_v60 = vmov 1966171168   ;;  %v2473_v52 = vcombine.low %v2431_v17, %v2433_v37  ;;  %v2470_v1 = vld [vmem:[%s7178_s7] sm:$0x3]  ;;  %s9899_s19 = sld [smem:[#allocation22_spill]] }
 0x41d   : > { %v2475_v9 = vunpack.c.l.s4 %v3989_v60 }
 0x41e   : > { %v7921_v21 = vshrl.u32 %v2477_v54, 7  ;;  %vm2492_vm5 = vcmp.lt.s32.totalorder %v2477_v54, 256 }
 0x41f   : > { %v2476_v31 = vunpack.c.0.s8 %v2475_v9 }
 0x421   : > { %v2479_v48 = vsub.s32 %v2476_v31, %v7921_v21 }
 0x422   : > { %p2915_p10 = scmp.ne.s32.totalorder %s9899_s19, 1 }
 0x423   : > { %v2480_v62 = vrot.slane %v2473_v52, %v2479_v48  ;;  %v2500_v46 = vld [vmem:[%s4444_s23] sm:$0x3] (!%p2915_p10)  ;;  %v2518_v0 = vld [vmem:[#allocation3] sm:$0xff] (!%p2915_p10)  ;;  %v2519_v15 = vld [vmem:[#allocation3 + $0x8] sm:$0xff] (!%p2915_p10)  ;;  %v2545_v37 = vsub.s32 (!%p2915_p10), 0, %v7921_v21  ;;  %v2549_v56 = vsub.s32 (!%p2915_p10), 1, %v7921_v21 }
 0x424   : > { %2498 = sbr.rel (%p2915_p10) target bundleno = 1102 (0x44e), region = 76  ;;  %v2502_v11 = vand.u32 (!%p2915_p10), 2147483647, %v2500_v46  ;;  %v2520_v10 = vadd.f32 (!%p2915_p10), 1e-32, %v2518_v0  ;;  %v2536_v19 = vld [vmem:[%s4424_s15] sm:$0xff] (!%p2915_p10) }
 0x425   : > { %v2487_v42 = vrot.slane %v2480_v62, %v2479_v48  ;;  %v2521_v14 = vadd.f32 (!%p2915_p10), 1e-32, %v2519_v15  ;;  %v2537_v26 = vld [vmem:[%s4424_s15 + $0x8] sm:$0xff] (!%p2915_p10)  ;;  %v2499_v55 = vld [vmem:[%s4438_s21] sm:$0x3] (!%p2915_p10)  ;;  %v2501_v53 = vmax.f32 (!%p2915_p10), %v2500_v46, 0.0 }
 0x426   : > { %v2503_v58 = vsub.f32 (!%p2915_p10), 0.0, %v2502_v11  ;;  %3664 = vrsqrt.f32 (!%p2915_p10), %v2520_v10  ;;  %vm2524_vm10 = vcmp.eq.f32.partialorder (!%p2915_p10), %v2520_v10, inf  ;;  %v2527_v36 = vand.u32 (!%p2915_p10), 2147483648, %v2520_v10  ;;  %v2516_v18 = vld [vmem:[#allocation2] sm:$0xff] (!%p2915_p10)  ;;  %v2517_v22 = vld [vmem:[#allocation2 + $0x8] sm:$0xff] (!%p2915_p10) }
 0x427   : > { %v2489_v4 = vadd.f32 %v2487_v42, %v2470_v1  ;;  %3666 = vrsqrt.f32 (!%p2915_p10), %v2521_v14  ;;  %vm2531_vm12 = vcmp.eq.f32.partialorder (!%p2915_p10), %v2521_v14, inf  ;;  %v2534_v6 = vand.u32 (!%p2915_p10), 2147483648, %v2521_v14  ;;  %v2555_v8 = vld [vmem:[%s531_s5] sm:$0x3] (!%p2915_p10) }
 0x428   : > { %v2504_v27 = vmul.f32 (!%p2915_p10), 1.442695, %v2503_v58  ;;  %vm2526_vm13 = vcmp.eq.f32.partialorder (!%p2915_p10), %v2520_v10, 0.0  ;;  %vm2533_vm15 = vcmp.eq.f32.partialorder (!%p2915_p10), %v2521_v14, 0.0  ;;  %v2546_v23 = vrot.slane (!%p2915_p10), %v2499_v55, %v2545_v37 }
 0x429   : > { %2494 = vst.msk [vmem:[%s7178_s7] sm:$0x3] %vm2492_vm5, %v2489_v4  ;;  %v2550_v40 = vrot.slane (!%p2915_p10), %v2499_v55, %v2549_v56 }
 0x42a   : > { %3668 = vpow2.f32 (!%p2915_p10), %v2504_v27 }
 0x430   : > { %v3665_v2 = vpop.eup %3664 }
 0x431   : > { %v3667_v61 = vpop.eup %3666  ;;  %v2523_v33 = vmul.f32 %v3665_v2, %v2520_v10 }
 0x432   : > { %v2530_v24 = vmul.f32 %v3667_v61, %v2521_v14 }
 0x433   : > { %v2525_v5 = vsel %vm2524_vm10, %v2520_v10, %v2523_v33 }
 0x434   : > { %v3669_v51 = vpop.eup %3668  ;;  %v2532_v41 = vsel %vm2531_vm12, %v2521_v14, %v2530_v24  ;;  %v2528_v39 = vsel %vm2526_vm13, %v2527_v36, %v2525_v5 }
 0x435   : > { %v2506_v13 = vadd.f32 1.0, %v3669_v51  ;;  %v2509_v35 = vmul.f32 -0.5, %v3669_v51  ;;  %v2535_v30 = vsel %vm2533_vm15, %v2534_v6, %v2532_v41  ;;  %v2512_v3 = vand.u32 2147483647, %v3669_v51 }
 0x436   : > { %v2538_v17 = vmul.f32 %v2536_v19, %v2528_v39  ;;  %v2539_v20 = vmul.f32 %v2537_v26, %v2535_v30 }
 0x437   : > { %3670 = vlog2.f32 %v2506_v13  ;;  %v2510_v28 = vadd.f32 1.0, %v2509_v35  ;;  %vm2513_vm0 = vcmp.lt.f32.partialorder %v2512_v3, 0.0004427343 }
 0x438   : > { %v2540_v43 = vadd.f32 %v2538_v17, %v2516_v18  ;;  %v2541_v32 = vadd.f32 %v2539_v20, %v2517_v22 }
 0x439   : > { %v2511_v29 = vmul.f32 %v3669_v51, %v2510_v28 }
 0x43a   : > { %v2553_v38 = vadd.f32 %v2546_v23, %v2540_v43  ;;  %v2554_v44 = vadd.f32 %v2550_v40, %v2541_v32 }
 0x441   : > { %v3671_v12 = vpop.eup %3670 }
 0x442   : > { %v2508_v63 = vmul.f32 0.6931472, %v3671_v12 }
 0x444   : > { %v2514_v47 = vsel %vm2513_vm0, %v2511_v29, %v2508_v63 }
 0x445   : > { %v2515_v34 = vadd.f32 %v2514_v47, %v2501_v53 }
 0x447   : > { %v2556_v7 = vmul.f32 %v2555_v8, %v2515_v34 }
 0x449   : > { %v2561_v49 = vrot.slane %v2556_v7, %v2545_v37  ;;  %v2565_v57 = vrot.slane %v2556_v7, %v2549_v56 }
 0x44b   : > { %v2568_v25 = vadd.f32 %v2561_v49, %v2553_v38  ;;  %v2569_v16 = vadd.f32 %v2565_v57, %v2554_v44 }
 0x44d   : > { %2570 = vst [vmem:[%s7174_s4] sm:$0xff] %v2568_v25  ;;  %2571 = vst [vmem:[%s7174_s4 + $0x8] sm:$0xff] %v2569_v16 }
 0x44e PF: > { %s9901_s21 = sld [smem:[#allocation23_spill]]  ;;  %s9902_s24 = sld [smem:[#allocation306_spill]] }
 0x44f   : > { %s2592_s3 = sshll.u32 %s7174_s4, 4  ;;  %s2573_s0 = scalar_lea.sflag [#allocation6], %s4416_s25  ;;  %s2593_s3 = int_to_ptr.vmem [resolvable:$true] %s2592_s3 }
 0x450   : > { %s3792_s6 = scalar_lea.vmem %s2593_s3, 256  ;;  %p9903_p2 = scmp.ne.s32.totalorder %s8586_s1, 0 }
 0x451   : > { %p3793_p13 = scmp.ne.s32.totalorder %s2593_s3, %s3792_s6  ;;  %s3990_s12 = smov [#allocation12]  }
 0x452   : > { %s3796_s9 = sshll.u32 %s3990_s12, 4  ;;  %s3797_s9 = int_to_ptr.vmem [resolvable:$false] %s3796_s9 }
 0x453   : > { %p3794_p9 = pnand %p3793_p13, %p9903_p2  ;;  %s3798_s19 = scalar_lea.vmem %s3797_s9, 512 }
 0x454   : > { %s2928_s2 = sshll.u32 %s9901_s21, 8  ;;  %p3799_p4 = scmp.lt.s32.totalorder %s2593_s3, %s3797_s9 }
 0x455   : > { %s7944_s5 = scalar_lea.hbm %s9902_s24, %s2928_s2  ;;  %p3795_p5 = pneg %p3794_p9 }
 0x456   : > { %p3800_p0 = scmp.lt.s32.totalorder %s3798_s19, %s3792_s6 }
 0x458   : > { %p3801_p1 = por %p3800_p0, %p3799_p4 }
 0x45a   : > { %p3802_p7 = pnand %p3801_p1, %p3795_p5 }
 0x45c   : > { %3805 = shalt.err (!%p3802_p7)
}
 0x45d   : > { %s3806_s4 = scalar_lea.hbm %s7944_s5, 256  ;;  %s3810_s11 = scalar_lea.hbm %s9902_s24, 512 }
 0x45e   : > { %p3807_p11 = scmp.ne.s32.totalorder %s7944_s5, %s3806_s4  ;;  %p3811_p8 = scmp.lt.u32.totalorder %s7944_s5, %s9902_s24 }
 0x45f   : > { %p3812_p6 = scmp.lt.u32.totalorder %s3810_s11, %s3806_s4  ;;  %p3814_p13 = scmp.lt.u32.totalorder %s3806_s4, %s7944_s5 }
 0x460   : > { %p3808_p3 = pnand %p3807_p11, %p9903_p2 }
 0x461   : > { %p3813_p10 = por %p3812_p6, %p3811_p8 }
 0x462   : > { %p3809_p12 = pneg %p3808_p3 }
 0x463   : > { %p3815_p9 = por %p3814_p13, %p3813_p10 }
 0x465   : > { %p3816_p5 = pnand %p3815_p9, %p3809_p12 }
 0x467   : > { %3819 = shalt.err (!%p3816_p5)
}
 0x468   : > { %3130 = dma.vmem_to_hbm [thread:$0]  (%p9903_p2), %s2593_s3, 256, %s7944_s5, %s2573_s0  }
 0x469   : > { %s2929_s8 = sshll.u32 %s9901_s21, 5  ;;  %s2606_s6 = sshll.u32 %s7178_s7, 4  ;;  %s2607_s6 = int_to_ptr.vmem [resolvable:$true] %s2606_s6 }
 0x46a   : > { %s9904_s19 = sld [smem:[#allocation307_spill]]  ;;  %s2578_s4 = scalar_lea.sflag [#allocation14], %s4416_s25 }
 0x46b   : > { %s3820_s23 = scalar_lea.vmem %s2607_s6, 32  ;;  %s3991_s11 = smov [#allocation13]  }
 0x46c   : > { %p3821_p4 = scmp.ne.s32.totalorder %s2607_s6, %s3820_s23  ;;  %s3824_s2 = sshll.u32 %s3991_s11, 4  ;;  %s3825_s2 = int_to_ptr.vmem [resolvable:$false] %s3824_s2 }
 0x46d   : > { %s3826_s16 = scalar_lea.vmem %s3825_s2, 64  ;;  %p3827_p7 = scmp.lt.s32.totalorder %s2607_s6, %s3825_s2 }
 0x46e   : > { %p3822_p0 = pnand %p3821_p4, %p9903_p2  ;;  %p3828_p11 = scmp.lt.s32.totalorder %s3826_s16, %s3820_s23 }
 0x470   : > { %s7970_s15 = scalar_lea.hbm %s9904_s19, %s2929_s8  ;;  %p3823_p1 = pneg %p3822_p0 }
 0x471   : > { %p3829_p3 = por %p3828_p11, %p3827_p7 }
 0x473   : > { %p3830_p12 = pnand %p3829_p3, %p3823_p1 }
 0x475   : > { %3833 = shalt.err (!%p3830_p12)
}
 0x476   : > { %s3834_s25 = scalar_lea.hbm %s7970_s15, 32  ;;  %s3838_s5 = scalar_lea.hbm %s9904_s19, 64 }
 0x477   : > { %p3835_p8 = scmp.ne.s32.totalorder %s7970_s15, %s3834_s25  ;;  %p3839_p13 = scmp.lt.u32.totalorder %s7970_s15, %s9904_s19 }
 0x478   : > { %p3840_p9 = scmp.lt.u32.totalorder %s3838_s5, %s3834_s25  ;;  %p3842_p4 = scmp.lt.u32.totalorder %s3834_s25, %s7970_s15 }
 0x479   : > { %p3836_p6 = pnand %p3835_p8, %p9903_p2 }
 0x47a   : > { %p3841_p5 = por %p3840_p9, %p3839_p13 }
 0x47b   : > { %p3837_p10 = pneg %p3836_p6 }
 0x47c   : > { %p3843_p0 = por %p3842_p4, %p3841_p5 }
 0x47e   : > { %p3844_p1 = pnand %p3843_p0, %p3837_p10 }
 0x480   : > { %3847 = shalt.err (!%p3844_p1)
}
 0x481   : > { %3131 = dma.vmem_to_hbm [thread:$0]  (%p9903_p2), %s2607_s6, 32, %s7970_s15, %s2578_s4  }
 0x482 PF: > { %p3155_p7 = scmp.ge.s32.totalorder %s3978_s18, 2  ;;  %s2618_s8 = sand.u32 1, %s3926_s27  }
 0x483   : > { %p9905_p11 = scmp.ne.s32.totalorder %s8587_s20, 0  ;;  %s2619_s12 = scalar_lea.sflag [#allocation6], %s2618_s8 }
 0x485   : > { %p3148_p3 = pnand %p3155_p7, %p9905_p11 }
 0x487   : > { %3917 = dma.done.wait (!%p3148_p3), %s2619_s12, 256  }
 0x488   : > { %3919 = vsyncadd (!%p3148_p3), %s2619_s12, 4294967040  ;;  %s2628_s9 = scalar_lea.sflag [#allocation14], %s2618_s8 }
 0x489   : > { %3921 = dma.done.wait (!%p3148_p3), %s2628_s9, 32  }
 0x48a   : > { %3923 = vsyncadd (!%p3148_p3), %s2628_s9, 4294967264  ;;  %s34_s18 = sadd.s32 1, %s3978_s18   ;;  %s9907_s6 = sld [smem:[#allocation20_spill]] }
 0x48b   : > { %p7995_p12 = scmp.ge.s32.totalorder %s34_s18, 6   ;;  %s9908_s11 = sld [smem:[#allocation21_spill]] }
 0x48c   : > { %s9909_s20 = sld [smem:[#allocation24_spill]]  ;;  %s9910_s16 = sld [smem:[#allocation25_spill]] }
 0x48d   : > { %s9911_s4 = smov %s9928_s14  ;;  %s9912_s27 = smov %s3930_s28 }
 0x48e   : > { %s9913_s28 = smov %s3934_s29  ;;  %s9914_s29 = smov %s4352_s30 }
 0x48f   : > { %s9916_s9 = smov %s3946_s10  ;;  %s9917_s10 = smov %s4357_s22 }
 0x490   : > { %s9915_s30 = smov %s9907_s6  ;;  %s9918_s12 = smov %s3958_s13 }
 0x491   : > { %s9919_s13 = smov %s4236_s26  ;;  %s9921_s15 = smov %s3974_s17 }
 0x492   : > { %s9920_s14 = smov %s9909_s20  ;;  %s9922_s17 = smov %s9911_s4 }
 0x493   :  { %33 = sbr.rel (!%p7995_p12) target bundleno = 26 (0x1a), region = 168 }
 0x49a   :  { %2633 = vsyncpa [#allocation5], 1 }
 0x49b   :  { %2635 = vsyncpa [#allocation5 + $0x1], 1 }
 0x49c   :  { %2636 = vsyncpa [#allocation8], 1 }
 0x49d   :  { %2638 = vsyncpa [#allocation8 + $0x1], 1 }
 0x49e   :  { %2639 = vsyncpa [#allocation11], 1 }
 0x49f   :  { %2641 = vsyncpa [#allocation11 + $0x1], 1 }
 0x4a0   :  { %2642 = vsyncpa [#allocation6], 1 }
 0x4a1   :  { %2644 = vsyncpa [#allocation6 + $0x1], 1 }
 0x4a2   :  { %2645 = vsyncpa [#allocation14], 1 }
 0x4a3   :  { %2647 = vsyncpa [#allocation14 + $0x1], 1 }

</bundles_post_ra>
